<compile_context>
chip_gen: v7x
topology: tpu7x:2x2x1
jax: 0.10.0
libtpu: 0.0.40
codegen_flags: <defaults>
</compile_context>

<pallas_src>
import functools
import math

import jax
import jax.numpy as jnp
from jax import lax
from jax.experimental import pallas as pl
from jax.experimental.pallas import tpu as pltpu


def spatial_att_kernel(scal_ref, pln_l_ref, pln_c_ref, wa_ref, xl_ref, xc_ref,
                       out_ref, hl_ref, hc_ref, *, T, H, W, PAD):
    # scal_ref : (2,) SMEM          [bl + bc, ba]
    # pln_l_ref: (9, HW) VMEM       per-tap (weight x edge-mask) planes, lists conv
    # pln_c_ref: (9, HW) VMEM       per-tap (weight x edge-mask) planes, cur conv
    # wa_ref   : (1, HW) VMEM       spatial_attention full-map kernel (flattened)
    # xl_ref   : (Bblk, T*HW)       visual_lists block (lane-dense, T segments)
    # xc_ref   : (Bblk, HW)         visual_cur block
    # out_ref  : (Bblk, HW)         semantic output block (sublane+lane dense)
    # hl_ref/hc_ref: VMEM halo staging buffers
    HW = H * W
    THW = T * HW
    Bblk = out_ref.shape[0]
    bias = scal_ref[0]            # conv biases bl + bc, folded on the host
    ba = scal_ref[1]              # spatial_attention bias (cancels in softmax)

    # ---- stage the inputs into lane-padded halo buffers -------------------
    # Margins are zeroed every step (not only at program_id == 0) so the
    # kernel stays correct when the "parallel" grid axis is sharded across
    # TensorCores (each core sees an arbitrary subset of steps).  All stores
    # start at 128-aligned lane offsets; the right-margin zero starts at the
    # last aligned lane before the margin and its overlap with the data
    # region is rewritten by the (later) center store.
    rz_l = (PAD + THW) // 128 * 128
    rz_c = (PAD + HW) // 128 * 128
    hl_w = hl_ref.shape[1]
    hc_w = hc_ref.shape[1]
    hl_ref[:, pl.ds(0, PAD)] = jnp.zeros((Bblk, PAD), jnp.float32)
    hc_ref[:, pl.ds(0, PAD)] = jnp.zeros((Bblk, PAD), jnp.float32)
    hl_ref[:, pl.ds(rz_l, hl_w - rz_l)] = jnp.zeros((Bblk, hl_w - rz_l), jnp.float32)
    hc_ref[:, pl.ds(rz_c, hc_w - rz_c)] = jnp.zeros((Bblk, hc_w - rz_c), jnp.float32)
    hl_ref[:, pl.ds(PAD, THW)] = xl_ref[...]
    hc_ref[:, pl.ds(PAD, HW)] = xc_ref[...]

    # tap shifts for PyTorch Conv2d(3x3, padding=1) cross-correlation; the
    # ordering matches the plane construction in the wrapper.
    shifts = [dy * W + dx for dy in (-1, 0, 1) for dx in (-1, 0, 1)]

    # per-tap masked conv weights, (1, HW) each, loaded once and reused
    wl_planes = [pln_l_ref[pl.ds(k, 1), :] for k in range(9)]
    wc_planes = [pln_c_ref[pl.ds(k, 1), :] for k in range(9)]

    # visual_cur 3x3 conv (+ both conv biases); shared by every list entry t.
    # Out-of-image taps are zero because the corresponding plane entry is 0,
    # and the halo margins hold zeros, so no garbage is ever multiplied.
    base_c = None
    for k, s in enumerate(shifts):
        term = hc_ref[:, pl.ds(PAD + s, HW)] * wc_planes[k]
        base_c = term if base_c is None else base_c + term
    base_c = base_c + bias                                   # (Bblk, HW)

    wa = wa_ref[...]                                         # (1, HW)

    # per-list-entry conv + attention logit (T is static -> Python unroll).
    # Reads that cross a segment boundary hit real data from the neighbouring
    # segment, but those positions are image edges and their plane entry is 0.
    logits = []
    for t in range(T):
        off = PAD + t * HW
        acc = None
        for k, s in enumerate(shifts):
            term = hl_ref[:, pl.ds(off + s, HW)] * wl_planes[k]
            acc = term if acc is None else acc + term
        s_map = jnp.tanh(acc + base_c)                       # (Bblk, HW)
        logits.append(jnp.sum(s_map * wa, axis=-1, keepdims=True) + ba)

    # softmax over the T logits, computed slab-wise on (Bblk, 1) values
    mx = logits[0]
    for lg in logits[1:]:
        mx = jnp.maximum(mx, lg)
    exps = [jnp.exp(lg - mx) for lg in logits]
    den = exps[0]
    for ex in exps[1:]:
        den = den + ex
    # approx=True would push this onto the EUP, but the denominator is a
    # single (Bblk, 1) slab, so keep the exact reciprocal for f32 accuracy.
    inv = pl.reciprocal(den, approx=False)                   # (Bblk, 1)

    # semantic = sum_t softmax_t * visual_lists[:, t]  (lane/sublane dense)
    sem = None
    for t in range(T):
        att_t = exps[t] * inv                                # (Bblk, 1)
        term = att_t * xl_ref[:, pl.ds(t * HW, HW)]
        sem = term if sem is None else sem + term
    out_ref[...] = sem


def _pick_block_b(batch, max_block=64):
    """Batch block size: a multiple of 8 (sublane-dense blocks) that divides
    the batch, capped at max_block, preferring >= 2 grid steps so v7x's two
    TensorCores both get work.  Falls back to the full batch (single step)
    when no such divisor exists (small or awkward batch sizes)."""
    cands = [d for d in range(8, max_block + 1, 8) if batch % d == 0]
    two_step = [d for d in cands if batch // d >= 2]
    if two_step:
        return max(two_step)
    if cands:
        return max(cands)
    return batch


def _edge_planes(w3x3, H, W):
    """(9, H*W) planes: tap-k conv weight at positions whose k-th 3x3
    neighbour lies inside the image, 0 elsewhere.  Folding weight and edge
    mask into one operand makes each in-kernel tap a single multiply and also
    makes the shifted halo/segment reads safe (masked positions contribute 0)."""
    HW = H * W
    pos = jnp.arange(HW, dtype=jnp.int32)
    row = pos // W
    col = pos % W
    planes = []
    for dy in (-1, 0, 1):
        for dx in (-1, 0, 1):
            ok = ((row + dy >= 0) & (row + dy < H) &
                  (col + dx >= 0) & (col + dx < W))
            planes.append(jnp.where(ok, w3x3[dy + 1, dx + 1], 0.0))
    return jnp.stack(planes, axis=0).astype(jnp.float32)      # (9, HW)


def spatial_att_forward(visual_lists, visual_cur, params, block_b=None):
    B, T, H, W = visual_lists.shape
    HW = H * W
    THW = T * HW
    if block_b is None:
        block_b = _pick_block_b(B)
    assert B % block_b == 0, "block_b must divide the batch size"
    assert block_b == B or block_b % 8 == 0, "block_b must be B or a multiple of 8"

    # Free reshapes: lane-dense flattened maps, each input DMA'd exactly once.
    xl = visual_lists.reshape(B, THW).astype(jnp.float32)
    xc = visual_cur.reshape(B, HW).astype(jnp.float32)
    wa = params["wa"].reshape(1, HW).astype(jnp.float32)
    planes_l = _edge_planes(params["wl"], H, W)
    planes_c = _edge_planes(params["wc"], H, W)
    scal = jnp.stack([params["bl"][0] + params["bc"][0],
                      params["ba"][0]]).astype(jnp.float32)    # (2,)

    pad = ((W + 2 + 127) // 128) * 128      # lane-aligned halo margin (>= W + 1)

    kernel = functools.partial(spatial_att_kernel, T=T, H=H, W=W, PAD=pad)
    smem = pl.BlockSpec(memory_space=pltpu.SMEM)

    out = pl.pallas_call(
        kernel,
        out_shape=jax.ShapeDtypeStruct((B, HW), jnp.float32),
        grid=(B // block_b,),
        in_specs=[
            smem,                                              # [bl+bc, ba]
            pl.BlockSpec((9, HW), lambda b: (0, 0)),           # lists weight planes
            pl.BlockSpec((9, HW), lambda b: (0, 0)),           # cur weight planes
            pl.BlockSpec((1, HW), lambda b: (0, 0)),           # spatial_attention w
            pl.BlockSpec((block_b, THW), lambda b: (b, 0)),    # visual_lists
            pl.BlockSpec((block_b, HW), lambda b: (b, 0)),     # visual_cur
        ],
        out_specs=pl.BlockSpec((block_b, HW), lambda b: (b, 0)),
        scratch_shapes=[
            pltpu.VMEM((block_b, pad + THW + pad), jnp.float32),  # lists halo
            pltpu.VMEM((block_b, pad + HW + pad), jnp.float32),   # cur halo
        ],
        compiler_params=pltpu.CompilerParams(
            dimension_semantics=("parallel",)),
    )(scal, planes_l, planes_c, wa, xl, xc)

    return out.reshape(B, H, W)


def reference_forward(visual_lists, visual_cur, params):
    """Pure-JAX reference matching the PyTorch module."""
    B, T, H, W = visual_lists.shape
    dn = ("NCHW", "OIHW", "NCHW")
    wl = params["wl"].reshape(1, 1, 3, 3)
    wc = params["wc"].reshape(1, 1, 3, 3)
    x = visual_lists.reshape(B * T, 1, H, W)
    conv_l = lax.conv_general_dilated(x, wl, (1, 1), ((1, 1), (1, 1)),
                                      dimension_numbers=dn) + params["bl"][0]
    conv_c = lax.conv_general_dilated(visual_cur, wc, (1, 1), ((1, 1), (1, 1)),
                                      dimension_numbers=dn) + params["bc"][0]
    s = jnp.tanh(conv_l.reshape(B, T, H, W) + conv_c)                # (B, T, H, W)
    logits = jnp.sum(s * params["wa"][None, None], axis=(2, 3)) + params["ba"][0]
    att = jax.nn.softmax(logits, axis=1)[:, :, None, None]           # (B, T, 1, 1)
    return jnp.sum(visual_lists * att, axis=1)                       # (B, H, W)


def init_params(key, H, W):
    """xavier_uniform(gain=sqrt(2)) conv weights like the module; biases are
    given small non-zero values so the folded-bias path is exercised by the
    correctness check (the module itself zero-inits them)."""
    gain = math.sqrt(2.0)
    k1, k2, k3, k4 = jax.random.split(key, 4)
    a3 = gain * math.sqrt(6.0 / (9 + 9))
    aA = gain * math.sqrt(6.0 / (H * W + H * W))
    return {
        "wl": jax.random.uniform(k1, (3, 3), jnp.float32, -a3, a3),
        "wc": jax.random.uniform(k2, (3, 3), jnp.float32, -a3, a3),
        "wa": jax.random.uniform(k3, (H, W), jnp.float32, -aA, aA),
        "bl": 0.1 * jax.random.normal(k4, (1,), jnp.float32),
        "bc": jnp.full((1,), -0.05, jnp.float32),
        "ba": jnp.full((1,), 0.3, jnp.float32),
    }


if __name__ == "__main__":
    # The module hard-codes spatial_attention kernel_size=(30, 40), so the
    # map must be H=30, W=40 for the forward pass to be well-formed.
    H, W = 30, 40
    key = jax.random.PRNGKey(0)
    kp, kx1, kx2, kx3, kx4 = jax.random.split(key, 5)
    params = init_params(kp, H, W)

    # Case 1: tiny batch -> single grid step (block_b == B).
    # Case 2: B=16 -> block_b=8, two "parallel" grid steps, exercising the
    #          batch-blocked path and per-step halo re-initialisation.
    cases = (((2, 4), kx1, kx2), ((16, 5), kx3, kx4))
    for (B, T), ka, kb in cases:
        visual_lists = jax.random.normal(ka, (B, T, H, W), jnp.float32)
        visual_cur = jax.random.normal(kb, (B, 1, H, W), jnp.float32)

        out = jax.block_until_ready(
            spatial_att_forward(visual_lists, visual_cur, params))
        ref = jax.block_until_ready(
            reference_forward(visual_lists, visual_cur, params))

        assert out.shape == (B, H, W)
        err = float(jnp.max(jnp.abs(out - ref)))
        assert err < 1e-4, f"mismatch vs pure-JAX reference (B={B}, T={T}): {err}"

    print("KERNEL_OK")
</pallas_src>

<mosaic_0001>
module attributes {stable_mosaic.version = 11 : i64} {
  func.func @spatial_att_kernel(%arg0: i32, %arg1: memref<2xf32, #tpu.memory_space<smem>>, %arg2: memref<9x1200xf32, #tpu.memory_space<vmem>>, %arg3: memref<9x1200xf32, #tpu.memory_space<vmem>>, %arg4: memref<1x1200xf32, #tpu.memory_space<vmem>>, %arg5: memref<2x4800xf32, #tpu.memory_space<vmem>>, %arg6: memref<2x1200xf32, #tpu.memory_space<vmem>>, %arg7: memref<2x1200xf32, #tpu.memory_space<vmem>>, %arg8: memref<2x5056xf32, #tpu.memory_space<vmem>>, %arg9: memref<2x1456xf32, #tpu.memory_space<vmem>>) attributes {dimension_semantics = [#tpu.dimension_semantics<parallel>], iteration_bounds = array<i64: 1>, scalar_prefetch = 0 : i64, scratch_operands = 2 : i64, tpu.core_type = #tpu.core_type<tc>, window_params = [{transform_indices = @transform_0, window_bounds = array<i64: 2>}, {pipeline_mode = #tpu.pipeline_mode<synchronous>, transform_indices = @transform_1, window_bounds = array<i64: 9, 1200>}, {pipeline_mode = #tpu.pipeline_mode<synchronous>, transform_indices = @transform_2, window_bounds = array<i64: 9, 1200>}, {pipeline_mode = #tpu.pipeline_mode<synchronous>, transform_indices = @transform_3, window_bounds = array<i64: 1, 1200>}, {transform_indices = @transform_4, window_bounds = array<i64: 2, 4800>}, {transform_indices = @transform_5, window_bounds = array<i64: 2, 1200>}, {transform_indices = @transform_6, window_bounds = array<i64: 2, 1200>}]} {
    %c0 = arith.constant 0 : index
    %0 = memref.load %arg1[%c0] : memref<2xf32, #tpu.memory_space<smem>>
    %c1 = arith.constant 1 : index
    %1 = memref.load %arg1[%c1] : memref<2xf32, #tpu.memory_space<smem>>
    %cst = arith.constant 0.000000e+00 : f32
    %2 = vector.broadcast %cst : f32 to vector<2x128xf32>
    %c0_0 = arith.constant 0 : index
    %c0_1 = arith.constant 0 : index
    %3 = vector.load %arg8[%c0_0, %c0_1] : memref<2x5056xf32, #tpu.memory_space<vmem>>, vector<2x128xf32>
    tpu.vector_store %arg8[%c0_0, %c0_1], %2 {strides = array<i32>} : memref<2x5056xf32, #tpu.memory_space<vmem>>, vector<2x128xf32>,
    %cst_2 = arith.constant 0.000000e+00 : f32
    %4 = vector.broadcast %cst_2 : f32 to vector<2x128xf32>
    %c0_3 = arith.constant 0 : index
    %c0_4 = arith.constant 0 : index
    %5 = vector.load %arg9[%c0_3, %c0_4] : memref<2x1456xf32, #tpu.memory_space<vmem>>, vector<2x128xf32>
    tpu.vector_store %arg9[%c0_3, %c0_4], %4 {strides = array<i32>} : memref<2x1456xf32, #tpu.memory_space<vmem>>, vector<2x128xf32>,
    %cst_5 = arith.constant 0.000000e+00 : f32
    %6 = vector.broadcast %cst_5 : f32 to vector<2x192xf32>
    %c0_6 = arith.constant 0 : index
    %c4864 = arith.constant 4864 : index
    %7 = vector.load %arg8[%c0_6, %c4864] : memref<2x5056xf32, #tpu.memory_space<vmem>>, vector<2x192xf32>
    tpu.vector_store %arg8[%c0_6, %c4864], %6 {strides = array<i32>} : memref<2x5056xf32, #tpu.memory_space<vmem>>, vector<2x192xf32>,
    %cst_7 = arith.constant 0.000000e+00 : f32
    %8 = vector.broadcast %cst_7 : f32 to vector<2x176xf32>
    %c0_8 = arith.constant 0 : index
    %c1280 = arith.constant 1280 : index
    %9 = vector.load %arg9[%c0_8, %c1280] : memref<2x1456xf32, #tpu.memory_space<vmem>>, vector<2x176xf32>
    tpu.vector_store %arg9[%c0_8, %c1280], %8 {strides = array<i32>} : memref<2x1456xf32, #tpu.memory_space<vmem>>, vector<2x176xf32>,
    %c0_9 = arith.constant 0 : index
    %c0_10 = arith.constant 0 : index
    %10 = vector.load %arg5[%c0_9, %c0_10] : memref<2x4800xf32, #tpu.memory_space<vmem>>, vector<2x4800xf32>
    %c0_11 = arith.constant 0 : index
    %c128 = arith.constant 128 : index
    %11 = vector.load %arg8[%c0_11, %c128] : memref<2x5056xf32, #tpu.memory_space<vmem>>, vector<2x4800xf32>
    tpu.vector_store %arg8[%c0_11, %c128], %10 {strides = array<i32>} : memref<2x5056xf32, #tpu.memory_space<vmem>>, vector<2x4800xf32>,
    %c0_12 = arith.constant 0 : index
    %c0_13 = arith.constant 0 : index
    %12 = vector.load %arg6[%c0_12, %c0_13] : memref<2x1200xf32, #tpu.memory_space<vmem>>, vector<2x1200xf32>
    %c0_14 = arith.constant 0 : index
    %c128_15 = arith.constant 128 : index
    %13 = vector.load %arg9[%c0_14, %c128_15] : memref<2x1456xf32, #tpu.memory_space<vmem>>, vector<2x1200xf32>
    tpu.vector_store %arg9[%c0_14, %c128_15], %12 {strides = array<i32>} : memref<2x1456xf32, #tpu.memory_space<vmem>>, vector<2x1200xf32>,
    %c0_16 = arith.constant 0 : index
    %c0_17 = arith.constant 0 : index
    %14 = vector.load %arg2[%c0_16, %c0_17] : memref<9x1200xf32, #tpu.memory_space<vmem>>, vector<1x1200xf32>
    %c1_18 = arith.constant 1 : index
    %c0_19 = arith.constant 0 : index
    %15 = vector.load %arg2[%c1_18, %c0_19] : memref<9x1200xf32, #tpu.memory_space<vmem>>, vector<1x1200xf32>
    %c2 = arith.constant 2 : index
    %c0_20 = arith.constant 0 : index
    %16 = vector.load %arg2[%c2, %c0_20] : memref<9x1200xf32, #tpu.memory_space<vmem>>, vector<1x1200xf32>
    %c3 = arith.constant 3 : index
    %c0_21 = arith.constant 0 : index
    %17 = vector.load %arg2[%c3, %c0_21] : memref<9x1200xf32, #tpu.memory_space<vmem>>, vector<1x1200xf32>
    %c4 = arith.constant 4 : index
    %c0_22 = arith.constant 0 : index
    %18 = vector.load %arg2[%c4, %c0_22] : memref<9x1200xf32, #tpu.memory_space<vmem>>, vector<1x1200xf32>
    %c5 = arith.constant 5 : index
    %c0_23 = arith.constant 0 : index
    %19 = vector.load %arg2[%c5, %c0_23] : memref<9x1200xf32, #tpu.memory_space<vmem>>, vector<1x1200xf32>
    %c6 = arith.constant 6 : index
    %c0_24 = arith.constant 0 : index
    %20 = vector.load %arg2[%c6, %c0_24] : memref<9x1200xf32, #tpu.memory_space<vmem>>, vector<1x1200xf32>
    %c7 = arith.constant 7 : index
    %c0_25 = arith.constant 0 : index
    %21 = vector.load %arg2[%c7, %c0_25] : memref<9x1200xf32, #tpu.memory_space<vmem>>, vector<1x1200xf32>
    %c8 = arith.constant 8 : index
    %c0_26 = arith.constant 0 : index
    %22 = vector.load %arg2[%c8, %c0_26] : memref<9x1200xf32, #tpu.memory_space<vmem>>, vector<1x1200xf32>
    %c0_27 = arith.constant 0 : index
    %c0_28 = arith.constant 0 : index
    %23 = vector.load %arg3[%c0_27, %c0_28] : memref<9x1200xf32, #tpu.memory_space<vmem>>, vector<1x1200xf32>
    %c1_29 = arith.constant 1 : index
    %c0_30 = arith.constant 0 : index
    %24 = vector.load %arg3[%c1_29, %c0_30] : memref<9x1200xf32, #tpu.memory_space<vmem>>, vector<1x1200xf32>
    %c2_31 = arith.constant 2 : index
    %c0_32 = arith.constant 0 : index
    %25 = vector.load %arg3[%c2_31, %c0_32] : memref<9x1200xf32, #tpu.memory_space<vmem>>, vector<1x1200xf32>
    %c3_33 = arith.constant 3 : index
    %c0_34 = arith.constant 0 : index
    %26 = vector.load %arg3[%c3_33, %c0_34] : memref<9x1200xf32, #tpu.memory_space<vmem>>, vector<1x1200xf32>
    %c4_35 = arith.constant 4 : index
    %c0_36 = arith.constant 0 : index
    %27 = vector.load %arg3[%c4_35, %c0_36] : memref<9x1200xf32, #tpu.memory_space<vmem>>, vector<1x1200xf32>
    %c5_37 = arith.constant 5 : index
    %c0_38 = arith.constant 0 : index
    %28 = vector.load %arg3[%c5_37, %c0_38] : memref<9x1200xf32, #tpu.memory_space<vmem>>, vector<1x1200xf32>
    %c6_39 = arith.constant 6 : index
    %c0_40 = arith.constant 0 : index
    %29 = vector.load %arg3[%c6_39, %c0_40] : memref<9x1200xf32, #tpu.memory_space<vmem>>, vector<1x1200xf32>
    %c7_41 = arith.constant 7 : index
    %c0_42 = arith.constant 0 : index
    %30 = vector.load %arg3[%c7_41, %c0_42] : memref<9x1200xf32, #tpu.memory_space<vmem>>, vector<1x1200xf32>
    %c8_43 = arith.constant 8 : index
    %c0_44 = arith.constant 0 : index
    %31 = vector.load %arg3[%c8_43, %c0_44] : memref<9x1200xf32, #tpu.memory_space<vmem>>, vector<1x1200xf32>
    %c0_45 = arith.constant 0 : index
    %c87 = arith.constant 87 : index
    %32 = vector.load %arg9[%c0_45, %c87] : memref<2x1456xf32, #tpu.memory_space<vmem>>, vector<2x1200xf32>
    %33 = vector.broadcast %23 : vector<1x1200xf32> to vector<2x1200xf32>
    %34 = arith.mulf %32, %33 : vector<2x1200xf32>
    %c0_46 = arith.constant 0 : index
    %c88 = arith.constant 88 : index
    %35 = vector.load %arg9[%c0_46, %c88] : memref<2x1456xf32, #tpu.memory_space<vmem>>, vector<2x1200xf32>
    %36 = vector.broadcast %24 : vector<1x1200xf32> to vector<2x1200xf32>
    %37 = arith.mulf %35, %36 : vector<2x1200xf32>
    %38 = arith.addf %34, %37 : vector<2x1200xf32>
    %c0_47 = arith.constant 0 : index
    %c89 = arith.constant 89 : index
    %39 = vector.load %arg9[%c0_47, %c89] : memref<2x1456xf32, #tpu.memory_space<vmem>>, vector<2x1200xf32>
    %40 = vector.broadcast %25 : vector<1x1200xf32> to vector<2x1200xf32>
    %41 = arith.mulf %39, %40 : vector<2x1200xf32>
    %42 = arith.addf %38, %41 : vector<2x1200xf32>
    %c0_48 = arith.constant 0 : index
    %c127 = arith.constant 127 : index
    %43 = vector.load %arg9[%c0_48, %c127] : memref<2x1456xf32, #tpu.memory_space<vmem>>, vector<2x1200xf32>
    %44 = vector.broadcast %26 : vector<1x1200xf32> to vector<2x1200xf32>
    %45 = arith.mulf %43, %44 : vector<2x1200xf32>
    %46 = arith.addf %42, %45 : vector<2x1200xf32>
    %c0_49 = arith.constant 0 : index
    %c128_50 = arith.constant 128 : index
    %47 = vector.load %arg9[%c0_49, %c128_50] : memref<2x1456xf32, #tpu.memory_space<vmem>>, vector<2x1200xf32>
    %48 = vector.broadcast %27 : vector<1x1200xf32> to vector<2x1200xf32>
    %49 = arith.mulf %47, %48 : vector<2x1200xf32>
    %50 = arith.addf %46, %49 : vector<2x1200xf32>
    %c0_51 = arith.constant 0 : index
    %c129 = arith.constant 129 : index
    %51 = vector.load %arg9[%c0_51, %c129] : memref<2x1456xf32, #tpu.memory_space<vmem>>, vector<2x1200xf32>
    %52 = vector.broadcast %28 : vector<1x1200xf32> to vector<2x1200xf32>
    %53 = arith.mulf %51, %52 : vector<2x1200xf32>
    %54 = arith.addf %50, %53 : vector<2x1200xf32>
    %c0_52 = arith.constant 0 : index
    %c167 = arith.constant 167 : index
    %55 = vector.load %arg9[%c0_52, %c167] : memref<2x1456xf32, #tpu.memory_space<vmem>>, vector<2x1200xf32>
    %56 = vector.broadcast %29 : vector<1x1200xf32> to vector<2x1200xf32>
    %57 = arith.mulf %55, %56 : vector<2x1200xf32>
    %58 = arith.addf %54, %57 : vector<2x1200xf32>
    %c0_53 = arith.constant 0 : index
    %c168 = arith.constant 168 : index
    %59 = vector.load %arg9[%c0_53, %c168] : memref<2x1456xf32, #tpu.memory_space<vmem>>, vector<2x1200xf32>
    %60 = vector.broadcast %30 : vector<1x1200xf32> to vector<2x1200xf32>
    %61 = arith.mulf %59, %60 : vector<2x1200xf32>
    %62 = arith.addf %58, %61 : vector<2x1200xf32>
    %c0_54 = arith.constant 0 : index
    %c169 = arith.constant 169 : index
    %63 = vector.load %arg9[%c0_54, %c169] : memref<2x1456xf32, #tpu.memory_space<vmem>>, vector<2x1200xf32>
    %64 = vector.broadcast %31 : vector<1x1200xf32> to vector<2x1200xf32>
    %65 = arith.mulf %63, %64 : vector<2x1200xf32>
    %66 = arith.addf %62, %65 : vector<2x1200xf32>
    %67 = vector.broadcast %0 : f32 to vector<2x1200xf32>
    %68 = arith.addf %66, %67 : vector<2x1200xf32>
    %c0_55 = arith.constant 0 : index
    %c0_56 = arith.constant 0 : index
    %69 = vector.load %arg4[%c0_55, %c0_56] : memref<1x1200xf32, #tpu.memory_space<vmem>>, vector<1x1200xf32>
    %c0_57 = arith.constant 0 : index
    %c87_58 = arith.constant 87 : index
    %70 = vector.load %arg8[%c0_57, %c87_58] : memref<2x5056xf32, #tpu.memory_space<vmem>>, vector<2x1200xf32>
    %71 = vector.broadcast %14 : vector<1x1200xf32> to vector<2x1200xf32>
    %72 = arith.mulf %70, %71 : vector<2x1200xf32>
    %c0_59 = arith.constant 0 : index
    %c88_60 = arith.constant 88 : index
    %73 = vector.load %arg8[%c0_59, %c88_60] : memref<2x5056xf32, #tpu.memory_space<vmem>>, vector<2x1200xf32>
    %74 = vector.broadcast %15 : vector<1x1200xf32> to vector<2x1200xf32>
    %75 = arith.mulf %73, %74 : vector<2x1200xf32>
    %76 = arith.addf %72, %75 : vector<2x1200xf32>
    %c0_61 = arith.constant 0 : index
    %c89_62 = arith.constant 89 : index
    %77 = vector.load %arg8[%c0_61, %c89_62] : memref<2x5056xf32, #tpu.memory_space<vmem>>, vector<2x1200xf32>
    %78 = vector.broadcast %16 : vector<1x1200xf32> to vector<2x1200xf32>
    %79 = arith.mulf %77, %78 : vector<2x1200xf32>
    %80 = arith.addf %76, %79 : vector<2x1200xf32>
    %c0_63 = arith.constant 0 : index
    %c127_64 = arith.constant 127 : index
    %81 = vector.load %arg8[%c0_63, %c127_64] : memref<2x5056xf32, #tpu.memory_space<vmem>>, vector<2x1200xf32>
    %82 = vector.broadcast %17 : vector<1x1200xf32> to vector<2x1200xf32>
    %83 = arith.mulf %81, %82 : vector<2x1200xf32>
    %84 = arith.addf %80, %83 : vector<2x1200xf32>
    %c0_65 = arith.constant 0 : index
    %c128_66 = arith.constant 128 : index
    %85 = vector.load %arg8[%c0_65, %c128_66] : memref<2x5056xf32, #tpu.memory_space<vmem>>, vector<2x1200xf32>
    %86 = vector.broadcast %18 : vector<1x1200xf32> to vector<2x1200xf32>
    %87 = arith.mulf %85, %86 : vector<2x1200xf32>
    %88 = arith.addf %84, %87 : vector<2x1200xf32>
    %c0_67 = arith.constant 0 : index
    %c129_68 = arith.constant 129 : index
    %89 = vector.load %arg8[%c0_67, %c129_68] : memref<2x5056xf32, #tpu.memory_space<vmem>>, vector<2x1200xf32>
    %90 = vector.broadcast %19 : vector<1x1200xf32> to vector<2x1200xf32>
    %91 = arith.mulf %89, %90 : vector<2x1200xf32>
    %92 = arith.addf %88, %91 : vector<2x1200xf32>
    %c0_69 = arith.constant 0 : index
    %c167_70 = arith.constant 167 : index
    %93 = vector.load %arg8[%c0_69, %c167_70] : memref<2x5056xf32, #tpu.memory_space<vmem>>, vector<2x1200xf32>
    %94 = vector.broadcast %20 : vector<1x1200xf32> to vector<2x1200xf32>
    %95 = arith.mulf %93, %94 : vector<2x1200xf32>
    %96 = arith.addf %92, %95 : vector<2x1200xf32>
    %c0_71 = arith.constant 0 : index
    %c168_72 = arith.constant 168 : index
    %97 = vector.load %arg8[%c0_71, %c168_72] : memref<2x5056xf32, #tpu.memory_space<vmem>>, vector<2x1200xf32>
    %98 = vector.broadcast %21 : vector<1x1200xf32> to vector<2x1200xf32>
    %99 = arith.mulf %97, %98 : vector<2x1200xf32>
    %100 = arith.addf %96, %99 : vector<2x1200xf32>
    %c0_73 = arith.constant 0 : index
    %c169_74 = arith.constant 169 : index
    %101 = vector.load %arg8[%c0_73, %c169_74] : memref<2x5056xf32, #tpu.memory_space<vmem>>, vector<2x1200xf32>
    %102 = vector.broadcast %22 : vector<1x1200xf32> to vector<2x1200xf32>
    %103 = arith.mulf %101, %102 : vector<2x1200xf32>
    %104 = arith.addf %100, %103 : vector<2x1200xf32>
    %105 = arith.addf %104, %68 : vector<2x1200xf32>
    %106 = math.tanh %105 : vector<2x1200xf32>
    %107 = vector.broadcast %69 : vector<1x1200xf32> to vector<2x1200xf32>
    %108 = arith.mulf %106, %107 : vector<2x1200xf32>
    %cst_75 = arith.constant dense<0.000000e+00> : vector<2xf32>
    %109 = vector.multi_reduction <add>, %108, %cst_75 [1] : vector<2x1200xf32> to vector<2xf32>
    %110 = vector.shape_cast %109 : vector<2xf32> to vector<2x1xf32>
    %111 = vector.broadcast %1 : f32 to vector<2x1xf32>
    %112 = arith.addf %110, %111 : vector<2x1xf32>
    %c0_76 = arith.constant 0 : index
    %c1287 = arith.constant 1287 : index
    %113 = vector.load %arg8[%c0_76, %c1287] : memref<2x5056xf32, #tpu.memory_space<vmem>>, vector<2x1200xf32>
    %114 = vector.broadcast %14 : vector<1x1200xf32> to vector<2x1200xf32>
    %115 = arith.mulf %113, %114 : vector<2x1200xf32>
    %c0_77 = arith.constant 0 : index
    %c1288 = arith.constant 1288 : index
    %116 = vector.load %arg8[%c0_77, %c1288] : memref<2x5056xf32, #tpu.memory_space<vmem>>, vector<2x1200xf32>
    %117 = vector.broadcast %15 : vector<1x1200xf32> to vector<2x1200xf32>
    %118 = arith.mulf %116, %117 : vector<2x1200xf32>
    %119 = arith.addf %115, %118 : vector<2x1200xf32>
    %c0_78 = arith.constant 0 : index
    %c1289 = arith.constant 1289 : index
    %120 = vector.load %arg8[%c0_78, %c1289] : memref<2x5056xf32, #tpu.memory_space<vmem>>, vector<2x1200xf32>
    %121 = vector.broadcast %16 : vector<1x1200xf32> to vector<2x1200xf32>
    %122 = arith.mulf %120, %121 : vector<2x1200xf32>
    %123 = arith.addf %119, %122 : vector<2x1200xf32>
    %c0_79 = arith.constant 0 : index
    %c1327 = arith.constant 1327 : index
    %124 = vector.load %arg8[%c0_79, %c1327] : memref<2x5056xf32, #tpu.memory_space<vmem>>, vector<2x1200xf32>
    %125 = vector.broadcast %17 : vector<1x1200xf32> to vector<2x1200xf32>
    %126 = arith.mulf %124, %125 : vector<2x1200xf32>
    %127 = arith.addf %123, %126 : vector<2x1200xf32>
    %c0_80 = arith.constant 0 : index
    %c1328 = arith.constant 1328 : index
    %128 = vector.load %arg8[%c0_80, %c1328] : memref<2x5056xf32, #tpu.memory_space<vmem>>, vector<2x1200xf32>
    %129 = vector.broadcast %18 : vector<1x1200xf32> to vector<2x1200xf32>
    %130 = arith.mulf %128, %129 : vector<2x1200xf32>
    %131 = arith.addf %127, %130 : vector<2x1200xf32>
    %c0_81 = arith.constant 0 : index
    %c1329 = arith.constant 1329 : index
    %132 = vector.load %arg8[%c0_81, %c1329] : memref<2x5056xf32, #tpu.memory_space<vmem>>, vector<2x1200xf32>
    %133 = vector.broadcast %19 : vector<1x1200xf32> to vector<2x1200xf32>
    %134 = arith.mulf %132, %133 : vector<2x1200xf32>
    %135 = arith.addf %131, %134 : vector<2x1200xf32>
    %c0_82 = arith.constant 0 : index
    %c1367 = arith.constant 1367 : index
    %136 = vector.load %arg8[%c0_82, %c1367] : memref<2x5056xf32, #tpu.memory_space<vmem>>, vector<2x1200xf32>
    %137 = vector.broadcast %20 : vector<1x1200xf32> to vector<2x1200xf32>
    %138 = arith.mulf %136, %137 : vector<2x1200xf32>
    %139 = arith.addf %135, %138 : vector<2x1200xf32>
    %c0_83 = arith.constant 0 : index
    %c1368 = arith.constant 1368 : index
    %140 = vector.load %arg8[%c0_83, %c1368] : memref<2x5056xf32, #tpu.memory_space<vmem>>, vector<2x1200xf32>
    %141 = vector.broadcast %21 : vector<1x1200xf32> to vector<2x1200xf32>
    %142 = arith.mulf %140, %141 : vector<2x1200xf32>
    %143 = arith.addf %139, %142 : vector<2x1200xf32>
    %c0_84 = arith.constant 0 : index
    %c1369 = arith.constant 1369 : index
    %144 = vector.load %arg8[%c0_84, %c1369] : memref<2x5056xf32, #tpu.memory_space<vmem>>, vector<2x1200xf32>
    %145 = vector.broadcast %22 : vector<1x1200xf32> to vector<2x1200xf32>
    %146 = arith.mulf %144, %145 : vector<2x1200xf32>
    %147 = arith.addf %143, %146 : vector<2x1200xf32>
    %148 = arith.addf %147, %68 : vector<2x1200xf32>
    %149 = math.tanh %148 : vector<2x1200xf32>
    %150 = vector.broadcast %69 : vector<1x1200xf32> to vector<2x1200xf32>
    %151 = arith.mulf %149, %150 : vector<2x1200xf32>
    %cst_85 = arith.constant dense<0.000000e+00> : vector<2xf32>
    %152 = vector.multi_reduction <add>, %151, %cst_85 [1] : vector<2x1200xf32> to vector<2xf32>
    %153 = vector.shape_cast %152 : vector<2xf32> to vector<2x1xf32>
    %154 = vector.broadcast %1 : f32 to vector<2x1xf32>
    %155 = arith.addf %153, %154 : vector<2x1xf32>
    %c0_86 = arith.constant 0 : index
    %c2487 = arith.constant 2487 : index
    %156 = vector.load %arg8[%c0_86, %c2487] : memref<2x5056xf32, #tpu.memory_space<vmem>>, vector<2x1200xf32>
    %157 = vector.broadcast %14 : vector<1x1200xf32> to vector<2x1200xf32>
    %158 = arith.mulf %156, %157 : vector<2x1200xf32>
    %c0_87 = arith.constant 0 : index
    %c2488 = arith.constant 2488 : index
    %159 = vector.load %arg8[%c0_87, %c2488] : memref<2x5056xf32, #tpu.memory_space<vmem>>, vector<2x1200xf32>
    %160 = vector.broadcast %15 : vector<1x1200xf32> to vector<2x1200xf32>
    %161 = arith.mulf %159, %160 : vector<2x1200xf32>
    %162 = arith.addf %158, %161 : vector<2x1200xf32>
    %c0_88 = arith.constant 0 : index
    %c2489 = arith.constant 2489 : index
    %163 = vector.load %arg8[%c0_88, %c2489] : memref<2x5056xf32, #tpu.memory_space<vmem>>, vector<2x1200xf32>
    %164 = vector.broadcast %16 : vector<1x1200xf32> to vector<2x1200xf32>
    %165 = arith.mulf %163, %164 : vector<2x1200xf32>
    %166 = arith.addf %162, %165 : vector<2x1200xf32>
    %c0_89 = arith.constant 0 : index
    %c2527 = arith.constant 2527 : index
    %167 = vector.load %arg8[%c0_89, %c2527] : memref<2x5056xf32, #tpu.memory_space<vmem>>, vector<2x1200xf32>
    %168 = vector.broadcast %17 : vector<1x1200xf32> to vector<2x1200xf32>
    %169 = arith.mulf %167, %168 : vector<2x1200xf32>
    %170 = arith.addf %166, %169 : vector<2x1200xf32>
    %c0_90 = arith.constant 0 : index
    %c2528 = arith.constant 2528 : index
    %171 = vector.load %arg8[%c0_90, %c2528] : memref<2x5056xf32, #tpu.memory_space<vmem>>, vector<2x1200xf32>
    %172 = vector.broadcast %18 : vector<1x1200xf32> to vector<2x1200xf32>
    %173 = arith.mulf %171, %172 : vector<2x1200xf32>
    %174 = arith.addf %170, %173 : vector<2x1200xf32>
    %c0_91 = arith.constant 0 : index
    %c2529 = arith.constant 2529 : index
    %175 = vector.load %arg8[%c0_91, %c2529] : memref<2x5056xf32, #tpu.memory_space<vmem>>, vector<2x1200xf32>
    %176 = vector.broadcast %19 : vector<1x1200xf32> to vector<2x1200xf32>
    %177 = arith.mulf %175, %176 : vector<2x1200xf32>
    %178 = arith.addf %174, %177 : vector<2x1200xf32>
    %c0_92 = arith.constant 0 : index
    %c2567 = arith.constant 2567 : index
    %179 = vector.load %arg8[%c0_92, %c2567] : memref<2x5056xf32, #tpu.memory_space<vmem>>, vector<2x1200xf32>
    %180 = vector.broadcast %20 : vector<1x1200xf32> to vector<2x1200xf32>
    %181 = arith.mulf %179, %180 : vector<2x1200xf32>
    %182 = arith.addf %178, %181 : vector<2x1200xf32>
    %c0_93 = arith.constant 0 : index
    %c2568 = arith.constant 2568 : index
    %183 = vector.load %arg8[%c0_93, %c2568] : memref<2x5056xf32, #tpu.memory_space<vmem>>, vector<2x1200xf32>
    %184 = vector.broadcast %21 : vector<1x1200xf32> to vector<2x1200xf32>
    %185 = arith.mulf %183, %184 : vector<2x1200xf32>
    %186 = arith.addf %182, %185 : vector<2x1200xf32>
    %c0_94 = arith.constant 0 : index
    %c2569 = arith.constant 2569 : index
    %187 = vector.load %arg8[%c0_94, %c2569] : memref<2x5056xf32, #tpu.memory_space<vmem>>, vector<2x1200xf32>
    %188 = vector.broadcast %22 : vector<1x1200xf32> to vector<2x1200xf32>
    %189 = arith.mulf %187, %188 : vector<2x1200xf32>
    %190 = arith.addf %186, %189 : vector<2x1200xf32>
    %191 = arith.addf %190, %68 : vector<2x1200xf32>
    %192 = math.tanh %191 : vector<2x1200xf32>
    %193 = vector.broadcast %69 : vector<1x1200xf32> to vector<2x1200xf32>
    %194 = arith.mulf %192, %193 : vector<2x1200xf32>
    %cst_95 = arith.constant dense<0.000000e+00> : vector<2xf32>
    %195 = vector.multi_reduction <add>, %194, %cst_95 [1] : vector<2x1200xf32> to vector<2xf32>
    %196 = vector.shape_cast %195 : vector<2xf32> to vector<2x1xf32>
    %197 = vector.broadcast %1 : f32 to vector<2x1xf32>
    %198 = arith.addf %196, %197 : vector<2x1xf32>
    %c0_96 = arith.constant 0 : index
    %c3687 = arith.constant 3687 : index
    %199 = vector.load %arg8[%c0_96, %c3687] : memref<2x5056xf32, #tpu.memory_space<vmem>>, vector<2x1200xf32>
    %200 = vector.broadcast %14 : vector<1x1200xf32> to vector<2x1200xf32>
    %201 = arith.mulf %199, %200 : vector<2x1200xf32>
    %c0_97 = arith.constant 0 : index
    %c3688 = arith.constant 3688 : index
    %202 = vector.load %arg8[%c0_97, %c3688] : memref<2x5056xf32, #tpu.memory_space<vmem>>, vector<2x1200xf32>
    %203 = vector.broadcast %15 : vector<1x1200xf32> to vector<2x1200xf32>
    %204 = arith.mulf %202, %203 : vector<2x1200xf32>
    %205 = arith.addf %201, %204 : vector<2x1200xf32>
    %c0_98 = arith.constant 0 : index
    %c3689 = arith.constant 3689 : index
    %206 = vector.load %arg8[%c0_98, %c3689] : memref<2x5056xf32, #tpu.memory_space<vmem>>, vector<2x1200xf32>
    %207 = vector.broadcast %16 : vector<1x1200xf32> to vector<2x1200xf32>
    %208 = arith.mulf %206, %207 : vector<2x1200xf32>
    %209 = arith.addf %205, %208 : vector<2x1200xf32>
    %c0_99 = arith.constant 0 : index
    %c3727 = arith.constant 3727 : index
    %210 = vector.load %arg8[%c0_99, %c3727] : memref<2x5056xf32, #tpu.memory_space<vmem>>, vector<2x1200xf32>
    %211 = vector.broadcast %17 : vector<1x1200xf32> to vector<2x1200xf32>
    %212 = arith.mulf %210, %211 : vector<2x1200xf32>
    %213 = arith.addf %209, %212 : vector<2x1200xf32>
    %c0_100 = arith.constant 0 : index
    %c3728 = arith.constant 3728 : index
    %214 = vector.load %arg8[%c0_100, %c3728] : memref<2x5056xf32, #tpu.memory_space<vmem>>, vector<2x1200xf32>
    %215 = vector.broadcast %18 : vector<1x1200xf32> to vector<2x1200xf32>
    %216 = arith.mulf %214, %215 : vector<2x1200xf32>
    %217 = arith.addf %213, %216 : vector<2x1200xf32>
    %c0_101 = arith.constant 0 : index
    %c3729 = arith.constant 3729 : index
    %218 = vector.load %arg8[%c0_101, %c3729] : memref<2x5056xf32, #tpu.memory_space<vmem>>, vector<2x1200xf32>
    %219 = vector.broadcast %19 : vector<1x1200xf32> to vector<2x1200xf32>
    %220 = arith.mulf %218, %219 : vector<2x1200xf32>
    %221 = arith.addf %217, %220 : vector<2x1200xf32>
    %c0_102 = arith.constant 0 : index
    %c3767 = arith.constant 3767 : index
    %222 = vector.load %arg8[%c0_102, %c3767] : memref<2x5056xf32, #tpu.memory_space<vmem>>, vector<2x1200xf32>
    %223 = vector.broadcast %20 : vector<1x1200xf32> to vector<2x1200xf32>
    %224 = arith.mulf %222, %223 : vector<2x1200xf32>
    %225 = arith.addf %221, %224 : vector<2x1200xf32>
    %c0_103 = arith.constant 0 : index
    %c3768 = arith.constant 3768 : index
    %226 = vector.load %arg8[%c0_103, %c3768] : memref<2x5056xf32, #tpu.memory_space<vmem>>, vector<2x1200xf32>
    %227 = vector.broadcast %21 : vector<1x1200xf32> to vector<2x1200xf32>
    %228 = arith.mulf %226, %227 : vector<2x1200xf32>
    %229 = arith.addf %225, %228 : vector<2x1200xf32>
    %c0_104 = arith.constant 0 : index
    %c3769 = arith.constant 3769 : index
    %230 = vector.load %arg8[%c0_104, %c3769] : memref<2x5056xf32, #tpu.memory_space<vmem>>, vector<2x1200xf32>
    %231 = vector.broadcast %22 : vector<1x1200xf32> to vector<2x1200xf32>
    %232 = arith.mulf %230, %231 : vector<2x1200xf32>
    %233 = arith.addf %229, %232 : vector<2x1200xf32>
    %234 = arith.addf %233, %68 : vector<2x1200xf32>
    %235 = math.tanh %234 : vector<2x1200xf32>
    %236 = vector.broadcast %69 : vector<1x1200xf32> to vector<2x1200xf32>
    %237 = arith.mulf %235, %236 : vector<2x1200xf32>
    %cst_105 = arith.constant dense<0.000000e+00> : vector<2xf32>
    %238 = vector.multi_reduction <add>, %237, %cst_105 [1] : vector<2x1200xf32> to vector<2xf32>
    %239 = vector.shape_cast %238 : vector<2xf32> to vector<2x1xf32>
    %240 = vector.broadcast %1 : f32 to vector<2x1xf32>
    %241 = arith.addf %239, %240 : vector<2x1xf32>
    %242 = arith.maximumf %112, %155 : vector<2x1xf32>
    %243 = arith.maximumf %242, %198 : vector<2x1xf32>
    %244 = arith.maximumf %243, %241 : vector<2x1xf32>
    %245 = arith.subf %112, %244 : vector<2x1xf32>
    %246 = math.exp %245 : vector<2x1xf32>
    %247 = arith.subf %155, %244 : vector<2x1xf32>
    %248 = math.exp %247 : vector<2x1xf32>
    %249 = arith.subf %198, %244 : vector<2x1xf32>
    %250 = math.exp %249 : vector<2x1xf32>
    %251 = arith.subf %241, %244 : vector<2x1xf32>
    %252 = math.exp %251 : vector<2x1xf32>
    %253 = arith.addf %246, %248 : vector<2x1xf32>
    %254 = arith.addf %253, %250 : vector<2x1xf32>
    %255 = arith.addf %254, %252 : vector<2x1xf32>
    %256 = tpu.reciprocal %255 : vector<2x1xf32> -> vector<2x1xf32>
    %257 = arith.mulf %246, %256 : vector<2x1xf32>
    %c0_106 = arith.constant 0 : index
    %c0_107 = arith.constant 0 : index
    %258 = vector.load %arg5[%c0_106, %c0_107] : memref<2x4800xf32, #tpu.memory_space<vmem>>, vector<2x1200xf32>
    %259 = vector.broadcast %257 : vector<2x1xf32> to vector<2x1200xf32>
    %260 = arith.mulf %259, %258 : vector<2x1200xf32>
    %261 = arith.mulf %248, %256 : vector<2x1xf32>
    %c0_108 = arith.constant 0 : index
    %c1200 = arith.constant 1200 : index
    %262 = vector.load %arg5[%c0_108, %c1200] : memref<2x4800xf32, #tpu.memory_space<vmem>>, vector<2x1200xf32>
    %263 = vector.broadcast %261 : vector<2x1xf32> to vector<2x1200xf32>
    %264 = arith.mulf %263, %262 : vector<2x1200xf32>
    %265 = arith.addf %260, %264 : vector<2x1200xf32>
    %266 = arith.mulf %250, %256 : vector<2x1xf32>
    %c0_109 = arith.constant 0 : index
    %c2400 = arith.constant 2400 : index
    %267 = vector.load %arg5[%c0_109, %c2400] : memref<2x4800xf32, #tpu.memory_space<vmem>>, vector<2x1200xf32>
    %268 = vector.broadcast %266 : vector<2x1xf32> to vector<2x1200xf32>
    %269 = arith.mulf %268, %267 : vector<2x1200xf32>
    %270 = arith.addf %265, %269 : vector<2x1200xf32>
    %271 = arith.mulf %252, %256 : vector<2x1xf32>
    %c0_110 = arith.constant 0 : index
    %c3600 = arith.constant 3600 : index
    %272 = vector.load %arg5[%c0_110, %c3600] : memref<2x4800xf32, #tpu.memory_space<vmem>>, vector<2x1200xf32>
    %273 = vector.broadcast %271 : vector<2x1xf32> to vector<2x1200xf32>
    %274 = arith.mulf %273, %272 : vector<2x1200xf32>
    %275 = arith.addf %270, %274 : vector<2x1200xf32>
    %c0_111 = arith.constant 0 : index
    %c0_112 = arith.constant 0 : index
    %276 = vector.load %arg7[%c0_111, %c0_112] : memref<2x1200xf32, #tpu.memory_space<vmem>>, vector<2x1200xf32>
    tpu.vector_store %arg7[%c0_111, %c0_112], %275 {strides = array<i32>} : memref<2x1200xf32, #tpu.memory_space<vmem>>, vector<2x1200xf32>,
    return
  }
  func.func @transform_0(%arg0: i32) -> i32 {
    %c0_i32 = arith.constant 0 : i32
    %c0_i32_0 = arith.constant 0 : i32
    return %c0_i32 : i32
  }
  func.func @transform_1(%arg0: i32) -> (i32, i32) {
    %c0_i32 = arith.constant 0 : i32
    %c0_i32_0 = arith.constant 0 : i32
    %c0_i32_1 = arith.constant 0 : i32
    return %c0_i32, %c0_i32_0 : i32, i32
  }
  func.func @transform_2(%arg0: i32) -> (i32, i32) {
    %c0_i32 = arith.constant 0 : i32
    %c0_i32_0 = arith.constant 0 : i32
    %c0_i32_1 = arith.constant 0 : i32
    return %c0_i32, %c0_i32_0 : i32, i32
  }
  func.func @transform_3(%arg0: i32) -> (i32, i32) {
    %c0_i32 = arith.constant 0 : i32
    %c0_i32_0 = arith.constant 0 : i32
    %c0_i32_1 = arith.constant 0 : i32
    return %c0_i32, %c0_i32_0 : i32, i32
  }
  func.func @transform_4(%arg0: i32) -> (i32, i32) {
    %c0_i32 = arith.constant 0 : i32
    %c0_i32_0 = arith.constant 0 : i32
    return %arg0, %c0_i32 : i32, i32
  }
  func.func @transform_5(%arg0: i32) -> (i32, i32) {
    %c0_i32 = arith.constant 0 : i32
    %c0_i32_0 = arith.constant 0 : i32
    return %arg0, %c0_i32 : i32, i32
  }
  func.func @transform_6(%arg0: i32) -> (i32, i32) {
    %c0_i32 = arith.constant 0 : i32
    %c0_i32_0 = arith.constant 0 : i32
    return %arg0, %c0_i32 : i32, i32
  }
}

</mosaic_0001>

<bundles_post_ra>
// kernel: tpu_custom_call.1
= control target key start
LH: loop header
LB: loop body
LE: loop exit
PB: predicated region body
PF: predicated region fallthrough
CT: control target
= control target key end

     0   :  { %11 = vsyncpa [#allocation7], 0  ;;  %s8028_s0 = inlined_call_operand.hbm [shape: f32[2], index: 0, kind: input, shape index: {}]   ;;  %s8029_s1 = inlined_call_operand.hbm [shape: f32[9,1200], index: 1, kind: input, shape index: {}]   ;;  %s8030_s2 = inlined_call_operand.hbm [shape: f32[9,1200], index: 2, kind: input, shape index: {}]   ;;  %s8031_s3 = inlined_call_operand.vmem [shape: f32[1,1200], index: 3, kind: input, shape index: {}]   ;;  %s8032_s4 = inlined_call_operand.hbm [shape: f32[2,4800], index: 4, kind: input, shape index: {}]   ;;  %s8033_s5 = inlined_call_operand.hbm [shape: f32[2,1200], index: 5, kind: input, shape index: {}]   ;;  %s8034_s6 = inlined_call_operand.hbm [shape: f32[2,1200], index: 6, kind: output, shape index: {}]  }
   0x1   :  { %12 = vsyncpa [#allocation5], 0 }
   0x2   :  { %13 = vsyncpa [#allocation10], 0 }
   0x3   :  { %14 = vsyncpa [#allocation13], 0 }
   0x4   :  { %15 = vsyncpa [#allocation6], 0  ;;  %s5022_s21 = smov [#allocation9]   ;;  %s5023_s23 = smov [#allocation8]  }
   0x5   :  { %s41_s22 = sshll.u32 %s5022_s21, 4  ;;  %s29_s24 = sshll.u32 %s5023_s23, 4  ;;  %s42_s22 = int_to_ptr.vmem [resolvable:$true] %s41_s22  ;;  %s30_s24 = int_to_ptr.vmem [resolvable:$true] %s29_s24 }
   0x6   :  { %s4892_s27 = scalar_lea.hbm %s8030_s2, 2560 }
   0x7   :  { %p4893_p0 = scmp.ne.s32.totalorder %s8030_s2, %s4892_s27  ;;  %p4896_p1 = scmp.lt.u32.totalorder %s4892_s27, %s8030_s2 }
   0x9   :  { %p4898_p2 = pnand %p4896_p1, %p4893_p0 }
   0xb   :  { %4901 = shalt.err (!%p4898_p2)
}
   0xc   :  { %s4902_s8 = scalar_lea.vmem %s42_s22, 2560  ;;  %p4907_p4 = scmp.lt.s32.totalorder %s42_s22, %s42_s22 }
   0xd   :  { %p4903_p3 = scmp.ne.s32.totalorder %s42_s22, %s4902_s8  ;;  %p4908_p5 = scmp.lt.s32.totalorder %s4902_s8, %s4902_s8 }
   0xf   :  { %p4909_p6 = por %p4908_p5, %p4907_p4 }
  0x11   :  { %p4910_p7 = pnand %p4909_p6, %p4903_p3 }
  0x13   :  { %4913 = shalt.err (!%p4910_p7)
}
  0x14   :  { %s5024_s9 = smov 1280   ;;  %s5025_s10 = smov 80  }
  0x15   :  { %47 = dma.hbm_to_vmem [thread:$0]  %s8030_s2, 2560, %s42_s22, [#allocation10], %s5024_s9, %s5024_s9, %s5025_s10  }
  0x16   :  { %s4914_s15 = scalar_lea.hbm %s8028_s0, 16 }
  0x17   :  { %p4915_p8 = scmp.ne.s32.totalorder %s8028_s0, %s4914_s15  ;;  %p4918_p9 = scmp.lt.u32.totalorder %s4914_s15, %s8028_s0 }
  0x19   :  { %p4920_p10 = pnand %p4918_p9, %p4915_p8 }
  0x1b   :  { %4923 = shalt.err (!%p4920_p10)
}
  0x1c   :  { %s5026_s20 = smov [#allocation4]   ;;  %s4924_s25 = scalar_lea.hbm %s8029_s1, 2560 }
  0x1d   :  { %23 = dma.hbm_to_smem %s8028_s0, 16, %s5026_s20, [#allocation7]  }
  0x1e   :  { %p4925_p11 = scmp.ne.s32.totalorder %s8029_s1, %s4924_s25  ;;  %p4928_p12 = scmp.lt.u32.totalorder %s4924_s25, %s8029_s1 }
  0x20   :  { %p4930_p13 = pnand %p4928_p12, %p4925_p11 }
  0x22   :  { %4933 = shalt.err (!%p4930_p13)
}
  0x23   :  { %s4934_s30 = scalar_lea.vmem %s30_s24, 2560  ;;  %p4939_p1 = scmp.lt.s32.totalorder %s30_s24, %s30_s24 }
  0x24   :  { %p4935_p0 = scmp.ne.s32.totalorder %s30_s24, %s4934_s30  ;;  %p4940_p2 = scmp.lt.s32.totalorder %s4934_s30, %s4934_s30 }
  0x26   :  { %p4941_p3 = por %p4940_p2, %p4939_p1 }
  0x28   :  { %p4942_p4 = pnand %p4941_p3, %p4935_p0 }
  0x2a   :  { %4945 = shalt.err (!%p4942_p4)
}
  0x2b   :  { %35 = dma.hbm_to_vmem [thread:$0]  %s8029_s1, 2560, %s30_s24, [#allocation5], %s5024_s9, %s5024_s9, %s5025_s10  }
  0x2c   :  { %s5027_s8 = smov [#allocation11]   ;;  %s5028_s12 = smov [#allocation12]  }
  0x2d   :  { %s56_s11 = sshll.u32 %s5027_s8, 4  ;;  %s66_s13 = sshll.u32 %s5028_s12, 4  ;;  %s57_s11 = int_to_ptr.vmem [resolvable:$true] %s56_s11  ;;  %s67_s13 = int_to_ptr.vmem [resolvable:$true] %s66_s13 }
  0x2e   :  { %s4946_s16 = scalar_lea.hbm %s8032_s4, 1216 }
  0x2f   :  { %p4947_p5 = scmp.ne.s32.totalorder %s8032_s4, %s4946_s16  ;;  %p4950_p6 = scmp.lt.u32.totalorder %s4946_s16, %s8032_s4 }
  0x31   :  { %p4952_p7 = pnand %p4950_p6, %p4947_p5 }
  0x33   :  { %4955 = shalt.err (!%p4952_p7)
}
  0x34   :  { %s4956_s1 = scalar_lea.vmem %s57_s11, 1216  ;;  %p4961_p9 = scmp.lt.s32.totalorder %s57_s11, %s57_s11 }
  0x35   :  { %p4957_p8 = scmp.ne.s32.totalorder %s57_s11, %s4956_s1  ;;  %p4962_p10 = scmp.lt.s32.totalorder %s4956_s1, %s4956_s1 }
  0x37   :  { %p4963_p11 = por %p4962_p10, %p4961_p9 }
  0x39   :  { %p4964_p12 = pnand %p4963_p11, %p4957_p8 }
  0x3b   :  { %4967 = shalt.err (!%p4964_p12)
}
  0x3c   :  { %59 = dma.hbm_to_vmem [thread:$0]  %s8032_s4, 1216, %s57_s11, [#allocation10]  }
  0x3d   :  { %s4968_s2 = scalar_lea.hbm %s8033_s5, 320 }
  0x3e   :  { %p4969_p13 = scmp.ne.s32.totalorder %s8033_s5, %s4968_s2  ;;  %p4972_p0 = scmp.lt.u32.totalorder %s4968_s2, %s8033_s5 }
  0x40   :  { %p4974_p1 = pnand %p4972_p0, %p4969_p13 }
  0x42   :  { %4977 = shalt.err (!%p4974_p1)
}
  0x43   :  { %s4978_s28 = scalar_lea.vmem %s67_s13, 320  ;;  %p4983_p3 = scmp.lt.s32.totalorder %s67_s13, %s67_s13 }
  0x44   :  { %p4979_p2 = scmp.ne.s32.totalorder %s67_s13, %s4978_s28  ;;  %p4984_p4 = scmp.lt.s32.totalorder %s4978_s28, %s4978_s28 }
  0x46   :  { %p4985_p5 = por %p4984_p4, %p4983_p3 }
  0x48   :  { %p4986_p6 = pnand %p4985_p5, %p4979_p2 }
  0x4a   :  { %4989 = shalt.err (!%p4986_p6)
}
  0x4b   :  { %69 = dma.hbm_to_vmem [thread:$0]  %s8033_s5, 320, %s67_s13, [#allocation13]  }
  0x4c   :  { %5012 = dma.done.wait [#allocation7], 16  }
  0x4d   :  { %5013 = vsyncadd [#allocation7], 4294967280 }
  0x4e   :  { %5014 = dma.done.wait [#allocation5], 2560  }
  0x4f   :  { %5015 = vsyncadd [#allocation5], 4294964736 }
  0x50   :  { %5016 = dma.done.wait [#allocation10], 3776  }
  0x51   :  { %5017 = vsyncadd [#allocation10], 4294963520 }
  0x52   :  { %5018 = dma.done.wait [#allocation13], 320  }
  0x53   :  { %5019 = vsyncadd [#allocation13], 4294966976 }
  0x54   :  { %85 = sfence }
  0x55   :  { %v234_v0 = vlaneseq  ;;  %v5029_v1 = vmov 1983009808   ;;  %v176_v3 = vld [vmem:[#allocation9] ss:$8 sm:$0xf]  ;;  %s5030_s5 = smov 87  }
  0x56   :  { %v277_v2 = vunpack.c.l.s4 %v5029_v1  ;;  %v177_v4 = vld [vmem:[#allocation9] ss:$8 sm:$0xf0]  ;;  %v186_v9 = vld [vmem:[#allocation9 + $0x41] ss:$8 sm:$0x3] }
  0x57   :  { %v235_v5 = vshrl.u32 %v234_v0, 7  ;;  %v178_v6 = vor.u32 %v177_v4, %v176_v3  ;;  %v180_v7 = vld [vmem:[#allocation9 + $0x40] ss:$8 sm:$0x3]  ;;  %v5171_v14 = vld [vmem:[#allocation12 + $0x8] sm:$0xff]  ;;  %v5195_v39 = vld [vmem:[#allocation12] sm:$0xff] }
  0x58   :  { %v278_v8 = vunpack.c.0.s8 %v277_v2  ;;  %121 = vst [vmem:[#allocation3 + $0xa] sm:$0xff] %v5171_v14  ;;  %v182_v27 = vld [vmem:[#allocation9 + $0x1] ss:$8 sm:$0xf]  ;;  %120 = vst [vmem:[#allocation3 + $0x2] sm:$0xff] %v5195_v39  ;;  %s5031_s30 = smov 88  }
  0x59   :  { %v5163_v10 = vsub.s32 0, %v235_v5  ;;  %v5165_v11 = vsub.s32 1, %v235_v5  ;;  %v5167_v12 = vsub.s32 2, %v235_v5  ;;  %v5169_v13 = vsub.s32 3, %v235_v5  ;;  %s5032_s0 = smov 89   ;;  %s5033_s7 = smov 127  }
  0x5a   :  { %v5173_v15 = vsub.s32 %v278_v8, %v235_v5  ;;  %v5175_v16 = vsub.s32 4, %v235_v5  ;;  %v5177_v17 = vsub.s32 5, %v235_v5  ;;  %v5179_v18 = vsub.s32 6, %v235_v5  ;;  %v183_v28 = vld [vmem:[#allocation9 + $0x1] ss:$8 sm:$0xf0] }
  0x5b   :  { %v269_v19 = vrot.slane %v180_v7, %v5163_v10  ;;  %v273_v20 = vrot.slane %v180_v7, %v5165_v11  ;;  %v237_v21 = vrot.slane %v178_v6, %v5163_v10  ;;  %v241_v22 = vrot.slane %v178_v6, %v5165_v11  ;;  %v188_v33 = vld [vmem:[#allocation9 + $0x2] ss:$8 sm:$0xf]  ;;  %s5035_s8 = smov 1   ;;  %s5036_s11 = smov 39  }
  0x5c   :  { %8182 = vst [vmem:[#allocation20_spill] sm:$0xff] %v5173_v15  ;;  %v245_v23 = vrot.slane %v178_v6, %v5167_v12  ;;  %v249_v24 = vrot.slane %v178_v6, %v5169_v13  ;;  %v374_v25 = vrot.slane %v186_v9, %v5163_v10  ;;  %v378_v26 = vrot.slane %v186_v9, %v5165_v11  ;;  %v189_v34 = vld [vmem:[#allocation9 + $0x2] ss:$8 sm:$0xf0]  ;;  %s5037_s12 = smov 40   ;;  %s5038_s13 = smov 41  }
  0x5d   :  { %v308_v29 = vcombine.low %v269_v19, %v273_v20  ;;  %v274_v30 = vcombine.low %v237_v21, %v241_v22  ;;  %v253_v31 = vrot.slane %v178_v6, %v5175_v16  ;;  %v257_v32 = vrot.slane %v178_v6, %v5177_v17  ;;  %v192_v4 = vld [vmem:[#allocation9 + $0x42] ss:$8 sm:$0x3]  ;;  %v194_v9 = vld [vmem:[#allocation9 + $0x3] ss:$8 sm:$0xf] }
  0x5e   :  { %v275_v35 = vcombine.low %v245_v23, %v249_v24  ;;  %v413_v36 = vcombine.low %v374_v25, %v378_v26  ;;  %v261_v37 = vrot.slane %v178_v6, %v5179_v18  ;;  %v5193_v38 = vsub.s32 7, %v235_v5  ;;  %v195_v19 = vld [vmem:[#allocation9 + $0x3] ss:$8 sm:$0xf0]  ;;  %s5039_s14 = smov 126   ;;  %s5040_s15 = smov 86  }
  0x5f   :  { %v315_v40 = vrot.slane %v308_v29, %v5173_v15  ;;  %v282_v41 = vrot.slane %v274_v30, %v5173_v15  ;;  %v291_v42 = vcombine.low %v253_v31, %v257_v32  ;;  %v184_v43 = vor.u32 %v183_v28, %v182_v27  ;;  %v200_v24 = vld [vmem:[#allocation9 + $0x4] ss:$8 sm:$0xf]  ;;  %v198_v30 = vld [vmem:[#allocation9 + $0x43] ss:$8 sm:$0x3] }
  0x60   :  { %v289_v44 = vrot.slane %v275_v35, %v5173_v15  ;;  %v420_v45 = vrot.slane %v413_v36, %v5173_v15  ;;  %v265_v46 = vrot.slane %v178_v6, %v5193_v38  ;;  %v190_v47 = vor.u32 %v189_v34, %v188_v33  ;;  %v201_v25 = vld [vmem:[#allocation9 + $0x4] ss:$8 sm:$0xf0]  ;;  %s5041_s16 = smov 48   ;;  %s5042_s17 = smov 47  }
  0x61   :  { %320 = vrot.lane.b32.xlu1 %v315_v40, %s5030_s5  ;;  %v299_v48 = vrot.slane %v291_v42, %v5173_v15  ;;  %v342_v49 = vrot.slane %v184_v43, %v5163_v10  ;;  %v346_v50 = vrot.slane %v184_v43, %v5165_v11  ;;  %v350_v51 = vrot.slane %v184_v43, %v5167_v12  ;;  %s5043_s18 = smov 46   ;;  %s5045_s9 = smov 8  }
  0x62   :  { %v290_v52 = vcombine.low %v282_v41, %v289_v44  ;;  %v292_v53 = vcombine.low %v261_v37, %v265_v46  ;;  %v354_v54 = vrot.slane %v184_v43, %v5169_v13  ;;  %v358_v55 = vrot.slane %v184_v43, %v5175_v16  ;;  %s5046_s21 = smov 9   ;;  %s6261_s23 = sld [smem:[#allocation4]] }
  0x63   :  { %v379_v56 = vcombine.low %v342_v49, %v346_v50  ;;  %v362_v57 = vrot.slane %v184_v43, %v5177_v17  ;;  %v366_v58 = vrot.slane %v184_v43, %v5179_v18  ;;  %v370_v59 = vrot.slane %v184_v43, %v5193_v38  ;;  %s5047_s2 = smov 49   ;;  %s5048_s22 = smov 55  }
  0x64   :  { %316 = vrot.lane.b32.xlu0 %v290_v52, %s5030_s5  ;;  %v306_v60 = vrot.slane %v292_v53, %v5173_v15  ;;  %v380_v61 = vcombine.low %v350_v51, %v354_v54  ;;  %v472_v62 = vrot.slane %v190_v47, %v5163_v10  ;;  %v476_v63 = vrot.slane %v190_v47, %v5165_v11  ;;  %s5049_s25 = smov 56   ;;  %s5050_s26 = smov 121  }
  0x65   :  { %425 = vrot.lane.b32.xlu1 %v420_v45, %s5031_s30  ;;  %v387_v0 = vrot.slane %v379_v56, %v5173_v15  ;;  %v396_v1 = vcombine.low %v358_v55, %v362_v57  ;;  %v397_v2 = vcombine.low %v366_v58, %v370_v59  ;;  %v480_v3 = vrot.slane %v190_v47, %v5167_v12  ;;  %s5051_s27 = smov 57   ;;  %s5052_s28 = smov 95  }
  0x66   :  { %v307_v5 = vcombine.low %v299_v48, %v306_v60  ;;  %v394_v6 = vrot.slane %v380_v61, %v5173_v15  ;;  %v484_v7 = vrot.slane %v190_v47, %v5169_v13  ;;  %v509_v8 = vcombine.low %v472_v62, %v476_v63  ;;  %v206_v61 = vld [vmem:[#allocation9 + $0x5] ss:$8 sm:$0xf]  ;;  %s5053_s4 = smov 105   ;;  %s5054_s29 = smov 96  }
  0x67   :  { %v404_v20 = vrot.slane %v396_v1, %v5173_v15  ;;  %v411_v21 = vrot.slane %v397_v2, %v5173_v15  ;;  %v488_v22 = vrot.slane %v190_v47, %v5175_v16  ;;  %v492_v23 = vrot.slane %v190_v47, %v5177_v17  ;;  %v207_v62 = vld [vmem:[#allocation9 + $0x5] ss:$8 sm:$0xf0]  ;;  %s5060_s19 = smov 103  }
  0x68   :  { %318 = vrot.lane.b32.xlu0 %v307_v5, %s5030_s5  ;;  %v395_v26 = vcombine.low %v387_v0, %v394_v6  ;;  %v510_v27 = vcombine.low %v480_v3, %v484_v7  ;;  %v517_v28 = vrot.slane %v509_v8, %v5173_v15  ;;  %v496_v29 = vrot.slane %v190_v47, %v5179_v18 }
  0x69   :  { %v412_v31 = vcombine.low %v404_v20, %v411_v21  ;;  %v500_v32 = vrot.slane %v190_v47, %v5193_v38  ;;  %v526_v33 = vcombine.low %v488_v22, %v492_v23  ;;  %v504_v34 = vrot.slane %v192_v4, %v5163_v10 }
  0x6a   :  { %421 = vrot.lane.b32.xlu1 %v395_v26, %s5031_s30  ;;  %v524_v35 = vrot.slane %v510_v27, %v5173_v15  ;;  %v508_v36 = vrot.slane %v192_v4, %v5165_v11  ;;  %v196_v37 = vor.u32 %v195_v19, %v194_v9  ;;  %v5234_v40 = vor.u32 %v201_v25, %v200_v24  ;;  %v210_v24 = vld [vmem:[#allocation9 + $0x45] ss:$8 sm:$0x3] }
  0x6b   :  { %v527_v41 = vcombine.low %v496_v29, %v500_v32  ;;  %v534_v42 = vrot.slane %v526_v33, %v5173_v15  ;;  %v633_v43 = vrot.slane %v198_v30, %v5163_v10  ;;  %v637_v44 = vrot.slane %v198_v30, %v5165_v11 }
  0x6c   :  { %423 = vrot.lane.b32.xlu0 %v412_v31, %s5031_s30  ;;  %v525_v45 = vcombine.low %v517_v28, %v524_v35  ;;  %v543_v46 = vcombine.low %v504_v34, %v508_v36  ;;  %v617_v47 = vrot.slane %v196_v37, %v5175_v16  ;;  %v621_v48 = vrot.slane %v196_v37, %v5177_v17 }
  0x6d   :  { %v541_v49 = vrot.slane %v527_v41, %v5173_v15  ;;  %v625_v50 = vrot.slane %v196_v37, %v5179_v18  ;;  %v629_v51 = vrot.slane %v196_v37, %v5193_v38  ;;  %v601_v52 = vrot.slane %v196_v37, %v5163_v10 }
  0x6e   :  { %551 = vrot.lane.b32.xlu1 %v525_v45, %s5032_s0  ;;  %v550_v53 = vrot.slane %v543_v46, %v5173_v15  ;;  %v655_v54 = vcombine.low %v617_v47, %v621_v48  ;;  %v605_v55 = vrot.slane %v196_v37, %v5165_v11  ;;  %v609_v56 = vrot.slane %v196_v37, %v5167_v12  ;;  %v212_v45 = vld [vmem:[#allocation9 + $0x6] ss:$8 sm:$0xf] }
  0x6f   :  { %v542_v57 = vcombine.low %v534_v42, %v541_v49  ;;  %v656_v58 = vcombine.low %v625_v50, %v629_v51  ;;  %v613_v59 = vrot.slane %v196_v37, %v5169_v13  ;;  %v747_v60 = vrot.slane %v5234_v40, %v5175_v16  ;;  %v213_v48 = vld [vmem:[#allocation9 + $0x6] ss:$8 sm:$0xf0] }
  0x70   :  { %v663_v63 = vrot.slane %v655_v54, %v5173_v15  ;;  %v638_v0 = vcombine.low %v601_v52, %v605_v55  ;;  %v751_v1 = vrot.slane %v5234_v40, %v5177_v17  ;;  %v755_v2 = vrot.slane %v5234_v40, %v5179_v18  ;;  %v119_v54 = vld [vmem:[#allocation12 + $0x10] sm:$0xf] }
  0x71   :  { %553 = vrot.lane.b32.xlu0 %v542_v57, %s5032_s0  ;;  %v670_v3 = vrot.slane %v656_v58, %v5173_v15  ;;  %v639_v4 = vcombine.low %v609_v56, %v613_v59  ;;  %v759_v5 = vrot.slane %v5234_v40, %v5193_v38  ;;  %v672_v6 = vcombine.low %v633_v43, %v637_v44  ;;  %v204_v44 = vld [vmem:[#allocation9 + $0x44] ss:$8 sm:$0x3] }
  0x72   :  { %555 = vrot.lane.b32.xlu1 %v550_v53, %s5032_s0  ;;  %v646_v7 = vrot.slane %v638_v0, %v5173_v15  ;;  %v785_v8 = vcombine.low %v747_v60, %v751_v1  ;;  %v5264_v9 = vor.u32 %v207_v62, %v206_v61  ;;  %v731_v19 = vrot.slane %v5234_v40, %v5163_v10  ;;  %v216_v0 = vld [vmem:[#allocation9 + $0x46] ss:$8 sm:$0x3] }
  0x73   :  { %v671_v20 = vcombine.low %v663_v63, %v670_v3  ;;  %v653_v21 = vrot.slane %v639_v4, %v5173_v15  ;;  %v786_v22 = vcombine.low %v755_v2, %v759_v5  ;;  %v679_v23 = vrot.slane %v672_v6, %v5173_v15 }
  0x74   :  { %v793_v25 = vrot.slane %v785_v8, %v5173_v15  ;;  %v844_v26 = vrot.slane %v5264_v9, %v5163_v10  ;;  %v848_v27 = vrot.slane %v5264_v9, %v5165_v11  ;;  %v852_v28 = vrot.slane %v5264_v9, %v5167_v12 }
  0x75   :  { %682 = vrot.lane.b32.xlu0 %v671_v20, %s5033_s7  ;;  %v654_v29 = vcombine.low %v646_v7, %v653_v21  ;;  %v800_v30 = vrot.slane %v786_v22, %v5173_v15  ;;  %v856_v31 = vrot.slane %v5264_v9, %v5169_v13  ;;  %v735_v32 = vrot.slane %v5234_v40, %v5165_v11 }
  0x76   :  { %v881_v33 = vcombine.low %v844_v26, %v848_v27  ;;  %v739_v34 = vrot.slane %v5234_v40, %v5167_v12  ;;  %v743_v35 = vrot.slane %v5234_v40, %v5169_v13  ;;  %v876_v36 = vrot.slane %v210_v24, %v5163_v10 }
  0x77   :  { %680 = vrot.lane.b32.xlu1 %v654_v29, %s5033_s7  ;;  %v801_v37 = vcombine.low %v793_v25, %v800_v30  ;;  %v882_v41 = vcombine.low %v852_v28, %v856_v31  ;;  %v768_v42 = vcombine.low %v731_v19, %v735_v32  ;;  %v880_v43 = vrot.slane %v210_v24, %v5165_v11  ;;  %v219_v28 = vld [vmem:[#allocation9 + $0x7] ss:$8 sm:$0xf0] }
  0x78   :  { %v889_v46 = vrot.slane %v881_v33, %v5173_v15  ;;  %v769_v47 = vcombine.low %v739_v34, %v743_v35  ;;  %vm90_vm0 = vcmask 1041408   ;;  %v8035_v52 = vmov 0.0  }
  0x79   :  { %v814_v49 = vmul.f32 %v801_v37, %v5171_v14  ;;  %v896_v40 = vrot.slane %v882_v41, %v5173_v15  ;;  %v776_v50 = vrot.slane %v768_v42, %v5173_v15  ;;  %v915_v51 = vcombine.low %v876_v36, %v880_v43  ;;  %88 = vst [vmem:[#allocation2] sm:$0x3] %v8035_v52 }
  0x7a   :  { %89 = vst [vmem:[#allocation3] sm:$0x3] %v8035_v52  ;;  %v783_v53 = vrot.slane %v769_v47, %v5173_v15  ;;  %vm94_vm1 = vcmask 388098   ;;  %v763_v55 = vrot.slane %v204_v44, %v5163_v10  ;;  %v767_v56 = vrot.slane %v204_v44, %v5165_v11 }
  0x7b   :  { %821 = vrot.lane.b32.xlu0 %v814_v49, %s5030_s5  ;;  %684 = vrot.lane.b32.xlu1 %v679_v23, %s5033_s7  ;;  %v897_v14 = vcombine.low %v889_v46, %v896_v40  ;;  %v922_v57 = vrot.slane %v915_v51, %v5173_v15  ;;  %vm5303_vm2 = vmor %vm94_vm1, %vm90_vm0  ;;  %v8183_v58 = vmov 0  ;;  %v214_v59 = vor.u32 %v213_v48, %v212_v45  ;;  %v218_v23 = vld [vmem:[#allocation9 + $0x7] ss:$8 sm:$0xf] }
  0x7c   :  { %v8184_v58 = vsel %vm5303_vm2, 4294967295, %v8183_v58  ;;  %v784_v60 = vcombine.low %v776_v50, %v783_v53  ;;  %96 = vst.msk [vmem:[#allocation3 + $0x14] sm:$0xf] %vm5303_vm2, %v8035_v52  ;;  %v802_v61 = vcombine.low %v763_v55, %v767_v56  ;;  %v860_v62 = vrot.slane %v5264_v9, %v5175_v16  ;;  %v224_v53 = vld [vmem:[#allocation9 + $0x50] ss:$8 sm:$0xf] }
  0x7d   :  { %8185 = vst [vmem:[#allocation21_spill] sm:$0xff] %v8184_v58  ;;  %v864_v63 = vrot.slane %v5264_v9, %v5177_v17  ;;  %122 = vst.msk [vmem:[#allocation3 + $0x12] sm:$0xf] %vm5303_vm2, %v119_v54  ;;  %v973_v1 = vrot.slane %v214_v59, %v5163_v10  ;;  %v977_v2 = vrot.slane %v214_v59, %v5165_v11  ;;  %v225_v54 = vld [vmem:[#allocation9 + $0x50] ss:$8 sm:$0xf0] }
  0x7e   :  { %v981_v3 = vrot.slane %v214_v59, %v5167_v12  ;;  %v985_v4 = vrot.slane %v214_v59, %v5169_v13  ;;  %v813_v5 = vmul.f32 %v784_v60, %v5195_v39  ;;  %v809_v6 = vrot.slane %v802_v61, %v5173_v15  ;;  %v124_v60 = vld [vmem:[#allocation8] ss:$8 sm:$0xf0] }
  0x7f   :  { %v868_v7 = vrot.slane %v5264_v9, %v5179_v18  ;;  %v872_v8 = vrot.slane %v5264_v9, %v5193_v38  ;;  %923 = vrot.lane.b32.xlu0 %v897_v14, %s5035_s8  ;;  %v1010_v19 = vcombine.low %v973_v1, %v977_v2  ;;  %v898_v21 = vcombine.low %v860_v62, %v864_v63  ;;  %v222_v9 = vld [vmem:[#allocation9 + $0x47] ss:$8 sm:$0x3]  ;;  %v230_v52 = vld [vmem:[#allocation3 + $0x8] sm:$0xff] }
  0x80   :  { %v1011_v20 = vcombine.low %v981_v3, %v985_v4  ;;  %v1005_v22 = vrot.slane %v216_v0, %v5163_v10  ;;  %819 = vrot.lane.b32.xlu1 %v813_v5, %s5030_s5  ;;  %v1009_v25 = vrot.slane %v216_v0, %v5165_v11  ;;  %v989_v26 = vrot.slane %v214_v59, %v5175_v16  ;;  %v228_v0 = vld [vmem:[#allocation9 + $0x90] ss:$8 sm:$0x3] }
  0x81   :  { %v899_v24 = vcombine.low %v868_v7, %v872_v8  ;;  %v993_v27 = vrot.slane %v214_v59, %v5177_v17  ;;  %v1018_v29 = vrot.slane %v1010_v19, %v5173_v15  ;;  %v906_v31 = vrot.slane %v898_v21, %v5173_v15 }
  0x82   :  { %v1025_v30 = vrot.slane %v1011_v20, %v5173_v15  ;;  %v997_v32 = vrot.slane %v214_v59, %v5179_v18  ;;  %v1044_v34 = vcombine.low %v1005_v22, %v1009_v25  ;;  %v1001_v35 = vrot.slane %v214_v59, %v5193_v38  ;;  %v123_v59 = vld [vmem:[#allocation8] ss:$8 sm:$0xf] }
  0x83   :  { %v913_v33 = vrot.slane %v899_v24, %v5173_v15  ;;  %v1027_v36 = vcombine.low %v989_v26, %v993_v27  ;;  %927 = vrot.lane.b32.xlu0 %v922_v57, %s5035_s8  ;;  %v220_v41 = vor.u32 %v219_v28, %v218_v23  ;;  %v1134_v42 = vrot.slane %v222_v9, %v5163_v10 }
  0x84   :  { %v1026_v37 = vcombine.low %v1018_v29, %v1025_v30  ;;  %v1138_v43 = vrot.slane %v222_v9, %v5165_v11  ;;  %v5341_v44 = vld [vmem:[#allocation3 + $0x12] sm:$0xf]  ;;  %v1051_v46 = vrot.slane %v1044_v34, %v5173_v15  ;;  %v1028_v47 = vcombine.low %v997_v32, %v1001_v35  ;;  %v5372_v29 = vld [vmem:[#allocation11] sm:$0xff] }
  0x85   :  { %v914_v45 = vcombine.low %v906_v31, %v913_v33  ;;  %v1035_v48 = vrot.slane %v1027_v36, %v5173_v15  ;;  %v815_v49 = vmul.f32 %v809_v6, %v5341_v44  ;;  %v1102_v40 = vrot.slane %v220_v41, %v5163_v10  ;;  %107 = vst [vmem:[#allocation2 + $0x2] sm:$0xff] %v5372_v29 }
  0x86   :  { %v1106_v50 = vrot.slane %v220_v41, %v5165_v11  ;;  %v1110_v51 = vrot.slane %v220_v41, %v5167_v12  ;;  %v1042_v55 = vrot.slane %v1028_v47, %v5173_v15  ;;  %v1114_v56 = vrot.slane %v220_v41, %v5169_v13  ;;  %v5387_v47 = vld [vmem:[#allocation11 + $0x8] sm:$0xff] }
  0x87   :  { %v1118_v14 = vrot.slane %v220_v41, %v5175_v16  ;;  %v1122_v57 = vrot.slane %v220_v41, %v5177_v17  ;;  %823 = vrot.lane.b32.xlu1 %v815_v49, %s5030_s5  ;;  %1052 = vrot.lane.b32.xlu0 %v1026_v37, %s5036_s11  ;;  %v1126_v62 = vrot.slane %v220_v41, %v5179_v18  ;;  %vm8174_vm3 = vcmask 719872  }
  0x88   :  { %v1139_v61 = vcombine.low %v1102_v40, %v1106_v50  ;;  %v1130_v63 = vrot.slane %v220_v41, %v5193_v38  ;;  %v1043_v1 = vcombine.low %v1035_v48, %v1042_v55  ;;  %v1140_v2 = vcombine.low %v1110_v51, %v1114_v56  ;;  %v129_v41 = vld [vmem:[#allocation8 + $0x1] ss:$8 sm:$0xf]  ;;  %108 = vst [vmem:[#allocation2 + $0xa] sm:$0xff] %v5387_v47 }
  0x89   :  { %v1156_v3 = vcombine.low %v1118_v14, %v1122_v57  ;;  %v1173_v4 = vcombine.low %v1134_v42, %v1138_v43  ;;  %v226_v7 = vor.u32 %v225_v54, %v224_v53  ;;  %v5358_v8 = vor.u32 %v124_v60, %v123_v59  ;;  %v130_v42 = vld [vmem:[#allocation8 + $0x1] ss:$8 sm:$0xf0] }
  0x8a   :  { %v1147_v5 = vrot.slane %v1139_v61, %v5173_v15  ;;  %v1157_v6 = vcombine.low %v1126_v62, %v1130_v63  ;;  %v1154_v19 = vrot.slane %v1140_v2, %v5173_v15  ;;  %v1263_v22 = vrot.slane %v228_v0, %v5163_v10  ;;  %v133_v63 = vld [vmem:[#allocation8 + $0x41] ss:$8 sm:$0x3] }
  0x8b   :  { %v1164_v20 = vrot.slane %v1156_v3, %v5173_v15  ;;  %v1180_v21 = vrot.slane %v1173_v4, %v5173_v15  ;;  %925 = vrot.lane.b32.xlu1 %v914_v45, %s5035_s8  ;;  %1056 = vrot.lane.b32.xlu0 %v1051_v46, %s5036_s11  ;;  %v1247_v24 = vrot.slane %v226_v7, %v5175_v16  ;;  %vm560_vm4 = vcmask 728064  }
  0x8c   :  { %v1171_v23 = vrot.slane %v1157_v6, %v5173_v15  ;;  %v1251_v25 = vrot.slane %v226_v7, %v5177_v17  ;;  %v1155_v26 = vcombine.low %v1147_v5, %v1154_v19  ;;  %v1255_v27 = vrot.slane %v226_v7, %v5179_v18 }
  0x8d   :  { %v1259_v28 = vrot.slane %v226_v7, %v5193_v38  ;;  %v1231_v9 = vrot.slane %v226_v7, %v5163_v10  ;;  %v1235_v32 = vrot.slane %v226_v7, %v5165_v11  ;;  %v1239_v33 = vrot.slane %v226_v7, %v5167_v12 }
  0x8e   :  { %v1172_v30 = vcombine.low %v1164_v20, %v1171_v23  ;;  %v1285_v31 = vcombine.low %v1247_v24, %v1251_v25  ;;  %v1243_v35 = vrot.slane %v226_v7, %v5169_v13  ;;  %v1385_v36 = vrot.slane %v5358_v8, %v5175_v16  ;;  %v127_v20 = vld [vmem:[#allocation8 + $0x40] ss:$8 sm:$0x3]  ;;  %v135_v25 = vld [vmem:[#allocation8 + $0x2] ss:$8 sm:$0xf] }
  0x8f   :  { %v1286_v34 = vcombine.low %v1255_v27, %v1259_v28  ;;  %v1389_v37 = vrot.slane %v5358_v8, %v5177_v17  ;;  %1054 = vrot.lane.b32.xlu1 %v1043_v1, %s5036_s11  ;;  %1181 = vrot.lane.b32.xlu0 %v1155_v26, %s5037_s12  ;;  %v1268_v45 = vcombine.low %v1231_v9, %v1235_v32  ;;  %v136_v26 = vld [vmem:[#allocation8 + $0x2] ss:$8 sm:$0xf0]  ;;  %vm456_vm5 = vcmask 1039360  }
  0x90   :  { %v1293_v43 = vrot.slane %v1285_v31, %v5173_v15  ;;  %v1393_v46 = vrot.slane %v5358_v8, %v5179_v18  ;;  %v1269_v49 = vcombine.low %v1239_v33, %v1243_v35  ;;  %v1397_v40 = vrot.slane %v5358_v8, %v5193_v38 }
  0x91   :  { %v1300_v48 = vrot.slane %v1286_v34, %v5173_v15  ;;  %v1423_v50 = vcombine.low %v1385_v36, %v1389_v37  ;;  %v1276_v51 = vrot.slane %v1268_v45, %v5173_v15  ;;  %v1267_v53 = vrot.slane %v228_v0, %v5165_v11  ;;  %v99_v0 = vld [vmem:[#allocation11 + $0x10] sm:$0xff] }
  0x92   :  { %v5395_v54 = vor.u32 %v130_v42, %v129_v41  ;;  %v1369_v55 = vrot.slane %v5358_v8, %v5163_v10  ;;  %v1283_v14 = vrot.slane %v1269_v49, %v5173_v15  ;;  %v1424_v57 = vcombine.low %v1393_v46, %v1397_v40  ;;  %109 = vst [vmem:[#allocation2 + $0x12] sm:$0xff] %v99_v0  ;;  %v139_v49 = vld [vmem:[#allocation8 + $0x42] ss:$8 sm:$0x3] }
  0x93   :  { %v1301_v56 = vcombine.low %v1293_v43, %v1300_v48  ;;  %v1431_v59 = vrot.slane %v1423_v50, %v5173_v15  ;;  %1183 = vrot.lane.b32.xlu1 %v1172_v30, %s5037_s12  ;;  %1185 = vrot.lane.b32.xlu0 %v1180_v21, %s5037_s12  ;;  %v1302_v60 = vcombine.low %v1263_v22, %v1267_v53  ;;  %v142_v0 = vld [vmem:[#allocation8 + $0x3] ss:$8 sm:$0xf0]  ;;  %vm932_vm6 = vcmask 7168  }
  0x94   :  { %v1473_v61 = vrot.slane %v5395_v54, %v5163_v10  ;;  %v1477_v62 = vrot.slane %v5395_v54, %v5165_v11  ;;  %v1284_v1 = vcombine.low %v1276_v51, %v1283_v14  ;;  %v1438_v2 = vrot.slane %v1424_v57, %v5173_v15 }
  0x95   :  { %v1481_v3 = vrot.slane %v5395_v54, %v5167_v12  ;;  %v1485_v4 = vrot.slane %v5395_v54, %v5169_v13  ;;  %v1309_v5 = vrot.slane %v1302_v60, %v5173_v15  ;;  %v1373_v7 = vrot.slane %v5358_v8, %v5165_v11 }
  0x96   :  { %v1510_v6 = vcombine.low %v1473_v61, %v1477_v62  ;;  %v1377_v19 = vrot.slane %v5358_v8, %v5167_v12  ;;  %v5417_v21 = vcombine.low %v1431_v59, %v1438_v2  ;;  %v1381_v23 = vrot.slane %v5358_v8, %v5169_v13 }
  0x97   :  { %v1511_v22 = vcombine.low %v1481_v3, %v1485_v4  ;;  %v1505_v24 = vrot.slane %v133_v63, %v5163_v10  ;;  %1312 = vrot.lane.b32.xlu1 %v1301_v56, %s5038_s13  ;;  %1310 = vrot.lane.b32.xlu0 %v1284_v1, %s5038_s13  ;;  %v1406_v28 = vcombine.low %v1369_v55, %v1373_v7  ;;  %v145_v3 = vld [vmem:[#allocation8 + $0x43] ss:$8 sm:$0x3]  ;;  %vm1061_vm7 = vcmask 318464  }
  0x98   :  { %8186 = vst [vmem:[#allocation22_spill] sm:$0xff] %v5417_v21  ;;  %v1518_v27 = vrot.slane %v1510_v6, %v5173_v15  ;;  %v1509_v9 = vrot.slane %v133_v63, %v5165_v11  ;;  %v1407_v31 = vcombine.low %v1377_v19, %v1381_v23  ;;  %v1401_v32 = vrot.slane %v127_v20, %v5163_v10  ;;  %v141_v63 = vld [vmem:[#allocation8 + $0x3] ss:$8 sm:$0xf] }
  0x99   :  { %v1525_v30 = vrot.slane %v1511_v22, %v5173_v15  ;;  %v1405_v8 = vrot.slane %v127_v20, %v5165_v11  ;;  %v1414_v33 = vrot.slane %v1406_v28, %v5173_v15  ;;  %v137_v35 = vor.u32 %v136_v26, %v135_v25 }
  0x9a   :  { %v1544_v34 = vcombine.low %v1505_v24, %v1509_v9  ;;  %v1489_v36 = vrot.slane %v5395_v54, %v5175_v16  ;;  %v1421_v41 = vrot.slane %v1407_v31, %v5173_v15  ;;  %v1493_v43 = vrot.slane %v5395_v54, %v5177_v17 }
  0x9b   :  { %v5432_v37 = vcombine.low %v1518_v27, %v1525_v30  ;;  %v1440_v42 = vcombine.low %v1401_v32, %v1405_v8  ;;  %1450 = vrot.lane.b32.xlu1 %v5417_v21, %s5030_s5  ;;  %1314 = vrot.lane.b32.xlu0 %v1309_v5, %s5038_s13  ;;  %v1600_v46 = vrot.slane %v137_v35, %v5163_v10  ;;  %vm1190_vm8 = vcmask 326656  }
  0x9c   :  { %v5441_v45 = vrot.slane %v1544_v34, %v5173_v15  ;;  %v1604_v48 = vrot.slane %v137_v35, %v5165_v11  ;;  %v5445_v40 = vcombine.low %v1414_v33, %v1421_v41  ;;  %v1608_v51 = vrot.slane %v137_v35, %v5167_v12 }
  0x9d   :  { %8187 = vst [vmem:[#allocation23_spill] sm:$0xff] %v5432_v37  ;;  %v5448_v50 = vrot.slane %v1440_v42, %v5173_v15  ;;  %v1612_v53 = vrot.slane %v137_v35, %v5169_v13  ;;  %v1497_v56 = vrot.slane %v5395_v54, %v5179_v18  ;;  %v1501_v14 = vrot.slane %v5395_v54, %v5193_v38 }
  0x9e   :  { %8188 = vst [vmem:[#allocation24_spill] sm:$0xff] %v5441_v45  ;;  %8189 = vst [vmem:[#allocation25_spill] sm:$0xff] %v5445_v40  ;;  %v1637_v55 = vcombine.low %v1600_v46, %v1604_v48  ;;  %v1527_v57 = vcombine.low %v1489_v36, %v1493_v43  ;;  %v1632_v60 = vrot.slane %v139_v49, %v5163_v10  ;;  %vm1319_vm9 = vcmask 334848  }
  0x9f   :  { %8190 = vst [vmem:[#allocation26_spill] sm:$0xff] %v5448_v50  ;;  %v1638_v59 = vcombine.low %v1608_v51, %v1612_v53  ;;  %v1636_v61 = vrot.slane %v139_v49, %v5165_v11  ;;  %v1616_v62 = vrot.slane %v137_v35, %v5175_v16  ;;  %1552 = vrot.lane.b32.xlu1 %v5432_v37, %s5031_s30  ;;  %vm2735_vm10 = vcmask 64512  }
  0xa0   :  { %1448 = vrot.lane.b32.xlu0 %v5445_v40, %s5030_s5  ;;  %v1645_v1 = vrot.slane %v1637_v55, %v5173_v15  ;;  %v1528_v2 = vcombine.low %v1497_v56, %v1501_v14  ;;  %v1535_v54 = vrot.slane %v1527_v57, %v5173_v15  ;;  %v1620_v5 = vrot.slane %v137_v35, %v5177_v17 }
  0xa1   :  { %v1652_v4 = vrot.slane %v1638_v59, %v5173_v15  ;;  %v1624_v6 = vrot.slane %v137_v35, %v5179_v18  ;;  %v1628_v19 = vrot.slane %v137_v35, %v5193_v38  ;;  %v143_v20 = vor.u32 %v142_v0, %v141_v63 }
  0xa2   :  { %v1542_v7 = vrot.slane %v1528_v2, %v5173_v15  ;;  %v1671_v23 = vcombine.low %v1632_v60, %v1636_v61  ;;  %v1654_v24 = vcombine.low %v1616_v62, %v1620_v5  ;;  %v1759_v25 = vrot.slane %v145_v3, %v5163_v10 }
  0xa3   :  { %v5470_v22 = vcombine.low %v1645_v1, %v1652_v4  ;;  %1556 = vrot.lane.b32.xlu1 %v5441_v45, %s5031_s30  ;;  %v1655_v27 = vcombine.low %v1624_v6, %v1628_v19  ;;  %v1727_v28 = vrot.slane %v143_v20, %v5163_v10  ;;  %v1731_v30 = vrot.slane %v143_v20, %v5165_v11 }
  0xa4   :  { %1452 = vrot.lane.b32.xlu0 %v5448_v50, %s5030_s5  ;;  %v5477_v26 = vcombine.low %v1535_v54, %v1542_v7  ;;  %v1662_v9 = vrot.slane %v1654_v24, %v5173_v15  ;;  %v1735_v31 = vrot.slane %v143_v20, %v5167_v12  ;;  %v1739_v32 = vrot.slane %v143_v20, %v5169_v13  ;;  %v229_v54 = vld [vmem:[#allocation3] sm:$0xff] }
  0xa5   :  { %8191 = vst [vmem:[#allocation27_spill] sm:$0xff] %v5470_v22  ;;  %v1669_v8 = vrot.slane %v1655_v27, %v5173_v15  ;;  %v1743_v33 = vrot.slane %v143_v20, %v5175_v16  ;;  %v1747_v34 = vrot.slane %v143_v20, %v5177_v17  ;;  %v1751_v35 = vrot.slane %v143_v20, %v5179_v18 }
  0xa6   :  { %8192 = vst [vmem:[#allocation28_spill] sm:$0xff] %v5477_v26  ;;  %v5489_v36 = vrot.slane %v1671_v23, %v5173_v15  ;;  %v1764_v41 = vcombine.low %v1727_v28, %v1731_v30  ;;  %v1765_v42 = vcombine.low %v1735_v31, %v1739_v32  ;;  %v1755_v43 = vrot.slane %v143_v20, %v5193_v38 }
  0xa7   :  { %1679 = vrot.lane.b32.xlu1 %v5470_v22, %s5032_s0  ;;  %v5496_v46 = vcombine.low %v1662_v9, %v1669_v8  ;;  %v1781_v48 = vcombine.low %v1743_v33, %v1747_v34  ;;  %v1763_v49 = vrot.slane %v145_v3, %v5165_v11  ;;  %vm2779_vm11 = vcmask 72704  }
  0xa8   :  { %8193 = vst [vmem:[#allocation29_spill] sm:$0xff] %v5489_v36  ;;  %1554 = vrot.lane.b32.xlu0 %v5477_v26, %s5031_s30  ;;  %v1772_v51 = vrot.slane %v1764_v41, %v5173_v15  ;;  %v1779_v53 = vrot.slane %v1765_v42, %v5173_v15  ;;  %v1782_v55 = vcombine.low %v1751_v35, %v1755_v43  ;;  %vm8169_vm12 = vcmask 384000  }
  0xa9   :  { %8194 = vst [vmem:[#allocation30_spill] sm:$0xff] %v5496_v46  ;;  %v1789_v56 = vrot.slane %v1781_v48, %v5173_v15  ;;  %v1798_v59 = vcombine.low %v1759_v25, %v1763_v49  ;;  %vm8172_vm13 = vcmask 1045504   ;;  %vm8173_vm14 = vcmask 711680  }
  0xaa   :  { %v1796_v14 = vrot.slane %v1782_v55, %v5173_v15  ;;  %v5507_v57 = vcombine.low %v1772_v51, %v1779_v53  ;;  %vm8175_vm15 = vcmask 1031168   ;;  %vm8171_vm1 = vcmask 703488  }
  0xab   :  { %1683 = vrot.lane.b32.xlu1 %v5489_v36, %s5032_s0  ;;  %v5516_v61 = vrot.slane %v1798_v59, %v5173_v15 }
  0xac   :  { %1681 = vrot.lane.b32.xlu0 %v5496_v46, %s5032_s0  ;;  %8195 = vst [vmem:[#allocation31_spill] sm:$0xff] %v5507_v57  ;;  %v5509_v60 = vcombine.low %v1789_v56, %v1796_v14 }
  0xad   :  { %8197 = vst [vmem:[#allocation33_spill] sm:$0xff] %v5516_v61 }
  0xae   :  { %8196 = vst [vmem:[#allocation32_spill] sm:$0xff] %v5509_v60 }
  0xaf   :  { %1806 = vrot.lane.b32.xlu1 %v5507_v57, %s5033_s7 }
  0xb0   :  { %1808 = vrot.lane.b32.xlu0 %v5509_v60, %s5033_s7 }
  0xb3   :  { %1810 = vrot.lane.b32.xlu1 %v5516_v61, %s5033_s7 }
  0xd3   :  { %v5520_v62 = vpop.permute.xlu1 %320 }
  0xd4   :  { %8198 = vst [vmem:[#allocation34_spill] sm:$0xff] %v5520_v62 }
  0xd6   :  { %v5522_v63 = vpop.permute.xlu0 %316 }
  0xd7   :  { %8199 = vst [vmem:[#allocation35_spill] sm:$0xff] %v5522_v63  ;;  %v5524_v0 = vpop.permute.xlu1 %425 }
  0xda   :  { %v5526_v1 = vpop.permute.xlu0 %318 }
  0xdb   :  { %8200 = vst [vmem:[#allocation36_spill] sm:$0xff] %v5526_v1 }
  0xdc   :  { %v422_v2 = vpop.permute.xlu1 %421 }
  0xdd   :  { %v427_v3 = vrot.slane %v422_v2, 6 }
  0xde   :  { %v5528_v4 = vpop.permute.xlu0 %423 }
  0xdf   :  { %v431_v5 = vsel %vm8174_vm3, %v427_v3, %v422_v2 }
  0xe0   :  { %v5531_v6 = vpop.permute.xlu1 %551  ;;  %v439_v7 = vmul.f32 %v431_v5, %v229_v54 }
  0xe1   :  { %v557_v19 = vrot.slane %v5531_v6, 6 }
  0xe2   :  { %445 = vrot.lane.b32.xlu0 %v439_v7, %s5033_s7 }
  0xe3   :  { %v561_v20 = vsel %vm560_vm4, %v557_v19, %v5531_v6  ;;  %v5537_v23 = vpop.permute.xlu0 %553 }
  0xe4   :  { %v5539_v24 = vpop.permute.xlu1 %555  ;;  %v569_v25 = vmul.f32 %v561_v20, %v229_v54 }
  0xe6   :  { %575 = vrot.lane.b32.xlu0 %v569_v25, %s5039_s14  ;;  %v8040_v25 = vrot.slane %v5528_v4, 6 }
  0xe7   :  { %v5542_v27 = vpop.permute.xlu0 %682 }
  0xe9   :  { %v5544_v28 = vpop.permute.xlu1 %680 }
  0xea   :  { %v686_v9 = vrot.slane %v5544_v28, 6 }
  0xec   :  { %v689_v30 = vsel %vm456_vm5, %v686_v9, %v5544_v28 }
  0xed   :  { %v5549_v31 = vpop.permute.xlu0 %821  ;;  %v5551_v32 = vpop.permute.xlu1 %684  ;;  %v697_v8 = vmul.f32 %v689_v30, %v229_v54 }
  0xee   :  { %8201 = vst [vmem:[#allocation37_spill] sm:$0xff] %v5549_v31 }
  0xef   :  { %703 = vrot.lane.b32.xlu0 %v697_v8, %s5031_s30 }
  0xf1   :  { %v5554_v33 = vpop.permute.xlu0 %923 }
  0xf2   :  { %v8039_v34 = vrot.slane %v5554_v33, 6  ;;  %v5557_v35 = vpop.permute.xlu1 %819 }
  0xf3   :  { %8202 = vst [vmem:[#allocation38_spill] sm:$0xff] %v5557_v35 }
  0xf4   :  { %v933_v41 = vsel %vm932_vm6, %v8039_v34, %v5554_v33 }
  0xf5   :  { %v5563_v42 = vpop.permute.xlu0 %927  ;;  %v941_v43 = vmul.f32 %v933_v41, %v5195_v39  ;;  %v432_v41 = vsel %vm90_vm0, %v427_v3, %v8040_v25 }
  0xf6   :  { %v931_v58 = vrot.slane %v5563_v42, 6 }
  0xf7   :  { %947 = vrot.lane.b32.xlu1 %v941_v43, %s5040_s15  ;;  %v8042_v43 = vrot.slane %v5537_v23, 6 }
  0xf9   :  { %v5567_v48 = vpop.permute.xlu1 %823  ;;  %v5569_v49 = vpop.permute.xlu0 %1052  ;;  %v562_v3 = vsel %vm90_vm0, %v557_v19, %v8042_v43 }
  0xfa   :  { %8203 = vst [vmem:[#allocation39_spill] sm:$0xff] %v5567_v48  ;;  %v8037_v51 = vrot.slane %v5569_v49, 6 }
  0xfc   :  { %v1062_v53 = vsel %vm1061_vm7, %v8037_v51, %v5569_v49  ;;  %v8046_v51 = vrot.slane %v5542_v27, 6 }
  0xfd   :  { %v5576_v55 = vpop.permute.xlu1 %925  ;;  %v5578_v56 = vpop.permute.xlu0 %1056  ;;  %v1070_v14 = vmul.f32 %v1062_v53, %v5195_v39 }
  0xfe   :  { %v1060_v19 = vrot.slane %v5578_v56, 6 }
  0xff   :  { %1076 = vrot.lane.b32.xlu1 %v1070_v14, %s5041_s16 }
 0x101   :  { %v5582_v59 = vpop.permute.xlu1 %1054  ;;  %v5584_v2 = vpop.permute.xlu0 %1181 }
 0x102   :  { %v8036_v54 = vrot.slane %v5584_v2, 6 }
 0x104   :  { %v1191_v5 = vsel %vm1190_vm8, %v8036_v54, %v5584_v2  ;;  %v433_v54 = vsel %vm8174_vm3, %v432_v41, %v5528_v4  ;;  %v1361_v41 = vld [vmem:[#allocation2] sm:$0xff] }
 0x105   :  { %v5591_v6 = vpop.permute.xlu1 %1183  ;;  %v5593_v7 = vpop.permute.xlu0 %1185  ;;  %v1199_v20 = vmul.f32 %v1191_v5, %v5195_v39  ;;  %v440_v25 = vmul.f32 %v433_v54, %v230_v52 }
 0x107   :  { %1205 = vrot.lane.b32.xlu1 %v1199_v20, %s5042_s17 }
 0x109   :  { %v5598_v28 = vpop.permute.xlu1 %1312  ;;  %v5600_v30 = vpop.permute.xlu0 %1310 }
 0x10a   :  { %v8038_v8 = vrot.slane %v5600_v30, 6 }
 0x10c   :  { %v1320_v53 = vsel %vm1319_vm9, %v8038_v8, %v5600_v30 }
 0x10d   :  { %v5611_v14 = vpop.permute.xlu1 %1450  ;;  %v5613_v5 = vpop.permute.xlu0 %1314  ;;  %v1328_v20 = vmul.f32 %v1320_v53, %v5195_v39  ;;  %v563_v39 = vsel %vm560_vm4, %v562_v3, %v5537_v23 }
 0x10e   :  { %8204 = vst [vmem:[#allocation40_spill] sm:$0xff] %v5611_v14  ;;  %v570_v3 = vmul.f32 %v563_v39, %v230_v52 }
 0x10f   :  { %1334 = vrot.lane.b32.xlu1 %v1328_v20, %s5043_s18  ;;  %v690_v20 = vsel %vm90_vm0, %v686_v9, %v8046_v51  ;;  %v8207_v9 = vrot.slane %v5576_v55, 6 }
 0x110   :  { %v691_v31 = vsel %vm456_vm5, %v690_v20, %v5542_v27  ;;  %v1189_v20 = vrot.slane %v5593_v7, 6 }
 0x111   :  { %v5623_v8 = vpop.permute.xlu1 %1552 }
 0x112   :  { %v5625_v34 = vpop.permute.xlu0 %1448  ;;  %v1558_v53 = vrot.slane %v5623_v8, 6 }
 0x113   :  { %8205 = vst [vmem:[#allocation41_spill] sm:$0xff] %v5625_v34  ;;  %447 = vrot.lane.b32.xlu1 %v440_v25, %s5033_s7  ;;  %v8051_v25 = vrot.slane %v5582_v59, 6  ;;  %v147_v34 = vld [vmem:[#allocation8 + $0x4] ss:$8 sm:$0xf] }
 0x114   :  { %v1561_v43 = vsel %vm8174_vm3, %v1558_v53, %v5623_v8  ;;  %v936_v8 = vsel %vm90_vm0, %v8207_v9, %v931_v58 }
 0x115   :  { %v5638_v54 = vpop.permute.xlu1 %1556  ;;  %v1569_v14 = vmul.f32 %v1561_v43, %v1361_v41  ;;  %v698_v43 = vmul.f32 %v691_v31, %v230_v52  ;;  %v8052_v52 = vrot.slane %v5591_v6, 6 }
 0x116   :  { %v5640_v48 = vpop.permute.xlu0 %1452 }
 0x117   :  { %8206 = vst [vmem:[#allocation42_spill] sm:$0xff] %v5640_v48  ;;  %1575 = vrot.lane.b32.xlu0 %v1569_v14, %s5033_s7  ;;  %577 = vrot.lane.b32.xlu1 %v570_v3, %s5039_s14  ;;  %v937_v48 = vsel %vm932_vm6, %v936_v8, %v5563_v42  ;;  %v1065_v14 = vsel %vm90_vm0, %v8051_v25, %v1060_v19  ;;  %v148_v3 = vld [vmem:[#allocation8 + $0x4] ss:$8 sm:$0xf0] }
 0x118   :  { %v943_v42 = vmul.f32 %v937_v48, %v5341_v44  ;;  %v1066_v9 = vsel %vm1061_vm7, %v1065_v14, %v5578_v56  ;;  %v5667_v8 = vor.u32 %v148_v3, %v147_v34  ;;  %v1194_v19 = vsel %vm90_vm0, %v8052_v52, %v1189_v20 }
 0x119   :  { %v1680_v51 = vpop.permute.xlu1 %1679  ;;  %v1072_v25 = vmul.f32 %v1066_v9, %v5341_v44  ;;  %v1195_v34 = vsel %vm1190_vm8, %v1194_v19, %v5593_v7  ;;  %v559_v3 = vrot.slane %v5539_v24, 6  ;;  %v8208_v9 = vrot.slane %v5528_v4, 6 }
 0x11a   :  { %v1685_v39 = vrot.slane %v1680_v51, 6  ;;  %v5659_v62 = vpop.permute.xlu0 %1554  ;;  %v1857_v20 = vrot.slane %v5667_v8, %v5163_v10  ;;  %v1861_v52 = vrot.slane %v5667_v8, %v5165_v11  ;;  %v1865_v1 = vrot.slane %v5667_v8, %v5167_v12 }
 0x11b   :  { %705 = vrot.lane.b32.xlu1 %v698_v43, %s5031_s30  ;;  %v429_v43 = vrot.slane %v5524_v0, 6  ;;  %v1869_v63 = vrot.slane %v5667_v8, %v5169_v13 }
 0x11c   :  { %v1688_v35 = vsel %vm560_vm4, %v1685_v39, %v1680_v51  ;;  %v1318_v51 = vrot.slane %v5613_v5, 6 }
 0x11d   :  { %v5662_v58 = vpop.permute.xlu1 %1683  ;;  %v1696_v31 = vmul.f32 %v1688_v35, %v1361_v41  ;;  %v8055_v35 = vrot.slane %v5598_v28, 6  ;;  %v434_v7 = vsel %vm90_vm0, %v8208_v9, %v429_v43  ;;  %v8209_v43 = vrot.slane %v5537_v23, 6 }
 0x11e   :  { %v5680_v56 = vpop.permute.xlu0 %1681  ;;  %v435_v4 = vsel %vm8174_vm3, %v434_v7, %v5524_v0  ;;  %v688_v9 = vrot.slane %v5551_v32, 6  ;;  %v1894_v0 = vcombine.low %v1857_v20, %v1861_v52  ;;  %v1895_v23 = vcombine.low %v1865_v1, %v1869_v63 }
 0x11f   :  { %1702 = vrot.lane.b32.xlu0 %v1696_v31, %s5039_s14  ;;  %951 = vrot.lane.b32.xlu1 %v943_v42, %s5040_s15  ;;  %v1323_v31 = vsel %vm90_vm0, %v8055_v35, %v1318_v51  ;;  %v1559_v42 = vrot.slane %v5659_v62, 6  ;;  %v1201_v35 = vmul.f32 %v1195_v34, %v5341_v44  ;;  %v5717_v34 = vld [vmem:[#allocation3 + $0x10] sm:$0x3f] }
 0x120   :  { %v1909_v52 = vrot.slane %v1895_v23, %v5173_v15  ;;  %v8212_v23 = vrot.slane %v5554_v33, 6 }
 0x121   :  { %v1807_v48 = vpop.permute.xlu1 %1806  ;;  %v1562_v60 = vsel %vm90_vm0, %v1558_v53, %v1559_v42 }
 0x122   :  { %v1812_v14 = vrot.slane %v1807_v48, 6  ;;  %v1563_v53 = vsel %vm8174_vm3, %v1562_v60, %v5659_v62  ;;  %v1902_v60 = vrot.slane %v1894_v0, %v5173_v15  ;;  %v8211_v0 = vrot.slane %v5576_v55, 6 }
 0x123   :  { %1080 = vrot.lane.b32.xlu1 %v1072_v25, %s5041_s16  ;;  %v1324_v25 = vsel %vm1319_vm9, %v1323_v31, %v5613_v5  ;;  %v5715_v5 = vpop.permute.xlu0 %1808 }
 0x124   :  { %v1815_v19 = vsel %vm456_vm5, %v1812_v14, %v1807_v48  ;;  %v564_v48 = vsel %vm90_vm0, %v8209_v43, %v559_v3  ;;  %v441_v3 = vmul.f32 %v435_v4, %v5717_v34  ;;  %v1330_v31 = vmul.f32 %v1324_v25, %v5341_v44  ;;  %v154_v44 = vld [vmem:[#allocation8 + $0x5] ss:$8 sm:$0xf0] }
 0x125   :  { %v1823_v51 = vmul.f32 %v1815_v19, %v1361_v41  ;;  %v1686_v41 = vrot.slane %v5680_v56, 6  ;;  %v565_v7 = vsel %vm560_vm4, %v564_v48, %v5539_v24  ;;  %v151_v19 = vld [vmem:[#allocation8 + $0x44] ss:$8 sm:$0x3]  ;;  %v1813_v1 = vrot.slane %v5715_v5, 6 }
 0x126   :  { %v5734_v24 = vld [vmem:[#allocation2 + $0x8] sm:$0xff]  ;;  %v1889_v25 = vrot.slane %v151_v19, %v5163_v10 }
 0x127   :  { %1829 = vrot.lane.b32.xlu0 %v1823_v51, %s5031_s30  ;;  %1209 = vrot.lane.b32.xlu1 %v1201_v35, %s5042_s17  ;;  %v153_v51 = vld [vmem:[#allocation8 + $0x5] ss:$8 sm:$0xf]  ;;  %v8210_v35 = vrot.slane %v5542_v27, 6  ;;  %v1689_v63 = vsel %vm90_vm0, %v1685_v39, %v1686_v41  ;;  %v571_v27 = vmul.f32 %v565_v7, %v5717_v34  ;;  %v1570_v20 = vmul.f32 %v1563_v53, %v5734_v24 }
 0x128   :  { %v1893_v39 = vrot.slane %v151_v19, %v5165_v11  ;;  %v1690_v48 = vsel %vm560_vm4, %v1689_v63, %v5680_v56  ;;  %v5760_v53 = vcombine.low %v1902_v60, %v1909_v52  ;;  %v8215_v63 = vrot.slane %v5569_v49, 6  ;;  %v4884_v52 = vld [vmem:[#allocation3 + $0xa] sm:$0xff] }
 0x129   :  { %v692_v43 = vsel %vm90_vm0, %v8210_v35, %v688_v9  ;;  %v5746_v9 = vor.u32 %v154_v44, %v153_v51  ;;  %v1697_v7 = vmul.f32 %v1690_v48, %v5734_v24  ;;  %v8218_v48 = vrot.slane %v5584_v2, 6 }
 0x12a   :  { %v693_v4 = vsel %vm456_vm5, %v692_v43, %v5551_v32  ;;  %8213 = vst [vmem:[#allocation43_spill] sm:$0xff] %v5760_v53  ;;  %v1928_v19 = vcombine.low %v1889_v25, %v1893_v39  ;;  %v8214_v43 = vrot.slane %v5582_v59, 6  ;;  %v1939_v49 = vmul.f32 %v5760_v53, %v5372_v29 }
 0x12b   :  { %449 = vrot.lane.b32.xlu0 %v441_v3, %s5033_s7  ;;  %1338 = vrot.lane.b32.xlu1 %v1330_v31, %s5043_s18  ;;  %v934_v3 = vsel %vm90_vm0, %v8212_v23, %v8211_v0  ;;  %v1816_v31 = vsel %vm90_vm0, %v1812_v14, %v1813_v1  ;;  %v699_v32 = vmul.f32 %v693_v4, %v5717_v34  ;;  %v8217_v4 = vrot.slane %v5591_v6, 6  ;;  %v5796_v23 = vld [vmem:[#allocation2 + $0x12] sm:$0xf] }
 0x12c   :  { %v935_v33 = vsel %vm932_vm6, %v934_v3, %v5576_v55  ;;  %v1817_v51 = vsel %vm456_vm5, %v1816_v31, %v5715_v5  ;;  %v1986_v14 = vrot.slane %v5746_v9, %v5175_v16  ;;  %v1990_v35 = vrot.slane %v5746_v9, %v5177_v17 }
 0x12d   :  { %v1063_v44 = vsel %vm90_vm0, %v8215_v63, %v8214_v43  ;;  %v1994_v55 = vrot.slane %v5746_v9, %v5179_v18  ;;  %v1998_v60 = vrot.slane %v5746_v9, %v5193_v38  ;;  %v5787_v39 = vrot.slane %v1928_v19, %v5173_v15 }
 0x12e   :  { %v1064_v25 = vsel %vm1061_vm7, %v1063_v44, %v5582_v59  ;;  %v1192_v0 = vsel %vm90_vm0, %v8218_v48, %v8217_v4  ;;  %v2024_v3 = vcombine.low %v1986_v14, %v1990_v35  ;;  %v8219_v2 = vrot.slane %v5598_v28, 6 }
 0x12f   :  { %579 = vrot.lane.b32.xlu0 %v571_v27, %s5039_s14  ;;  %1577 = vrot.lane.b32.xlu1 %v1570_v20, %s5033_s7  ;;  %v942_v27 = vmul.f32 %v4884_v52, %v935_v33  ;;  %v1824_v20 = vmul.f32 %v1817_v51, %v5734_v24  ;;  %8216 = vst [vmem:[#allocation44_spill] sm:$0xff] %v5787_v39  ;;  %v8220_v19 = vrot.slane %v5600_v30, 6  ;;  %v1560_v35 = vrot.slane %v5638_v54, 6 }
 0x130   :  { %v2025_v59 = vcombine.low %v1994_v55, %v1998_v60  ;;  %v1071_v31 = vmul.f32 %v4884_v52, %v1064_v25  ;;  %v2032_v51 = vrot.slane %v2024_v3, %v5173_v15  ;;  %v1873_v43 = vrot.slane %v5667_v8, %v5175_v16 }
 0x131   :  { %v1321_v33 = vsel %vm90_vm0, %v8220_v19, %v8219_v2  ;;  %v1877_v44 = vrot.slane %v5667_v8, %v5177_v17  ;;  %v1881_v30 = vrot.slane %v5667_v8, %v5179_v18  ;;  %v1885_v55 = vrot.slane %v5667_v8, %v5193_v38  ;;  %v157_v19 = vld [vmem:[#allocation8 + $0x45] ss:$8 sm:$0x3] }
 0x132   :  { %v2039_v14 = vrot.slane %v2025_v59, %v5173_v15  ;;  %v1322_v63 = vsel %vm1319_vm9, %v1321_v33, %v5598_v28  ;;  %v1564_v60 = vsel %vm90_vm0, %v1559_v42, %v1560_v35  ;;  %v1811_v28 = vpop.permute.xlu1 %1810  ;;  %v5838_v42 = vld [vmem:[#allocation2 + $0x10] sm:$0x3f]  ;;  %v1970_v59 = vrot.slane %v5746_v9, %v5163_v10 }
 0x133   :  { %707 = vrot.lane.b32.xlu0 %v699_v32, %s5031_s30  ;;  %1704 = vrot.lane.b32.xlu1 %v1697_v7, %s5039_s14  ;;  %v1193_v32 = vsel %vm1190_vm8, %v1192_v0, %v5591_v6  ;;  %v1941_v7 = vmul.f32 %v5787_v39, %v5796_v23  ;;  %v1329_v25 = vmul.f32 %v4884_v52, %v1322_v63  ;;  %v1814_v8 = vrot.slane %v1811_v28, 6 }
 0x134   :  { %v1200_v6 = vmul.f32 %v4884_v52, %v1193_v32  ;;  %v1911_v4 = vcombine.low %v1873_v43, %v1877_v44  ;;  %v1912_v48 = vcombine.low %v1881_v30, %v1885_v55  ;;  %v2002_v35 = vrot.slane %v157_v19, %v5163_v10 }
 0x135   :  { %v1818_v56 = vsel %vm90_vm0, %v1813_v1, %v1814_v8 }
 0x136   :  { %v1926_v3 = vrot.slane %v1912_v48, %v5173_v15 }
 0x137   :  { %949 = vrot.lane.b32.xlu0 %v942_v27, %s5040_s15  ;;  %1831 = vrot.lane.b32.xlu1 %v1824_v20, %s5031_s30  ;;  %v5827_v27 = vcombine.low %v2032_v51, %v2039_v14  ;;  %v1687_v20 = vrot.slane %v5662_v58, 6 }
 0x139   :  { %8221 = vst [vmem:[#allocation45_spill] sm:$0xff] %v5827_v27  ;;  %v1691_v62 = vsel %vm90_vm0, %v1686_v41, %v1687_v20  ;;  %v1974_v41 = vrot.slane %v5746_v9, %v5165_v11 }
 0x13a   :  { %v1692_v52 = vsel %vm560_vm4, %v1691_v62, %v5662_v58  ;;  %v1982_v58 = vrot.slane %v5746_v9, %v5169_v13 }
 0x13b   :  { %1078 = vrot.lane.b32.xlu0 %v1071_v31, %s5041_s16  ;;  %1945 = vrot.lane.b32.xlu1 %v1939_v49, %s5030_s5  ;;  %v1565_v49 = vsel %vm8174_vm3, %v1564_v60, %v5638_v54  ;;  %v1919_v54 = vrot.slane %v1911_v4, %v5173_v15  ;;  %v1978_v31 = vrot.slane %v5746_v9, %v5167_v12 }
 0x13c   :  { %v1571_v0 = vmul.f32 %v1565_v49, %v5838_v42  ;;  %v1698_v32 = vmul.f32 %v1692_v52, %v5838_v42  ;;  %v2007_v5 = vcombine.low %v1970_v59, %v1974_v41 }
 0x13d   :  { %v5859_v2 = vcombine.low %v1919_v54, %v1926_v3  ;;  %v2008_v1 = vcombine.low %v1978_v31, %v1982_v58 }
 0x13e   :  { %v2015_v9 = vrot.slane %v2007_v5, %v5173_v15 }
 0x13f   :  { %1207 = vrot.lane.b32.xlu0 %v1200_v6, %s5042_s17  ;;  %1949 = vrot.lane.b32.xlu1 %v1941_v7, %s5030_s5  ;;  %v1819_v7 = vsel %vm456_vm5, %v1818_v56, %v1811_v28  ;;  %8222 = vst [vmem:[#allocation46_spill] sm:$0xff] %v5859_v2  ;;  %v1940_v51 = vmul.f32 %v5859_v2, %v5387_v47 }
 0x140   :  { %v1825_v33 = vmul.f32 %v1819_v7, %v5838_v42  ;;  %v2022_v14 = vrot.slane %v2008_v1, %v5173_v15  ;;  %v2006_v6 = vrot.slane %v157_v19, %v5165_v11 }
 0x142   :  { %v5871_v43 = vcombine.low %v2015_v9, %v2022_v14  ;;  %v2041_v63 = vcombine.low %v2002_v35, %v2006_v6  ;;  %v159_v35 = vld [vmem:[#allocation8 + $0x6] ss:$8 sm:$0xf] }
 0x143   :  { %1336 = vrot.lane.b32.xlu0 %v1329_v25, %s5043_s18  ;;  %2051 = vrot.lane.b32.xlu1 %v5827_v27, %s5035_s8  ;;  %v160_v6 = vld [vmem:[#allocation8 + $0x6] ss:$8 sm:$0xf0] }
 0x144   :  { %8223 = vst [vmem:[#allocation47_spill] sm:$0xff] %v5871_v43  ;;  %v5876_v44 = vrot.slane %v2041_v63, %v5173_v15 }
 0x146   :  { %8224 = vst [vmem:[#allocation48_spill] sm:$0xff] %v5876_v44 }
 0x147   :  { %1579 = vrot.lane.b32.xlu0 %v1571_v0, %s5033_s7 }
 0x14b   :  { %1706 = vrot.lane.b32.xlu0 %v1698_v32, %s5039_s14 }
 0x14f   :  { %1833 = vrot.lane.b32.xlu0 %v1825_v33, %s5031_s30 }
 0x153   :  { %1947 = vrot.lane.b32.xlu0 %v1940_v51, %s5030_s5 }
 0x154   :  { %v5888_v20 = vpop.permute.xlu0 %445 }
 0x157   :  { %2049 = vrot.lane.b32.xlu0 %v5871_v43, %s5035_s8 }
 0x158   :  { %v5892_v49 = vpop.permute.xlu0 %575 }
 0x15b   :  { %2053 = vrot.lane.b32.xlu0 %v5876_v44, %s5035_s8  ;;  %v161_v44 = vor.u32 %v160_v6, %v159_v35  ;;  %s5056_s8 = smov 104  }
 0x15d   :  { %v2097_v39 = vrot.slane %v161_v44, %v5163_v10  ;;  %v2101_v2 = vrot.slane %v161_v44, %v5165_v11  ;;  %v2105_v53 = vrot.slane %v161_v44, %v5167_v12  ;;  %v2117_v35 = vrot.slane %v161_v44, %v5177_v17 }
 0x15e   :  { %v2121_v6 = vrot.slane %v161_v44, %v5179_v18 }
 0x161   :  { %v5896_v48 = vpop.permute.xlu0 %703 }
 0x169   :  { %v5880_v30 = vpop.permute.xlu1 %947 }
 0x171   :  { %v5882_v55 = vpop.permute.xlu1 %1076 }
 0x179   :  { %v5884_v60 = vpop.permute.xlu1 %1205 }
 0x181   :  { %v5886_v28 = vpop.permute.xlu1 %1334 }
 0x185   :  { %v5890_v25 = vpop.permute.xlu1 %447 }
 0x189   :  { %v5894_v4 = vpop.permute.xlu1 %577  ;;  %v5900_v62 = vpop.permute.xlu0 %1575 }
 0x18d   :  { %v5898_v8 = vpop.permute.xlu1 %705 }
 0x191   :  { %v5902_v0 = vpop.permute.xlu1 %951  ;;  %v5904_v52 = vpop.permute.xlu0 %1702 }
 0x192   :  { %8225 = vst [vmem:[#allocation49_spill] sm:$0xff] %v5902_v0  ;;  %8226 = vst [vmem:[#allocation50_spill] sm:$0xff] %v5904_v52 }
 0x195   :  { %v5906_v54 = vpop.permute.xlu1 %1080 }
 0x196   :  { %8227 = vst [vmem:[#allocation51_spill] sm:$0xff] %v5906_v54 }
 0x199   :  { %v5908_v3 = vpop.permute.xlu0 %1829  ;;  %v5910_v59 = vpop.permute.xlu1 %1209 }
 0x19a   :  { %8228 = vst [vmem:[#allocation52_spill] sm:$0xff] %v5908_v3  ;;  %8229 = vst [vmem:[#allocation53_spill] sm:$0xff] %v5910_v59 }
 0x19d   :  { %v5912_v56 = vpop.permute.xlu0 %449  ;;  %v5916_v31 = vpop.permute.xlu1 %1338 }
 0x19e   :  { %8230 = vst [vmem:[#allocation54_spill] sm:$0xff] %v5916_v31  ;;  %v2134_v31 = vcombine.low %v2097_v39, %v2101_v2 }
 0x1a0   :  { %v2142_v3 = vrot.slane %v2134_v31, %v5173_v15 }
 0x1a1   :  { %v5914_v41 = vpop.permute.xlu0 %579  ;;  %v5920_v32 = vpop.permute.xlu1 %1577 }
 0x1a5   :  { %v5918_v58 = vpop.permute.xlu0 %707  ;;  %v5926_v1 = vpop.permute.xlu1 %1704 }
 0x1a6   :  { %8233 = vst [vmem:[#allocation57_spill] sm:$0xff] %v5926_v1 }
 0x1a9   :  { %v5922_v7 = vpop.permute.xlu0 %949  ;;  %v5930_v33 = vpop.permute.xlu1 %1831 }
 0x1aa   :  { %8231 = vst [vmem:[#allocation55_spill] sm:$0xff] %v5922_v7  ;;  %8235 = vst [vmem:[#allocation59_spill] sm:$0xff] %v5930_v33 }
 0x1ad   :  { %v5924_v5 = vpop.permute.xlu0 %1078  ;;  %v5936_v14 = vpop.permute.xlu1 %1945 }
 0x1ae   :  { %8232 = vst [vmem:[#allocation56_spill] sm:$0xff] %v5924_v5  ;;  %8238 = vst [vmem:[#allocation62_spill] sm:$0xff] %v5936_v14 }
 0x1b1   :  { %v5928_v19 = vpop.permute.xlu0 %1207  ;;  %v5940_v27 = vpop.permute.xlu1 %1949 }
 0x1b2   :  { %8234 = vst [vmem:[#allocation58_spill] sm:$0xff] %v5928_v19  ;;  %8240 = vst [vmem:[#allocation64_spill] sm:$0xff] %v5940_v27  ;;  %v163_v27 = vld [vmem:[#allocation8 + $0x46] ss:$8 sm:$0x3] }
 0x1b5   :  { %v5932_v51 = vpop.permute.xlu0 %1336  ;;  %v2052_v14 = vpop.permute.xlu1 %2051 }
 0x1b6   :  { %8236 = vst [vmem:[#allocation60_spill] sm:$0xff] %v5932_v51  ;;  %v2109_v51 = vrot.slane %v161_v44, %v5169_v13  ;;  %v2056_v5 = vrot.slane %v2052_v14, 6 }
 0x1b9   :  { %v5934_v9 = vpop.permute.xlu0 %1579 }
 0x1ba   :  { %8237 = vst [vmem:[#allocation61_spill] sm:$0xff] %v5934_v9  ;;  %v2135_v9 = vcombine.low %v2105_v53, %v2109_v51  ;;  %v2133_v53 = vrot.slane %v163_v27, %v5165_v11 }
 0x1bc   :  { %v2149_v0 = vrot.slane %v2135_v9, %v5173_v15 }
 0x1bd   :  { %v5938_v63 = vpop.permute.xlu0 %1706 }
 0x1be   :  { %8239 = vst [vmem:[#allocation63_spill] sm:$0xff] %v5938_v63  ;;  %v2113_v63 = vrot.slane %v161_v44, %v5175_v16  ;;  %v5964_v9 = vcombine.low %v2142_v3, %v2149_v0  ;;  %v165_v3 = vld [vmem:[#allocation8 + $0x7] ss:$8 sm:$0xf] }
 0x1c0   :  { %v2151_v51 = vcombine.low %v2113_v63, %v2117_v35  ;;  %8243 = vst [vmem:[#allocation67_spill] sm:$0xff] %v5964_v9 }
 0x1c1   :  { %v5942_v43 = vpop.permute.xlu0 %1833 }
 0x1c2   :  { %8241 = vst [vmem:[#allocation65_spill] sm:$0xff] %v5942_v43  ;;  %v2125_v43 = vrot.slane %v161_v44, %v5193_v38 }
 0x1c4   :  { %v2152_v33 = vcombine.low %v2121_v6, %v2125_v43 }
 0x1c5   :  { %v5948_v19 = vpop.permute.xlu0 %1947 }
 0x1c6   :  { %8242 = vst [vmem:[#allocation66_spill] sm:$0xff] %v5948_v19  ;;  %v2129_v19 = vrot.slane %v163_v27, %v5163_v10  ;;  %v2166_v43 = vrot.slane %v2152_v33, %v5173_v15 }
 0x1c9   :  { %v2050_v59 = vpop.permute.xlu0 %2049 }
 0x1ca   :  { %v2055_v54 = vrot.slane %v2050_v59, 6 }
 0x1cc   :  { %v2058_v39 = vsel %vm932_vm6, %v2055_v54, %v2050_v59  ;;  %v2059_v2 = vsel %vm90_vm0, %v2055_v54, %v2056_v5  ;;  %v2168_v59 = vcombine.low %v2129_v19, %v2133_v53  ;;  %v2159_v54 = vrot.slane %v2151_v51, %v5173_v15 }
 0x1cd   :  { %v2054_v7 = vpop.permute.xlu0 %2053  ;;  %v2066_v52 = vmul.f32 %v2058_v39, %v5372_v29  ;;  %v2060_v44 = vsel %vm932_vm6, %v2059_v2, %v2052_v14 }
 0x1ce   :  { %v2057_v1 = vrot.slane %v2054_v7, 6  ;;  %v2067_v31 = vmul.f32 %v2060_v44, %v5387_v47  ;;  %v5976_v0 = vrot.slane %v2168_v59, %v5173_v15 }
 0x1cf   :  { %2072 = vrot.lane.b32.xlu1 %v2066_v52, %s5040_s15  ;;  %v5978_v52 = vcombine.low %v2159_v54, %v2166_v43 }
 0x1d0   :  { %v2061_v27 = vsel %vm90_vm0, %v2056_v5, %v2057_v1  ;;  %2074 = vrot.lane.b32.xlu0 %v2067_v31, %s5040_s15  ;;  %8244 = vst [vmem:[#allocation68_spill] sm:$0xff] %v5976_v0 }
 0x1d1   :  { %v2062_v63 = vsel %vm932_vm6, %v2061_v27, %v2054_v7  ;;  %8245 = vst [vmem:[#allocation69_spill] sm:$0xff] %v5978_v52  ;;  %v166_v7 = vld [vmem:[#allocation8 + $0x7] ss:$8 sm:$0xf0]  ;;  %vm8170_vm6 = vcmask 392192  }
 0x1d2   :  { %v2068_v14 = vmul.f32 %v2062_v63, %v5796_v23  ;;  %v167_v5 = vor.u32 %v166_v7, %v165_v3  ;;  %v169_v7 = vld [vmem:[#allocation8 + $0x47] ss:$8 sm:$0x3] }
 0x1d4   :  { %2176 = vrot.lane.b32.xlu0 %v5964_v9, %s5036_s11  ;;  %2076 = vrot.lane.b32.xlu1 %v2068_v14, %s5040_s15  ;;  %v2224_v33 = vrot.slane %v167_v5, %v5163_v10  ;;  %v2228_v35 = vrot.slane %v167_v5, %v5165_v11  ;;  %v2232_v6 = vrot.slane %v167_v5, %v5167_v12 }
 0x1d5   :  { %v2236_v53 = vrot.slane %v167_v5, %v5169_v13  ;;  %v2240_v39 = vrot.slane %v167_v5, %v5175_v16  ;;  %v2244_v2 = vrot.slane %v167_v5, %v5177_v17  ;;  %v2248_v51 = vrot.slane %v167_v5, %v5179_v18 }
 0x1d6   :  { %v2252_v44 = vrot.slane %v167_v5, %v5193_v38  ;;  %v2261_v54 = vcombine.low %v2224_v33, %v2228_v35  ;;  %v2256_v35 = vrot.slane %v169_v7, %v5163_v10 }
 0x1d7   :  { %v2262_v43 = vcombine.low %v2232_v6, %v2236_v53  ;;  %v2278_v63 = vcombine.low %v2240_v39, %v2244_v2 }
 0x1d8   :  { %2180 = vrot.lane.b32.xlu0 %v5976_v0, %s5036_s11  ;;  %2178 = vrot.lane.b32.xlu1 %v5978_v52, %s5036_s11  ;;  %v2279_v3 = vcombine.low %v2248_v51, %v2252_v44  ;;  %v2269_v5 = vrot.slane %v2261_v54, %v5173_v15  ;;  %s5057_s11 = smov 16  }
 0x1d9   :  { %v2286_v33 = vrot.slane %v2278_v63, %v5173_v15 }
 0x1da   :  { %v2293_v39 = vrot.slane %v2279_v3, %v5173_v15 }
 0x241   :  { %v5984_v1 = vpop.permute.xlu1 %2072 }
 0x242   :  { %8246 = vst [vmem:[#allocation70_spill] sm:$0xff] %v5984_v1  ;;  %v5986_v19 = vpop.permute.xlu0 %2074 }
 0x243   :  { %8247 = vst [vmem:[#allocation71_spill] sm:$0xff] %v5986_v19 }
 0x246   :  { %v5996_v31 = vpop.permute.xlu1 %2076  ;;  %v2177_v27 = vpop.permute.xlu0 %2176 }
 0x247   :  { %8248 = vst [vmem:[#allocation72_spill] sm:$0xff] %v5996_v31  ;;  %v2182_v59 = vrot.slane %v2177_v27, 6  ;;  %v2276_v31 = vrot.slane %v2262_v43, %v5173_v15 }
 0x249   :  { %v2185_v14 = vsel %vm1061_vm7, %v2182_v59, %v2177_v27  ;;  %v6015_v27 = vcombine.low %v2269_v5, %v2276_v31 }
 0x24a   :  { %v2179_v0 = vpop.permute.xlu1 %2178  ;;  %v2181_v9 = vpop.permute.xlu0 %2180  ;;  %v2193_v52 = vmul.f32 %v2185_v14, %v5372_v29  ;;  %v2260_v29 = vrot.slane %v169_v7, %v5165_v11 }
 0x24b   :  { %v2183_v1 = vrot.slane %v2179_v0, 6  ;;  %v2184_v19 = vrot.slane %v2181_v9, 6  ;;  %8249 = vst [vmem:[#allocation73_spill] sm:$0xff] %v6015_v27 }
 0x24c   :  { %2199 = vrot.lane.b32.xlu1 %v2193_v52, %s5041_s16 }
 0x24d   :  { %v2186_v6 = vsel %vm90_vm0, %v2182_v59, %v2183_v1  ;;  %v2188_v53 = vsel %vm90_vm0, %v2183_v1, %v2184_v19  ;;  %v6017_v59 = vcombine.low %v2286_v33, %v2293_v39  ;;  %v2295_v1 = vcombine.low %v2256_v35, %v2260_v29  ;;  %v175_v35 = vld [vmem:[#allocation8 + $0x90] ss:$8 sm:$0x3] }
 0x24e   :  { %v2187_v2 = vsel %vm1061_vm7, %v2186_v6, %v2179_v0  ;;  %v2189_v52 = vsel %vm1061_vm7, %v2188_v53, %v2181_v9  ;;  %v172_v0 = vld [vmem:[#allocation8 + $0x50] ss:$8 sm:$0xf0]  ;;  %vm8168_vm7 = vcmask 375808  }
 0x24f   :  { %v2194_v51 = vmul.f32 %v2187_v2, %v5387_v47  ;;  %v2195_v44 = vmul.f32 %v2189_v52, %v5796_v23  ;;  %8250 = vst [vmem:[#allocation74_spill] sm:$0xff] %v6017_v59  ;;  %v6024_v9 = vrot.slane %v2295_v1, %v5173_v15  ;;  %v171_v47 = vld [vmem:[#allocation8 + $0x50] ss:$8 sm:$0xf] }
 0x250   :  { %v173_v19 = vor.u32 %v172_v0, %v171_v47  ;;  %v2383_v0 = vrot.slane %v175_v35, %v5163_v10 }
 0x251   :  { %2201 = vrot.lane.b32.xlu0 %v2194_v51, %s5041_s16  ;;  %2203 = vrot.lane.b32.xlu1 %v2195_v44, %s5041_s16  ;;  %8251 = vst [vmem:[#allocation75_spill] sm:$0xff] %v6024_v9 }
 0x252   :  { %v2351_v54 = vrot.slane %v173_v19, %v5163_v10  ;;  %v2355_v43 = vrot.slane %v173_v19, %v5165_v11  ;;  %v2359_v63 = vrot.slane %v173_v19, %v5167_v12  ;;  %v2363_v14 = vrot.slane %v173_v19, %v5169_v13 }
 0x253   :  { %v2367_v6 = vrot.slane %v173_v19, %v5175_v16  ;;  %v2371_v53 = vrot.slane %v173_v19, %v5177_v17  ;;  %v2375_v39 = vrot.slane %v173_v19, %v5179_v18  ;;  %v2379_v29 = vrot.slane %v173_v19, %v5193_v38  ;;  %v4885_v19 = vld [vmem:[#allocation2 + $0x2] sm:$0xff] }
 0x254   :  { %v2388_v5 = vcombine.low %v2351_v54, %v2355_v43  ;;  %v2389_v33 = vcombine.low %v2359_v63, %v2363_v14  ;;  %v2387_v54 = vrot.slane %v175_v35, %v5165_v11 }
 0x255   :  { %2303 = vrot.lane.b32.xlu0 %v6015_v27, %s5037_s12  ;;  %2305 = vrot.lane.b32.xlu1 %v6017_v59, %s5037_s12  ;;  %v2405_v14 = vcombine.low %v2367_v6, %v2371_v53 }
 0x256   :  { %v2396_v1 = vrot.slane %v2388_v5, %v5173_v15  ;;  %v2403_v47 = vrot.slane %v2389_v33, %v5173_v15 }
 0x257   :  { %v2413_v6 = vrot.slane %v2405_v14, %v5173_v15 }
 0x258   :  { %v6050_v33 = vcombine.low %v2396_v1, %v2403_v47 }
 0x259   :  { %2307 = vrot.lane.b32.xlu0 %v6024_v9, %s5037_s12  ;;  %v2406_v9 = vcombine.low %v2375_v39, %v2379_v29  ;;  %s5058_s12 = smov 15  }
 0x25a   :  { %8255 = vst [vmem:[#allocation79_spill] sm:$0xff] %v6050_v33 }
 0x25b   :  { %v2420_v53 = vrot.slane %v2406_v9, %v5173_v15 }
 0x2be   :  { %v6028_v31 = vpop.permute.xlu1 %2199 }
 0x2bf   :  { %8252 = vst [vmem:[#allocation76_spill] sm:$0xff] %v6028_v31 }
 0x2c3   :  { %v6034_v3 = vpop.permute.xlu1 %2203  ;;  %v6036_v7 = vpop.permute.xlu0 %2201 }
 0x2c4   :  { %8253 = vst [vmem:[#allocation77_spill] sm:$0xff] %v6034_v3  ;;  %8254 = vst [vmem:[#allocation78_spill] sm:$0xff] %v6036_v7  ;;  %v4886_v3 = vld [vmem:[#allocation2 + $0xa] sm:$0xff] }
 0x2c7   :  { %v2306_v2 = vpop.permute.xlu1 %2305  ;;  %v2304_v52 = vpop.permute.xlu0 %2303 }
 0x2c8   :  { %v2310_v51 = vrot.slane %v2306_v2, 6  ;;  %v2309_v44 = vrot.slane %v2304_v52, 6 }
 0x2ca   :  { %v2312_v43 = vsel %vm1190_vm8, %v2309_v44, %v2304_v52  ;;  %v2313_v63 = vsel %vm90_vm0, %v2309_v44, %v2310_v51  ;;  %v2422_v52 = vcombine.low %v2383_v0, %v2387_v54 }
 0x2cb   :  { %v2308_v59 = vpop.permute.xlu0 %2307  ;;  %v2320_v27 = vmul.f32 %v4885_v19, %v2312_v43  ;;  %v2314_v31 = vsel %vm1190_vm8, %v2313_v63, %v2306_v2 }
 0x2cc   :  { %v2311_v7 = vrot.slane %v2308_v59, 6  ;;  %v2321_v5 = vmul.f32 %v4886_v3, %v2314_v31  ;;  %v6064_v31 = vcombine.low %v2413_v6, %v2420_v53 }
 0x2cd   :  { %2326 = vrot.lane.b32.xlu1 %v2320_v27, %s5042_s17  ;;  %v6062_v27 = vrot.slane %v2422_v52, %v5173_v15 }
 0x2ce   :  { %v2315_v35 = vsel %vm90_vm0, %v2310_v51, %v2311_v7  ;;  %2328 = vrot.lane.b32.xlu0 %v2321_v5, %s5042_s17  ;;  %8257 = vst [vmem:[#allocation81_spill] sm:$0xff] %v6064_v31 }
 0x2cf   :  { %v2316_v39 = vsel %vm1190_vm8, %v2315_v35, %v2308_v59  ;;  %8256 = vst [vmem:[#allocation80_spill] sm:$0xff] %v6062_v27  ;;  %v1359_v59 = vld [vmem:[%s8031_s3] sm:$0xff]  ;;  %v100_v35 = vld [vmem:[#allocation11 + $0x18] sm:$0xff]  ;;  %vm2909_vm8 = vcmask 400384  }
 0x2d0   :  { %v2322_v29 = vmul.f32 %v2316_v39, %v5796_v23  ;;  %v2484_v2 = vrot.slane %v1359_v59, %v5163_v10  ;;  %v2488_v51 = vrot.slane %v1359_v59, %v5165_v11  ;;  %v2492_v44 = vrot.slane %v1359_v59, %v5167_v12  ;;  %110 = vst [vmem:[#allocation2 + $0x1a] sm:$0xff] %v100_v35 }
 0x2d1   :  { %v2496_v1 = vrot.slane %v1359_v59, %v5169_v13  ;;  %v2500_v47 = vrot.slane %v1359_v59, %v5175_v16  ;;  %v2504_v0 = vrot.slane %v1359_v59, %v5177_v17  ;;  %v2508_v54 = vrot.slane %v1359_v59, %v5179_v18  ;;  %v1360_v16 = vld [vmem:[%s8031_s3 + $0x8] sm:$0x3]  ;;  %s5044_s3 = smov 7  }
 0x2d2   :  { %2430 = vrot.lane.b32.xlu0 %v6050_v33, %s5038_s13  ;;  %2330 = vrot.lane.b32.xlu1 %v2322_v29, %s5042_s17  ;;  %v2512_v43 = vrot.slane %v1359_v59, %v5193_v38  ;;  %v2521_v52 = vcombine.low %v2484_v2, %v2488_v51 }
 0x2d3   :  { %v2522_v6 = vcombine.low %v2492_v44, %v2496_v1  ;;  %v2538_v53 = vcombine.low %v2500_v47, %v2504_v0  ;;  %v2516_v44 = vrot.slane %v1360_v16, %v5163_v10  ;;  %v101_v1 = vld [vmem:[#allocation11 + $0x20] sm:$0xff] }
 0x2d4   :  { %v2539_v13 = vcombine.low %v2508_v54, %v2512_v43  ;;  %v2529_v59 = vrot.slane %v2521_v52, %v5173_v15  ;;  %111 = vst [vmem:[#allocation2 + $0x22] sm:$0xff] %v101_v1 }
 0x2d5   :  { %v2536_v2 = vrot.slane %v2522_v6, %v5173_v15  ;;  %v2546_v51 = vrot.slane %v2538_v53, %v5173_v15 }
 0x2d6   :  { %2434 = vrot.lane.b32.xlu0 %v6062_v27, %s5038_s13  ;;  %2432 = vrot.lane.b32.xlu1 %v6064_v31, %s5038_s13  ;;  %v2553_v54 = vrot.slane %v2539_v13, %v5173_v15 }
 0x2d7   :  { %v6105_v10 = vcombine.low %v2529_v59, %v2536_v2 }
 0x2d9   :  { %8258 = vst [vmem:[#allocation82_spill] sm:$0xff] %v6105_v10 }
 0x33f   :  { %v6073_v9 = vpop.permute.xlu1 %2326 }
 0x340   :  { %v6075_v7 = vpop.permute.xlu0 %2328 }
 0x344   :  { %v6085_v63 = vpop.permute.xlu1 %2330  ;;  %v2431_v14 = vpop.permute.xlu0 %2430 }
 0x345   :  { %v2436_v5 = vrot.slane %v2431_v14, 6 }
 0x347   :  { %v2439_v12 = vsel %vm1319_vm9, %v2436_v5, %v2431_v14 }
 0x348   :  { %v2433_v17 = vpop.permute.xlu1 %2432  ;;  %v2435_v18 = vpop.permute.xlu0 %2434  ;;  %v2447_v39 = vmul.f32 %v4885_v19, %v2439_v12  ;;  %v2520_v19 = vrot.slane %v1360_v16, %v5165_v11 }
 0x349   :  { %v2437_v38 = vrot.slane %v2433_v17, 6  ;;  %v2438_v29 = vrot.slane %v2435_v18, 6 }
 0x34a   :  { %2453 = vrot.lane.b32.xlu1 %v2447_v39, %s5043_s18  ;;  %v2555_v6 = vcombine.low %v2516_v44, %v2520_v19  ;;  %v6142_v39 = vld [vmem:[#allocation2 + $0x14] sm:$0xff]  ;;  %v6148_v44 = vld [vmem:[#allocation2 + $0x1c] sm:$0xff] }
 0x34b   :  { %v2440_v47 = vsel %vm90_vm0, %v2436_v5, %v2437_v38  ;;  %v2442_v0 = vsel %vm90_vm0, %v2437_v38, %v2438_v29  ;;  %v6107_v5 = vcombine.low %v2546_v51, %v2553_v54  ;;  %8264 = vst [vmem:[#allocation88_spill] sm:$0xff] %v6142_v39 }
 0x34c   :  { %v2441_v43 = vsel %vm1319_vm9, %v2440_v47, %v2433_v17  ;;  %v2443_v14 = vsel %vm1319_vm9, %v2442_v0, %v2435_v18  ;;  %v6114_v11 = vrot.slane %v2555_v6, %v5173_v15  ;;  %v2334_v15 = vrot.slane %v6085_v63, 6 }
 0x34d   :  { %v2448_v35 = vmul.f32 %v4886_v3, %v2441_v43  ;;  %v2449_v52 = vmul.f32 %v2443_v14, %v5796_v23  ;;  %8259 = vst [vmem:[#allocation83_spill] sm:$0xff] %v6107_v5  ;;  %v6154_v43 = vld [vmem:[#allocation2 + $0x24] sm:$0xf] }
 0x34e   :  { %8260 = vst [vmem:[#allocation84_spill] sm:$0xff] %v6114_v11  ;;  %8265 = vst [vmem:[#allocation89_spill] sm:$0xff] %v6154_v43 }
 0x34f   :  { %2455 = vrot.lane.b32.xlu0 %v2448_v35, %s5043_s18  ;;  %2457 = vrot.lane.b32.xlu1 %v2449_v52, %s5043_s18 }
 0x353   :  { %2563 = vrot.lane.b32.xlu0 %v6105_v10, %s5030_s5  ;;  %2565 = vrot.lane.b32.xlu1 %v6107_v5, %s5030_s5  ;;  %v8298_v10 = vld [vmem:[#allocation58_spill] sm:$0xff] }
 0x357   :  { %2567 = vrot.lane.b32.xlu0 %v6114_v11, %s5030_s5  ;;  %2705 = vrot.lane.b32.xlu1 %v5445_v40, %s5044_s3  ;;  %v8293_v40 = vld [vmem:[#allocation61_spill] sm:$0xff] }
 0x358   :  { %v1583_v11 = vrot.slane %v8293_v40, 2 }
 0x35b   :  { %2707 = vrot.lane.b32.xlu1 %v5417_v21, %s5044_s3 }
 0x35f   :  { %2709 = vrot.lane.b32.xlu1 %v5448_v50, %s5044_s3 }
 0x363   :  { %2726 = vrot.lane.b32.xlu1 %v5432_v37, %s5045_s9 }
 0x367   :  { %2728 = vrot.lane.b32.xlu1 %v5477_v26, %s5045_s9 }
 0x36b   :  { %2730 = vrot.lane.b32.xlu1 %v5441_v45, %s5045_s9  ;;  %v8276_v45 = vld [vmem:[#allocation42_spill] sm:$0xff] }
 0x36c   :  { %v1456_v26 = vrot.slane %v8276_v45, 6 }
 0x3bc   :  { %v6130_v23 = vpop.permute.xlu1 %2453 }
 0x3c1   :  { %v6132_v3 = vpop.permute.xlu1 %2457  ;;  %v6169_v52 = vpop.permute.xlu0 %2455 }
 0x3c5   :  { %v6134_v53 = vpop.permute.xlu1 %2565 }
 0x3c9   :  { %v6136_v12 = vpop.permute.xlu1 %2705 }
 0x3ca   :  { %8261 = vst [vmem:[#allocation85_spill] sm:$0xff] %v6136_v12 }
 0x3cd   :  { %v6138_v13 = vpop.permute.xlu1 %2707 }
 0x3ce   :  { %8262 = vst [vmem:[#allocation86_spill] sm:$0xff] %v6138_v13 }
 0x3d1   :  { %v6140_v16 = vpop.permute.xlu1 %2709 }
 0x3d2   :  { %8263 = vst [vmem:[#allocation87_spill] sm:$0xff] %v6140_v16 }
 0x3d5   :  { %v2727_v17 = vpop.permute.xlu1 %2726 }
 0x3d6   :  { %v2732_v18 = vrot.slane %v2727_v17, 6 }
 0x3d8   :  { %v2736_v38 = vsel %vm2735_vm10, %v2732_v18, %v2727_v17  ;;  %v6173_v17 = vpop.permute.xlu0 %2563 }
 0x3d9   :  { %v2744_v29 = vmul.f32 %v2736_v38, %v6142_v39  ;;  %v2729_v59 = vpop.permute.xlu1 %2728  ;;  %8267 = vst [vmem:[#allocation91_spill] sm:$0xff] %v6173_v17 }
 0x3da   :  { %v2733_v2 = vrot.slane %v2729_v59, 6 }
 0x3db   :  { %2750 = vrot.lane.b32.xlu1 %v2744_v29, %s5033_s7 }
 0x3dc   :  { %v2737_v51 = vsel %vm90_vm0, %v2732_v18, %v2733_v2  ;;  %v6177_v29 = vpop.permute.xlu0 %2567 }
 0x3dd   :  { %v2738_v1 = vsel %vm2735_vm10, %v2737_v51, %v2729_v59  ;;  %v2731_v47 = vpop.permute.xlu1 %2730 }
 0x3de   :  { %v2745_v0 = vmul.f32 %v2738_v1, %v6148_v44  ;;  %v2734_v54 = vrot.slane %v2731_v47, 6 }
 0x3e0   :  { %v2739_v19 = vsel %vm90_vm0, %v2733_v2, %v2734_v54  ;;  %2752 = vrot.lane.b32.xlu1 %v2745_v0, %s5033_s7 }
 0x3e1   :  { %v2740_v14 = vsel %vm2735_vm10, %v2739_v19, %v2731_v47 }
 0x3e2   :  { %v2746_v35 = vmul.f32 %v2740_v14, %v6154_v43 }
 0x3e4   :  { %2770 = vrot.lane.b32.xlu1 %v5470_v22, %s5046_s21  ;;  %2754 = vrot.lane.b32.xlu0 %v2746_v35, %s5033_s7 }
 0x3e8   :  { %2772 = vrot.lane.b32.xlu1 %v5496_v46, %s5046_s21  ;;  %2814 = vrot.lane.b32.xlu0 %v5507_v57, %s5042_s17 }
 0x3ec   :  { %2774 = vrot.lane.b32.xlu1 %v5489_v36, %s5046_s21  ;;  %2818 = vrot.lane.b32.xlu0 %v5516_v61, %s5042_s17 }
 0x44d   :  { %v6171_v6 = vpop.permute.xlu1 %2750 }
 0x44e   :  { %8266 = vst [vmem:[#allocation90_spill] sm:$0xff] %v6171_v6 }
 0x452   :  { %v6175_v18 = vpop.permute.xlu1 %2752 }
 0x453   :  { %8268 = vst [vmem:[#allocation92_spill] sm:$0xff] %v6175_v18  ;;  %v8273_v18 = vld [vmem:[#allocation34_spill] sm:$0xff] }
 0x454   :  { %v324_v13 = vrot.slane %v8273_v18, 6 }
 0x456   :  { %v2771_v38 = vpop.permute.xlu1 %2770  ;;  %v6181_v47 = vpop.permute.xlu0 %2754 }
 0x457   :  { %v2776_v59 = vrot.slane %v2771_v38, 6  ;;  %8269 = vst [vmem:[#allocation93_spill] sm:$0xff] %v6181_v47  ;;  %v8272_v47 = vld [vmem:[#allocation36_spill] sm:$0xff] }
 0x458   :  { %v323_v6 = vrot.slane %v8272_v47, 6 }
 0x459   :  { %v2780_v2 = vsel %vm2779_vm11, %v2776_v59, %v2771_v38 }
 0x45a   :  { %v2788_v51 = vmul.f32 %v2780_v2, %v6142_v39  ;;  %v2773_v1 = vpop.permute.xlu1 %2772  ;;  %v6187_v57 = vpop.permute.xlu0 %2814 }
 0x45b   :  { %v2777_v0 = vrot.slane %v2773_v1, 6  ;;  %v8112_v61 = vrot.slane %v6187_v57, 6 }
 0x45c   :  { %2794 = vrot.lane.b32.xlu1 %v2788_v51, %s5039_s14 }
 0x45d   :  { %v2781_v54 = vsel %vm90_vm0, %v2776_v59, %v2777_v0  ;;  %v2823_v59 = vsel %vm8169_vm12, %v8112_v61, %v6187_v57 }
 0x45e   :  { %v2782_v19 = vsel %vm2779_vm11, %v2781_v54, %v2773_v1  ;;  %v2775_v14 = vpop.permute.xlu1 %2774  ;;  %v8270_v1 = vld [vmem:[#allocation32_spill] sm:$0xff]  ;;  %v8271_v54 = vld [vmem:[#allocation35_spill] sm:$0xff] }
 0x45f   :  { %v2789_v35 = vmul.f32 %v2782_v19, %v6148_v44  ;;  %v2778_v36 = vrot.slane %v2775_v14, 6  ;;  %v322_v19 = vrot.slane %v8271_v54, 6 }
 0x461   :  { %v2783_v38 = vsel %vm90_vm0, %v2777_v0, %v2778_v36  ;;  %2796 = vrot.lane.b32.xlu1 %v2789_v35, %s5039_s14  ;;  %v2831_v36 = vmul.f32 %v2823_v59, %v6142_v39  ;;  %v452_v0 = vrot.slane %v5890_v25, 2  ;;  %v8122_v35 = vrot.slane %v5894_v4, 2 }
 0x462   :  { %v2784_v2 = vsel %vm2779_vm11, %v2783_v38, %v2775_v14  ;;  %v451_v14 = vrot.slane %v5888_v20, 2  ;;  %v581_v38 = vrot.slane %v5892_v49, 2  ;;  %v326_v59 = vsel %vm8173_vm14, %v322_v19, %v8271_v54 }
 0x463   :  { %v2790_v51 = vmul.f32 %v2784_v2, %v6154_v43 }
 0x464   :  { %v455_v2 = vsel %vm8172_vm13, %v451_v14, %v452_v0  ;;  %v584_v61 = vsel %vm8172_vm13, %v581_v38, %v8122_v35 }
 0x465   :  { %2798 = vrot.lane.b32.xlu1 %v2790_v51, %s5039_s14  ;;  %v8124_v51 = vrot.slane %v5898_v8, 2  ;;  %v457_v46 = vsel %vm456_vm5, %v5888_v20, %v455_v2  ;;  %v586_v54 = vsel %vm8175_vm15, %v5892_v49, %v584_v61  ;;  %v327_v20 = vsel %vm90_vm0, %v322_v19, %v323_v6  ;;  %v8274_v2 = vld [vmem:[#allocation38_spill] sm:$0xff]  ;;  %v8278_v49 = vld [vmem:[#allocation39_spill] sm:$0xff] }
 0x466   :  { %v827_v37 = vrot.slane %v8278_v49, 6  ;;  %v8135_v19 = vrot.slane %v5880_v30, 6 }
 0x469   :  { %2816 = vrot.lane.b32.xlu1 %v8270_v1, %s5042_s17  ;;  %v4887_v1 = vld [vmem:[#allocation3] sm:$0xff] }
 0x46a   :  { %v334_v22 = vmul.f32 %v4887_v1, %v326_v59  ;;  %v329_v1 = vsel %vm90_vm0, %v323_v6, %v324_v13  ;;  %v825_v59 = vrot.slane %v8274_v2, 6  ;;  %v8279_v13 = vld [vmem:[#allocation40_spill] sm:$0xff] }
 0x46b   :  { %v1455_v6 = vrot.slane %v8279_v13, 6 }
 0x46c   :  { %v464_v12 = vadd.f32 %v457_v46, %v334_v22  ;;  %v328_v22 = vsel %vm8173_vm14, %v327_v20, %v8272_v47  ;;  %v8277_v46 = vld [vmem:[#allocation37_spill] sm:$0xff] }
 0x46d   :  { %2837 = vrot.lane.b32.xlu1 %v2831_v36, %s5031_s30  ;;  %v709_v36 = vrot.slane %v5896_v48, 2  ;;  %v826_v61 = vrot.slane %v8277_v46, 6 }
 0x46e   :  { %v593_v35 = vadd.f32 %v586_v54, %v464_v12  ;;  %v828_v12 = vsel %vm8173_vm14, %v825_v59, %v8274_v2  ;;  %v453_v2 = vrot.slane %v5912_v56, 2 }
 0x46f   :  { %v712_v14 = vsel %vm8172_vm13, %v709_v36, %v8124_v51  ;;  %v8275_v36 = vld [vmem:[#allocation41_spill] sm:$0xff]  ;;  %v829_v50 = vsel %vm90_vm0, %v825_v59, %v826_v61 }
 0x470   :  { %v713_v38 = vsel %vm8174_vm3, %v5896_v48, %v712_v14  ;;  %v1454_v51 = vrot.slane %v8275_v36, 6  ;;  %v330_v48 = vsel %vm8173_vm14, %v329_v1, %v8273_v18  ;;  %v4888_v14 = vld [vmem:[#allocation3 + $0x8] sm:$0xff]  ;;  %v831_v18 = vsel %vm90_vm0, %v826_v61, %v827_v37  ;;  %v4889_v61 = vld [vmem:[#allocation2] sm:$0xff] }
 0x471   :  { %v720_v16 = vadd.f32 %v713_v38, %v593_v35  ;;  %v335_v54 = vmul.f32 %v4888_v14, %v328_v22  ;;  %v1460_v38 = vsel %vm90_vm0, %v1455_v6, %v1456_v26  ;;  %v336_v20 = vmul.f32 %v330_v48, %v5717_v34 }
 0x472   :  { %v1458_v47 = vsel %vm90_vm0, %v1454_v51, %v1455_v6  ;;  %v1457_v1 = vsel %vm8173_vm14, %v1454_v51, %v8275_v36  ;;  %v8134_v22 = vrot.slane %v5882_v55, 6  ;;  %v8133_v26 = vrot.slane %v5884_v60, 6 }
 0x473   :  { %v836_v35 = vadd.f32 %v828_v12, %v720_v16  ;;  %v957_v16 = vsel %vm8171_vm1, %v8135_v19, %v5880_v30  ;;  %v1459_v34 = vsel %vm8173_vm14, %v1458_v47, %v8279_v13  ;;  %v1461_v37 = vsel %vm8173_vm14, %v1460_v38, %v8276_v45 }
 0x474   :  { %v583_v51 = vrot.slane %v5914_v41, 2  ;;  %v832_v36 = vsel %vm8173_vm14, %v831_v18, %v8278_v49  ;;  %v1465_v48 = vmul.f32 %v4889_v61, %v1457_v1  ;;  %v830_v12 = vsel %vm8173_vm14, %v829_v50, %v8277_v46 }
 0x475   :  { %v965_v59 = vadd.f32 %v957_v16, %v836_v35  ;;  %v458_v6 = vsel %vm8172_vm13, %v452_v0, %v453_v2  ;;  %v460_v13 = vsel %vm456_vm5, %v5912_v56, %v453_v2  ;;  %v8136_v45 = vrot.slane %v5920_v32, 2  ;;  %v8281_v2 = vld [vmem:[#allocation57_spill] sm:$0xff] }
 0x476   :  { %v711_v35 = vrot.slane %v5918_v58, 2  ;;  %v6273_v14 = vmul.f32 %v1461_v37, %v5838_v42  ;;  %v6276_v49 = vmul.f32 %v1459_v34, %v5734_v24  ;;  %v1086_v50 = vsel %vm8170_vm6, %v8134_v22, %v5882_v55  ;;  %v8282_v34 = vld [vmem:[#allocation50_spill] sm:$0xff] }
 0x477   :  { %v1215_v56 = vsel %vm8169_vm12, %v8133_v26, %v5884_v60  ;;  %v1581_v0 = vrot.slane %v5900_v62, 2  ;;  %v8280_v46 = vrot.slane %v5894_v4, 2  ;;  %v589_v24 = vsel %vm8175_vm15, %v5914_v41, %v583_v51  ;;  %v8286_v26 = vld [vmem:[#allocation49_spill] sm:$0xff] }
 0x478   :  { %v1094_v47 = vadd.f32 %v1086_v50, %v965_v59  ;;  %v459_v18 = vsel %vm456_vm5, %v5890_v25, %v458_v6  ;;  %v466_v1 = vadd.f32 %v460_v13, %v336_v20  ;;  %v1708_v37 = vrot.slane %v8282_v34, 2  ;;  %v8284_v20 = vld [vmem:[#allocation55_spill] sm:$0xff] }
 0x479   :  { %v587_v42 = vsel %vm8172_vm13, %v8280_v46, %v583_v51  ;;  %v1584_v61 = vsel %vm8172_vm13, %v1581_v0, %v8136_v45  ;;  %v8283_v46 = vrot.slane %v5898_v8, 2  ;;  %v716_v59 = vsel %vm8174_vm3, %v5918_v58, %v711_v35  ;;  %v8285_v13 = vld [vmem:[#allocation59_spill] sm:$0xff]  ;;  %v8287_v45 = vld [vmem:[#allocation52_spill] sm:$0xff] }
 0x47a   :  { %v588_v51 = vsel %vm8175_vm15, %v5894_v4, %v587_v42  ;;  %v595_v25 = vadd.f32 %v589_v24, %v466_v1  ;;  %v954_v6 = vrot.slane %v8284_v20, 6  ;;  %v8145_v50 = vrot.slane %v8285_v13, 2  ;;  %v8290_v24 = vld [vmem:[#allocation51_spill] sm:$0xff] }
 0x47b   :  { %v714_v41 = vsel %vm8172_vm13, %v8283_v46, %v711_v35  ;;  %v955_v22 = vrot.slane %v8286_v26, 6  ;;  %v465_v19 = vadd.f32 %v459_v18, %v335_v54  ;;  %v1223_v38 = vadd.f32 %v1215_v56, %v1094_v47  ;;  %v8291_v18 = vld [vmem:[#allocation53_spill] sm:$0xff] }
 0x47c   :  { %v6311_v0 = vstv %s6261_s23  ;;  %v1835_v16 = vrot.slane %v8287_v45, 2  ;;  %v722_v46 = vadd.f32 %v716_v59, %v595_v25  ;;  %v8288_v21 = vrot.slane %v8281_v2, 2 }
 0x47d   :  { %v715_v4 = vsel %vm8174_vm3, %v5898_v8, %v714_v41  ;;  %v8289_v35 = vrot.slane %v5886_v28, 6  ;;  %v1084_v54 = vrot.slane %v8290_v24, 6  ;;  %v1585_v56 = vsel %vm456_vm5, %v5900_v62, %v1584_v61  ;;  %v8292_v8 = vld [vmem:[#allocation56_spill] sm:$0xff]  ;;  %v8294_v62 = vld [vmem:[#allocation54_spill] sm:$0xff] }
 0x47e   :  { %v1711_v58 = vsel %vm8172_vm13, %v1708_v37, %v8288_v21  ;;  %v594_v47 = vadd.f32 %v588_v51, %v465_v19  ;;  %v1213_v1 = vrot.slane %v8291_v18, 6  ;;  %v960_v59 = vsel %vm90_vm0, %v954_v6, %v955_v22 }
 0x47f   :  { %v1344_v42 = vsel %vm8168_vm7, %v8289_v35, %v5886_v28  ;;  %v1838_v21 = vsel %vm8172_vm13, %v1835_v16, %v8145_v50  ;;  %v1083_v37 = vrot.slane %v8292_v8, 6  ;;  %v1712_v25 = vsel %vm8175_vm15, %v8282_v34, %v1711_v58 }
 0x480   :  { %v721_v41 = vadd.f32 %v715_v4, %v594_v47  ;;  %v6334_v35 = vadd.f32 %v1344_v42, %v1223_v38  ;;  %v1342_v19 = vrot.slane %v8294_v62, 6  ;;  %v838_v61 = vadd.f32 %v832_v36, %v722_v46  ;;  %v8296_v47 = vld [vmem:[#allocation62_spill] sm:$0xff]  ;;  %v8297_v38 = vld [vmem:[#allocation63_spill] sm:$0xff]  ;;  %v8299_v46 = vld [vmem:[#allocation65_spill] sm:$0xff] }
 0x481   :  { %v8295_v51 = vrot.slane %v5880_v30, 6  ;;  %v1592_v5 = vadd.f32 %v1585_v56, %v1465_v48  ;;  %v961_v16 = vsel %vm8171_vm1, %v960_v59, %v8286_v26  ;;  %v1839_v4 = vsel %vm8174_vm3, %v8287_v45, %v1838_v21  ;;  %v8300_v26 = vld [vmem:[#allocation64_spill] sm:$0xff]  ;;  %v8301_v56 = vld [vmem:[#allocation66_spill] sm:$0xff] }
 0x482   :  { %v1951_v34 = vrot.slane %v8296_v47, 6  ;;  %v1710_v58 = vrot.slane %v8297_v38, 2  ;;  %v1089_v42 = vsel %vm90_vm0, %v1083_v37, %v1084_v54  ;;  %v1212_v36 = vrot.slane %v8298_v10, 6 }
 0x483   :  { %v958_v22 = vsel %vm90_vm0, %v8295_v51, %v954_v6  ;;  %v1719_v50 = vadd.f32 %v1712_v25, %v1592_v5  ;;  %v1837_v30 = vrot.slane %v8299_v46, 2  ;;  %v6350_v31 = vadd.f32 %v830_v12, %v721_v41  ;;  %v8303_v51 = vld [vmem:[#allocation72_spill] sm:$0xff] }
 0x484   :  { %v1588_v48 = vsel %vm456_vm5, %v8293_v40, %v1583_v11  ;;  %v1953_v6 = vrot.slane %v8300_v26, 6  ;;  %v1952_v45 = vrot.slane %v8301_v56, 6  ;;  %v6358_v59 = vsel %vm8171_vm1, %v958_v22, %v8284_v20  ;;  %v8304_v22 = vld [vmem:[#allocation60_spill] sm:$0xff] }
 0x485   :  { %v967_v21 = vadd.f32 %v961_v16, %v838_v61  ;;  %v8302_v5 = vrot.slane %v5882_v55, 6  ;;  %v1846_v25 = vadd.f32 %v1839_v4, %v1719_v50  ;;  %v1090_v12 = vsel %vm8170_vm6, %v1089_v42, %v8290_v24  ;;  %v8305_v24 = vld [vmem:[#allocation71_spill] sm:$0xff]  ;;  %v8306_v4 = vld [vmem:[#allocation77_spill] sm:$0xff]  ;;  %v8307_v42 = vld [vmem:[#allocation78_spill] sm:$0xff] }
 0x486   :  { %v1954_v40 = vsel %vm8173_vm14, %v1951_v34, %v8296_v47  ;;  %v1715_v41 = vsel %vm8175_vm15, %v8297_v38, %v1710_v58  ;;  %v2080_v27 = vrot.slane %v8303_v51, 6  ;;  %v1218_v20 = vsel %vm90_vm0, %v1212_v36, %v1213_v1 }
 0x487   :  { %v1087_v54 = vsel %vm90_vm0, %v8302_v5, %v1083_v37  ;;  %v1341_v61 = vrot.slane %v8304_v22, 6  ;;  %v1594_v55 = vadd.f32 %v1588_v48, %v6273_v14  ;;  %v1842_v50 = vsel %vm8174_vm3, %v8299_v46, %v1837_v30 }
 0x488   :  { %v1957_v37 = vsel %vm90_vm0, %v1952_v45, %v1953_v6  ;;  %v2079_v16 = vrot.slane %v8305_v24, 6  ;;  %v2207_v47 = vrot.slane %v8306_v4, 6  ;;  %v2206_v5 = vrot.slane %v8307_v42, 6 }
 0x489   :  { %v1088_v38 = vsel %vm8170_vm6, %v1087_v54, %v8292_v8  ;;  %v1096_v33 = vadd.f32 %v1090_v12, %v967_v21  ;;  %v1962_v1 = vadd.f32 %v1954_v40, %v1846_v25  ;;  %v1721_v39 = vadd.f32 %v1715_v41, %v1594_v55 }
 0x48a   :  { %v1219_v14 = vsel %vm8169_vm12, %v1218_v20, %v8291_v18  ;;  %v8308_v48 = vrot.slane %v5920_v32, 2  ;;  %v2084_v6 = vsel %vm90_vm0, %v2079_v16, %v2080_v27  ;;  %v1347_v17 = vsel %vm90_vm0, %v1341_v61, %v1342_v19 }
 0x48b   :  { %v8309_v43 = vrot.slane %v8281_v2, 2  ;;  %v1848_v21 = vadd.f32 %v1842_v50, %v1721_v39  ;;  %v1958_v54 = vsel %vm8173_vm14, %v1957_v37, %v8300_v26  ;;  %v2211_v18 = vsel %vm90_vm0, %v2206_v5, %v2207_v47 }
 0x48c   :  { %v1586_v46 = vsel %vm8172_vm13, %v8308_v48, %v1583_v11  ;;  %v2333_v25 = vrot.slane %v6075_v7, 6  ;;  %v2461_v11 = vrot.slane %v6132_v3, 6  ;;  %v2460_v27 = vrot.slane %v6169_v52, 6 }
 0x48d   :  { %v1713_v8 = vsel %vm8172_vm13, %v8309_v43, %v1710_v58  ;;  %v8310_v12 = vrot.slane %v5884_v60, 6  ;;  %v1587_v40 = vsel %vm456_vm5, %v5920_v32, %v1586_v46  ;;  %v8311_v43 = vld [vmem:[#allocation70_spill] sm:$0xff]  ;;  %v2085_v58 = vsel %vm8171_vm1, %v2084_v6, %v8303_v51  ;;  %v8313_v32 = vld [vmem:[#allocation76_spill] sm:$0xff] }
 0x48e   :  { %v2078_v39 = vrot.slane %v8311_v43, 6  ;;  %v1225_v26 = vadd.f32 %v1219_v14, %v1096_v33  ;;  %v8312_v41 = vrot.slane %v8285_v13, 2  ;;  %v1964_v55 = vadd.f32 %v1958_v54, %v1848_v21 }
 0x48f   :  { %v1216_v19 = vsel %vm90_vm0, %v8310_v12, %v1212_v36  ;;  %v2338_v50 = vsel %vm90_vm0, %v2333_v25, %v2334_v15  ;;  %v1348_v60 = vsel %vm8168_vm7, %v1347_v17, %v8294_v62  ;;  %v1714_v36 = vsel %vm8175_vm15, %v8281_v2, %v1713_v8 }
 0x490   :  { %v1840_v20 = vsel %vm8172_vm13, %v8312_v41, %v1837_v30  ;;  %v2205_v37 = vrot.slane %v8313_v32, 6  ;;  %v2212_v47 = vsel %vm8170_vm6, %v2211_v18, %v8306_v4  ;;  %v1593_v33 = vadd.f32 %v1587_v40, %v6276_v49 }
 0x491   :  { %v1955_v51 = vsel %vm90_vm0, %v1951_v34, %v1952_v45  ;;  %v2091_v14 = vadd.f32 %v2085_v58, %v1964_v55  ;;  %v2465_v30 = vsel %vm90_vm0, %v2460_v27, %v2461_v11  ;;  %v1841_v15 = vsel %vm8174_vm3, %v8285_v13, %v1840_v20 }
 0x492   :  { %v2081_v17 = vsel %vm8171_vm1, %v2078_v39, %v8311_v43  ;;  %v2332_v2 = vrot.slane %v6073_v9, 6  ;;  %v2339_v62 = vsel %vm8169_vm12, %v2338_v50, %v6085_v63  ;;  %v1354_v48 = vadd.f32 %v1348_v60, %v1225_v26  ;;  %v2819_v60 = vpop.permute.xlu0 %2818 }
 0x493   :  { %v1720_v4 = vadd.f32 %v1714_v36, %v1593_v33  ;;  %v2082_v49 = vsel %vm90_vm0, %v2078_v39, %v2079_v16  ;;  %v2218_v46 = vadd.f32 %v2212_v47, %v2091_v14  ;;  %v1956_v34 = vsel %vm8173_vm14, %v1955_v51, %v8301_v56 }
 0x494   :  { %v2208_v45 = vsel %vm8170_vm6, %v2205_v37, %v8313_v32  ;;  %v2459_v13 = vrot.slane %v6130_v23, 6  ;;  %v2466_v6 = vsel %vm8168_vm7, %v2465_v30, %v6132_v3  ;;  %v2089_v21 = vadd.f32 %v2081_v17, %v1962_v1 }
 0x495   :  { %v1847_v8 = vadd.f32 %v1841_v15, %v1720_v4  ;;  %v2209_v63 = vsel %vm90_vm0, %v2205_v37, %v2206_v5  ;;  %v2345_v54 = vadd.f32 %v2339_v62, %v2218_v46  ;;  %v966_v16 = vadd.f32 %v6358_v59, %v6350_v31  ;;  %v8319_v62 = vld [vmem:[#allocation89_spill] sm:$0xff] }
 0x496   :  { %v8314_v18 = vrot.slane %v5886_v28, 6  ;;  %v2083_v11 = vsel %vm8171_vm1, %v2082_v49, %v8305_v24  ;;  %v2335_v12 = vsel %vm8169_vm12, %v2332_v2, %v6073_v9  ;;  %v2216_v1 = vadd.f32 %v2208_v45, %v2089_v21 }
 0x497   :  { %v1963_v3 = vadd.f32 %v1956_v34, %v1847_v8  ;;  %v2336_v5 = vsel %vm90_vm0, %v2332_v2, %v2333_v25  ;;  %v2472_v43 = vadd.f32 %v2466_v6, %v2345_v54  ;;  %v1095_v39 = vadd.f32 %v1088_v38, %v966_v16  ;;  %v8321_v6 = vld [vmem:[#allocation43_spill] sm:$0xff]  ;;  %v8322_v8 = vld [vmem:[#allocation46_spill] sm:$0xff]  ;;  %v8323_v54 = vld [vmem:[#allocation20_spill] sm:$0xff] }
 0x498   :  { %v1345_v56 = vsel %vm90_vm0, %v8314_v18, %v1341_v61  ;;  %v1217_v31 = vsel %vm8169_vm12, %v1216_v19, %v8298_v10  ;;  %v2210_v28 = vsel %vm8170_vm6, %v2209_v63, %v8307_v42  ;;  %v2462_v59 = vsel %vm8168_vm7, %v2459_v13, %v6130_v23 }
 0x499   :  { %v6455_v61 = vadd.f32 %v6311_v0, %v1354_v48  ;;  %v2090_v9 = vadd.f32 %v2083_v11, %v1963_v3  ;;  %v2343_v24 = vadd.f32 %v2335_v12, %v2216_v1  ;;  %v2463_v58 = vsel %vm90_vm0, %v2459_v13, %v2460_v27 }
 0x49a   :  { %v1346_v25 = vsel %vm8168_vm7, %v1345_v56, %v8304_v22  ;;  %v2337_v38 = vsel %vm8169_vm12, %v2336_v5, %v6075_v7  ;;  %v1224_v10 = vadd.f32 %v1217_v31, %v1095_v39  ;;  %v2464_v23 = vsel %vm8168_vm7, %v2463_v58, %v6169_v52  ;;  %v8324_v56 = vld [vmem:[#allocation44_spill] sm:$0xff] }
 0x49b   :  { %8315 = vst [vmem:[#allocation35_spill] sm:$0xff] %v6455_v61  ;;  %v2217_v19 = vadd.f32 %v2210_v28, %v2090_v9  ;;  %v2470_v26 = vadd.f32 %v2462_v59, %v2343_v24  ;;  %v2475_v42 = vadd.f32 %v2472_v43, %v6455_v61  ;;  %v6469_v27 = vadd.f32 %v6311_v0, %v6334_v35 }
 0x49c   :  { %v1353_v20 = vadd.f32 %v1346_v25, %v1224_v10  ;;  %v2822_v32 = vrot.slane %v2819_v60, 6  ;;  %v2571_v47 = vrot.slane %v6177_v29, 6  ;;  %v2570_v33 = vrot.slane %v6134_v53, 6 }
 0x49d   :  { %8316 = vst [vmem:[#allocation36_spill] sm:$0xff] %v6469_v27  ;;  %v2344_v55 = vadd.f32 %v2337_v38, %v2217_v19  ;;  %v2473_v22 = vadd.f32 %v2470_v26, %v6469_v27  ;;  %4850 = vtanh.f32 %v2475_v42  ;;  %v8318_v51 = vrot.slane %v6187_v57, 6  ;;  %v8320_v57 = vld [vmem:[#allocation91_spill] sm:$0xff] }
 0x49e   :  { %v6475_v36 = vadd.f32 %v6311_v0, %v1353_v20  ;;  %v2575_v17 = vsel %vm90_vm0, %v2570_v33, %v2571_v47  ;;  %v2569_v49 = vrot.slane %v8320_v57, 6  ;;  %v8325_v20 = vld [vmem:[#allocation88_spill] sm:$0xff] }
 0x49f   :  { %v2471_v50 = vadd.f32 %v2464_v23, %v2344_v55  ;;  %4852 = vtanh.f32 %v2473_v22  ;;  %v2576_v46 = vsel %vm8173_vm14, %v2575_v17, %v6177_v29 }
 0x4a0   :  { %8317 = vst [vmem:[#allocation34_spill] sm:$0xff] %v6475_v36  ;;  %v2572_v13 = vsel %vm8173_vm14, %v2569_v49, %v8320_v57  ;;  %v2573_v21 = vsel %vm90_vm0, %v2569_v49, %v2570_v33  ;;  %v8327_v33 = vld [vmem:[#allocation48_spill] sm:$0xff] }
 0x4a1   :  { %v2474_v52 = vadd.f32 %v2471_v50, %v6475_v36  ;;  %v2574_v29 = vsel %vm8173_vm14, %v2573_v21, %v6134_v53 }
 0x4a3   :  { %4854 = vtanh.f32 %v2474_v52 }
 0x4a7   :  { %v4851_v4 = vpop.eup %4850 }
 0x4a8   :  { %v2582_v34 = vmul.f32 %v4851_v4, %v2576_v46 }
 0x4a9   :  { %v4853_v45 = vpop.eup %4852 }
 0x4aa   :  { %v2580_v63 = vmul.f32 %v4853_v45, %v2572_v13  ;;  %v2627_v16 = vrot.slane %v2582_v34, %v8323_v54  ;;  %v2620_v1 = vcombine.high %v2582_v34, %v2582_v34 }
 0x4ac   :  { %v2593_v11 = vrot.slane %v2580_v63, %v8323_v54  ;;  %v2635_v12 = vcombine.high %v2627_v16, %v2627_v16  ;;  %v2586_v39 = vcombine.high %v2580_v63, %v2580_v63  ;;  %v2634_v31 = vrot.slane %v2620_v1, %v8323_v54 }
 0x4ad   :  { %v4855_v18 = vpop.eup %4854 }
 0x4ae   :  { %v2581_v3 = vmul.f32 %v4855_v18, %v2574_v29  ;;  %v2601_v43 = vcombine.high %v2593_v11, %v2593_v11  ;;  %v6517_v28 = vrot.slane %v2586_v39, %v8323_v54 }
 0x4b0   :  { %v2610_v5 = vrot.slane %v2581_v3, %v8323_v54  ;;  %v2603_v59 = vcombine.high %v2581_v3, %v2581_v3 }
 0x4b2   :  { %v2618_v53 = vcombine.high %v2610_v5, %v2610_v5  ;;  %v6522_v9 = vrot.slane %v2603_v59, %v8323_v54  ;;  %v8333_v59 = vld [vmem:[#allocation68_spill] sm:$0xff] }
 0x4ce   :  { %v6445_v40 = vpop.permute.xlu1 %2794 }
 0x4d3   :  { %v6463_v41 = vpop.permute.xlu1 %2796 }
 0x4d7   :  { %v6472_v7 = vpop.permute.xlu1 %2798 }
 0x4db   :  { %v2817_v37 = vpop.permute.xlu1 %2816 }
 0x4dc   :  { %v2821_v35 = vrot.slane %v2817_v37, 6 }
 0x4de   :  { %v2824_v14 = vsel %vm90_vm0, %v8318_v51, %v2821_v35  ;;  %v2826_v30 = vsel %vm90_vm0, %v2821_v35, %v2822_v32  ;;  %v8326_v35 = vld [vmem:[#allocation47_spill] sm:$0xff]  ;;  %v8328_v51 = vld [vmem:[#allocation45_spill] sm:$0xff] }
 0x4df   :  { %v2825_v0 = vsel %vm8169_vm12, %v2824_v14, %v2817_v37  ;;  %v2827_v15 = vsel %vm8169_vm12, %v2826_v30, %v2819_v60  ;;  %v6526_v24 = vpop.permute.xlu1 %2837 }
 0x4e0   :  { %v2832_v2 = vmul.f32 %v2825_v0, %v6148_v44  ;;  %v2833_v48 = vmul.f32 %v2827_v15, %v8319_v62 }
 0x4e2   :  { %2839 = vrot.lane.b32.xlu0 %v2832_v2, %s5031_s30  ;;  %2841 = vrot.lane.b32.xlu1 %v2833_v48, %s5031_s30 }
 0x4e6   :  { %2857 = vrot.lane.b32.xlu0 %v8321_v6, %s5041_s16  ;;  %2859 = vrot.lane.b32.xlu1 %v8322_v8, %s5041_s16 }
 0x4ea   :  { %2861 = vrot.lane.b32.xlu0 %v8324_v56, %s5041_s16  ;;  %2652 = vrot.lane.b32.xlu1 %v2627_v16, %s5038_s13 }
 0x4ee   :  { %2654 = vrot.lane.b32.xlu0 %v2635_v12, %s5038_s13  ;;  %2636 = vrot.lane.b32.xlu1 %v2593_v11, %s5038_s13 }
 0x4f2   :  { %2644 = vrot.lane.b32.xlu1 %v2610_v5, %s5038_s13  ;;  %2638 = vrot.lane.b32.xlu0 %v2601_v43, %s5038_s13 }
 0x4f6   :  { %2656 = vrot.lane.b32.xlu1 %v2634_v31, %s5038_s13  ;;  %2646 = vrot.lane.b32.xlu0 %v2618_v53, %s5038_s13  ;;  %v8331_v31 = vld [vmem:[#allocation69_spill] sm:$0xff]  ;;  %v8332_v53 = vld [vmem:[#allocation67_spill] sm:$0xff] }
 0x4fa   :  { %2640 = vrot.lane.b32.xlu1 %v6517_v28, %s5038_s13 }
 0x4fe   :  { %2648 = vrot.lane.b32.xlu1 %v6522_v9, %s5038_s13 }
 0x554   :  { %v6528_v58 = vpop.permute.xlu1 %2841  ;;  %v6530_v25 = vpop.permute.xlu0 %2839 }
 0x558   :  { %v2860_v38 = vpop.permute.xlu1 %2859  ;;  %v2858_v10 = vpop.permute.xlu0 %2857 }
 0x559   :  { %v2864_v19 = vrot.slane %v2860_v38, 6  ;;  %v2863_v26 = vrot.slane %v2858_v10, 6 }
 0x55b   :  { %v2866_v42 = vsel %vm8170_vm6, %v2863_v26, %v2858_v10  ;;  %v2867_v23 = vsel %vm90_vm0, %v2863_v26, %v2864_v19 }
 0x55c   :  { %v2874_v55 = vmul.f32 %v2866_v42, %v8325_v20  ;;  %v2862_v22 = vpop.permute.xlu0 %2861  ;;  %v2868_v50 = vsel %vm8170_vm6, %v2867_v23, %v2860_v38  ;;  %v6546_v14 = vpop.permute.xlu1 %2652 }
 0x55d   :  { %v2865_v60 = vrot.slane %v2862_v22, 6  ;;  %v2875_v32 = vmul.f32 %v2868_v50, %v6148_v44 }
 0x55e   :  { %2880 = vrot.lane.b32.xlu1 %v2874_v55, %s5030_s5 }
 0x55f   :  { %v2869_v52 = vsel %vm90_vm0, %v2864_v19, %v2865_v60  ;;  %2882 = vrot.lane.b32.xlu0 %v2875_v32, %s5030_s5 }
 0x560   :  { %v2870_v37 = vsel %vm8170_vm6, %v2869_v52, %v2862_v22  ;;  %v6548_v30 = vpop.permute.xlu1 %2636  ;;  %v6554_v17 = vpop.permute.xlu0 %2654 }
 0x561   :  { %v2876_v47 = vmul.f32 %v2870_v37, %v8319_v62  ;;  %8330 = vst [vmem:[#allocation41_spill] sm:$0xff] %v6554_v17 }
 0x563   :  { %2900 = vrot.lane.b32.xlu0 %v8326_v35, %s5047_s2  ;;  %2884 = vrot.lane.b32.xlu1 %v2876_v47, %s5030_s5 }
 0x564   :  { %v6550_v0 = vpop.permute.xlu1 %2644  ;;  %v6558_v48 = vpop.permute.xlu0 %2638 }
 0x567   :  { %2904 = vrot.lane.b32.xlu0 %v8327_v33, %s5047_s2  ;;  %2902 = vrot.lane.b32.xlu1 %v8328_v51, %s5047_s2  ;;  %v2844_v33 = vrot.slane %v6530_v25, 2 }
 0x568   :  { %v6552_v15 = vpop.permute.xlu1 %2656  ;;  %v6562_v57 = vpop.permute.xlu0 %2646 }
 0x569   :  { %8329 = vst [vmem:[#allocation38_spill] sm:$0xff] %v6552_v15 }
 0x56c   :  { %v6556_v2 = vpop.permute.xlu1 %2640 }
 0x570   :  { %v6560_v4 = vpop.permute.xlu1 %2648 }
 0x5d0   :  { %v6564_v49 = vpop.permute.xlu1 %2880 }
 0x5d1   :  { %v6566_v46 = vpop.permute.xlu0 %2882 }
 0x5d5   :  { %v2901_v34 = vpop.permute.xlu0 %2900  ;;  %v6568_v45 = vpop.permute.xlu1 %2884 }
 0x5d6   :  { %v2906_v13 = vrot.slane %v2901_v34, 6  ;;  %v2888_v56 = vrot.slane %v6568_v45, 2 }
 0x5d8   :  { %v2910_v21 = vsel %vm2909_vm8, %v2906_v13, %v2901_v34  ;;  %v2944_v34 = vld [vmem:[#allocation2 + $0x24] sm:$0x3f] }
 0x5d9   :  { %v2918_v63 = vmul.f32 %v2910_v21, %v8325_v20  ;;  %v2905_v16 = vpop.permute.xlu0 %2904  ;;  %v2903_v18 = vpop.permute.xlu1 %2902 }
 0x5da   :  { %v2908_v29 = vrot.slane %v2905_v16, 6  ;;  %v2907_v11 = vrot.slane %v2903_v18, 6 }
 0x5db   :  { %2924 = vrot.lane.b32.xlu1 %v2918_v63, %s5040_s15 }
 0x5dc   :  { %v2911_v12 = vsel %vm90_vm0, %v2906_v13, %v2907_v11  ;;  %v2913_v3 = vsel %vm90_vm0, %v2907_v11, %v2908_v29  ;;  %v8335_v29 = vld [vmem:[#allocation74_spill] sm:$0xff]  ;;  %v2619_v11 = vcombine.high %v6522_v9, %v6522_v9 }
 0x5dd   :  { %v2912_v1 = vsel %vm2909_vm8, %v2911_v12, %v2903_v18  ;;  %v2914_v5 = vsel %vm2909_vm8, %v2913_v3, %v2905_v16  ;;  %v8334_v16 = vld [vmem:[#allocation73_spill] sm:$0xff]  ;;  %v2602_v18 = vcombine.high %v6517_v28, %v6517_v28  ;;  %v8336_v12 = vld [vmem:[#allocation75_spill] sm:$0xff]  ;;  %vm3260_vm8 = vcmask 457728  }
 0x5de   :  { %v2919_v43 = vmul.f32 %v2912_v1, %v6148_v44  ;;  %v2920_v39 = vmul.f32 %v2914_v5, %v8319_v62 }
 0x5e0   :  { %2928 = vrot.lane.b32.xlu1 %v2920_v39, %s5040_s15  ;;  %2926 = vrot.lane.b32.xlu0 %v2919_v43, %s5040_s15 }
 0x5e4   :  { %2947 = vrot.lane.b32.xlu1 %v8331_v31, %s5030_s5  ;;  %2945 = vrot.lane.b32.xlu0 %v8332_v53, %s5030_s5 }
 0x5e8   :  { %2949 = vrot.lane.b32.xlu0 %v8333_v59, %s5030_s5 }
 0x64d   :  { %v6584_v38 = vpop.permute.xlu1 %2924 }
 0x652   :  { %v6586_v10 = vpop.permute.xlu0 %2926  ;;  %v6588_v19 = vpop.permute.xlu1 %2928 }
 0x656   :  { %v2946_v26 = vpop.permute.xlu0 %2945  ;;  %v2948_v42 = vpop.permute.xlu1 %2947 }
 0x657   :  { %v2951_v23 = vrot.slane %v2946_v26, 6  ;;  %v2952_v55 = vrot.slane %v2948_v42, 6 }
 0x659   :  { %v2954_v22 = vsel %vm8173_vm14, %v2951_v23, %v2946_v26  ;;  %v2955_v50 = vsel %vm90_vm0, %v2951_v23, %v2952_v55 }
 0x65a   :  { %v2962_v60 = vmul.f32 %v2954_v22, %v8325_v20  ;;  %v2956_v32 = vsel %vm8173_vm14, %v2955_v50, %v2948_v42  ;;  %v2950_v52 = vpop.permute.xlu0 %2949 }
 0x65b   :  { %v2963_v37 = vmul.f32 %v2956_v32, %v6148_v44  ;;  %v2953_v47 = vrot.slane %v2950_v52, 6 }
 0x65c   :  { %2968 = vrot.lane.b32.xlu1 %v2962_v60, %s5041_s16 }
 0x65d   :  { %v2957_v13 = vsel %vm90_vm0, %v2952_v55, %v2953_v47  ;;  %2970 = vrot.lane.b32.xlu0 %v2963_v37, %s5041_s16  ;;  %v8337_v47 = vld [vmem:[#allocation79_spill] sm:$0xff] }
 0x65e   :  { %v2958_v21 = vsel %vm8173_vm14, %v2957_v13, %v2950_v52 }
 0x65f   :  { %v2964_v63 = vmul.f32 %v2958_v21, %v2944_v34 }
 0x661   :  { %2972 = vrot.lane.b32.xlu1 %v2964_v63, %s5041_s16  ;;  %2988 = vrot.lane.b32.xlu0 %v8334_v16, %s5031_s30  ;;  %v8338_v63 = vld [vmem:[#allocation80_spill] sm:$0xff]  ;;  %v2800_v16 = vrot.slane %v6445_v40, 2 }
 0x665   :  { %2990 = vrot.lane.b32.xlu1 %v8335_v29, %s5031_s30  ;;  %2642 = vrot.lane.b32.xlu0 %v2602_v18, %s5038_s13  ;;  %v8339_v18 = vld [vmem:[#allocation81_spill] sm:$0xff] }
 0x669   :  { %2650 = vrot.lane.b32.xlu0 %v2619_v11, %s5038_s13  ;;  %s5059_s13 = smov 17  }
 0x66d   :  { %2992 = vrot.lane.b32.xlu0 %v8336_v12, %s5031_s30 }
 0x6ce   :  { %v6612_v3 = vpop.permute.xlu1 %2968 }
 0x6cf   :  { %v6614_v1 = vpop.permute.xlu0 %2970 }
 0x6d3   :  { %v2989_v5 = vpop.permute.xlu0 %2988  ;;  %v6616_v43 = vpop.permute.xlu1 %2972 }
 0x6d4   :  { %v2994_v28 = vrot.slane %v2989_v5, 6 }
 0x6d6   :  { %v2997_v39 = vsel %vm8174_vm3, %v2994_v28, %v2989_v5 }
 0x6d7   :  { %v3005_v26 = vmul.f32 %v2997_v39, %v8325_v20  ;;  %v2991_v42 = vpop.permute.xlu1 %2990  ;;  %v6620_v23 = vpop.permute.xlu0 %2642 }
 0x6d8   :  { %v2995_v9 = vrot.slane %v2991_v42, 6 }
 0x6d9   :  { %3011 = vrot.lane.b32.xlu1 %v3005_v26, %s5042_s17 }
 0x6da   :  { %v2998_v55 = vsel %vm90_vm0, %v2994_v28, %v2995_v9 }
 0x6db   :  { %v2999_v22 = vsel %vm8174_vm3, %v2998_v55, %v2991_v42  ;;  %v6625_v50 = vpop.permute.xlu0 %2650 }
 0x6dc   :  { %v3006_v60 = vmul.f32 %v2999_v22, %v6148_v44 }
 0x6de   :  { %3013 = vrot.lane.b32.xlu0 %v3006_v60, %s5042_s17 }
 0x6df   :  { %v2993_v32 = vpop.permute.xlu0 %2992 }
 0x6e0   :  { %v2996_v52 = vrot.slane %v2993_v32, 6 }
 0x6e2   :  { %v3000_v37 = vsel %vm90_vm0, %v2995_v9, %v2996_v52  ;;  %3031 = vrot.lane.b32.xlu0 %v8337_v47, %s5032_s0 }
 0x6e3   :  { %v3001_v13 = vsel %vm8174_vm3, %v3000_v37, %v2993_v32 }
 0x6e4   :  { %v3007_v21 = vmul.f32 %v3001_v13, %v2944_v34 }
 0x6e6   :  { %3015 = vrot.lane.b32.xlu1 %v3007_v21, %s5042_s17  ;;  %3035 = vrot.lane.b32.xlu0 %v8338_v63, %s5032_s0 }
 0x6ea   :  { %3033 = vrot.lane.b32.xlu1 %v8339_v18, %s5032_s0  ;;  %s5055_s0 = smov 97  }
 0x74b   :  { %v6640_v5 = vpop.permute.xlu1 %3011 }
 0x750   :  { %v6638_v11 = vpop.permute.xlu0 %3013 }
 0x754   :  { %v3032_v28 = vpop.permute.xlu0 %3031 }
 0x755   :  { %v3037_v39 = vrot.slane %v3032_v28, 6 }
 0x757   :  { %v3040_v26 = vsel %vm560_vm4, %v3037_v39, %v3032_v28 }
 0x758   :  { %v3048_v42 = vmul.f32 %v3040_v26, %v8325_v20  ;;  %v6644_v9 = vpop.permute.xlu1 %3015  ;;  %v3036_v55 = vpop.permute.xlu0 %3035  ;;  %v102_v26 = vld [vmem:[#allocation11 + $0x28] sm:$0xff] }
 0x759   :  { %v3039_v22 = vrot.slane %v3036_v55, 6  ;;  %112 = vst [vmem:[#allocation2 + $0x2a] sm:$0xff] %v102_v26 }
 0x75a   :  { %3054 = vrot.lane.b32.xlu1 %v3048_v42, %s5043_s18  ;;  %v103_v42 = vld [vmem:[#allocation11 + $0x30] sm:$0xff] }
 0x75b   :  { %113 = vst [vmem:[#allocation2 + $0x32] sm:$0xff] %v103_v42  ;;  %v8351_v42 = vld [vmem:[#allocation92_spill] sm:$0xff] }
 0x75c   :  { %v3034_v60 = vpop.permute.xlu1 %3033 }
 0x75d   :  { %v3038_v32 = vrot.slane %v3034_v60, 6 }
 0x75f   :  { %v3041_v52 = vsel %vm90_vm0, %v3037_v39, %v3038_v32  ;;  %v3043_v37 = vsel %vm90_vm0, %v3038_v32, %v3039_v22  ;;  %v8340_v39 = vld [vmem:[#allocation82_spill] sm:$0xff]  ;;  %v8346_v32 = vld [vmem:[#allocation23_spill] sm:$0xff] }
 0x760   :  { %v3042_v13 = vsel %vm560_vm4, %v3041_v52, %v3034_v60  ;;  %v3044_v21 = vsel %vm560_vm4, %v3043_v37, %v3036_v55  ;;  %v8342_v55 = vld [vmem:[#allocation84_spill] sm:$0xff]  ;;  %v8344_v22 = vld [vmem:[#allocation22_spill] sm:$0xff]  ;;  %vm2714_vm4 = vcmask 56320  }
 0x761   :  { %v3049_v28 = vmul.f32 %v3042_v13, %v6148_v44  ;;  %v3050_v18 = vmul.f32 %v3044_v21, %v2944_v34  ;;  %v8341_v34 = vld [vmem:[#allocation83_spill] sm:$0xff]  ;;  %v8345_v60 = vld [vmem:[#allocation26_spill] sm:$0xff]  ;;  %v8347_v52 = vld [vmem:[#allocation28_spill] sm:$0xff] }
 0x762   :  { %v8348_v37 = vld [vmem:[#allocation24_spill] sm:$0xff]  ;;  %v8349_v13 = vld [vmem:[#allocation87_spill] sm:$0xff] }
 0x763   :  { %3056 = vrot.lane.b32.xlu0 %v3049_v28, %s5043_s18  ;;  %3058 = vrot.lane.b32.xlu1 %v3050_v18, %s5043_s18  ;;  %v8343_v18 = vld [vmem:[#allocation25_spill] sm:$0xff]  ;;  %v2713_v21 = vrot.slane %v8349_v13, 6  ;;  %v8350_v28 = vld [vmem:[#allocation86_spill] sm:$0xff] }
 0x764   :  { %v2712_v26 = vrot.slane %v8350_v28, 6 }
 0x767   :  { %3077 = vrot.lane.b32.xlu0 %v6469_v27, %s5041_s16  ;;  %3079 = vrot.lane.b32.xlu1 %v6475_v36, %s5041_s16  ;;  %v8354_v36 = vld [vmem:[#allocation93_spill] sm:$0xff] }
 0x76b   :  { %3081 = vrot.lane.b32.xlu0 %v6455_v61, %s5041_s16  ;;  %3100 = vrot.lane.b32.xlu1 %v8340_v39, %s5044_s3  ;;  %v8353_v61 = vld [vmem:[#allocation90_spill] sm:$0xff] }
 0x76c   :  { %v2756_v27 = vrot.slane %v8353_v61, 2 }
 0x76f   :  { %3102 = vrot.lane.b32.xlu0 %v8341_v34, %s5044_s3  ;;  %3104 = vrot.lane.b32.xlu1 %v8342_v55, %s5044_s3  ;;  %v2757_v55 = vrot.slane %v8351_v42, 2  ;;  %v8352_v34 = vld [vmem:[#allocation85_spill] sm:$0xff] }
 0x770   :  { %v2711_v39 = vrot.slane %v8352_v34, 6 }
 0x771   :  { %v2759_v12 = vsel %vm8172_vm13, %v2756_v27, %v2757_v55 }
 0x772   :  { %v2716_v63 = vsel %vm90_vm0, %v2711_v39, %v2712_v26  ;;  %v2715_v53 = vsel %vm2714_vm4, %v2711_v39, %v8352_v34  ;;  %v2760_v27 = vsel %vm456_vm5, %v8353_v61, %v2759_v12  ;;  %v2845_v34 = vrot.slane %v6528_v58, 2 }
 0x773   :  { %3230 = vrot.lane.b32.xlu1 %v8343_v18, %s5048_s22  ;;  %v2801_v18 = vrot.slane %v6463_v41, 2  ;;  %v2717_v31 = vsel %vm2714_vm4, %v2716_v63, %v8350_v28  ;;  %v2723_v63 = vmul.f32 %v2715_v53, %v8325_v20 }
 0x774   :  { %v2724_v17 = vmul.f32 %v2717_v31, %v6148_v44 }
 0x775   :  { %v2767_v20 = vadd.f32 %v2760_v27, %v2723_v63  ;;  %v2931_v27 = vrot.slane %v6586_v10, 2  ;;  %v2848_v63 = vsel %vm8172_vm13, %v2844_v33, %v2845_v34 }
 0x777   :  { %3232 = vrot.lane.b32.xlu1 %v8344_v22, %s5048_s22  ;;  %v2718_v22 = vsel %vm90_vm0, %v2712_v26, %v2713_v21  ;;  %v2802_v21 = vrot.slane %v6472_v7, 2  ;;  %v2803_v26 = vsel %vm8172_vm13, %v2800_v16, %v2801_v18  ;;  %v2843_v16 = vrot.slane %v6526_v24, 2 }
 0x778   :  { %v2719_v47 = vsel %vm2714_vm4, %v2718_v22, %v8349_v13  ;;  %v2886_v22 = vrot.slane %v6564_v49, 2 }
 0x779   :  { %v2725_v61 = vmul.f32 %v2719_v47, %v8319_v62  ;;  %v2807_v28 = vsel %vm8175_vm15, %v6472_v7, %v2802_v21  ;;  %v2846_v62 = vsel %vm8172_vm13, %v2843_v16, %v2844_v33  ;;  %v2850_v47 = vsel %vm8174_vm3, %v6528_v58, %v2845_v34 }
 0x77a   :  { %v2847_v31 = vsel %vm8174_vm3, %v6526_v24, %v2846_v62  ;;  %v2893_v58 = vsel %vm8173_vm14, %v6568_v45, %v2888_v56  ;;  %v2974_v16 = vrot.slane %v6612_v3, 2  ;;  %v2975_v45 = vrot.slane %v6614_v1, 2 }
 0x77b   :  { %3234 = vrot.lane.b32.xlu1 %v8345_v60, %s5048_s22  ;;  %v2758_v60 = vrot.slane %v8354_v36, 2  ;;  %v3019_v33 = vrot.slane %v6644_v9, 2 }
 0x77d   :  { %v2761_v29 = vsel %vm8172_vm13, %v2757_v55, %v2758_v60  ;;  %v2763_v39 = vsel %vm456_vm5, %v8354_v36, %v2758_v60  ;;  %v2887_v55 = vrot.slane %v6566_v46, 2  ;;  %v2804_v36 = vsel %vm8175_vm15, %v6445_v40, %v2803_v26 }
 0x77e   :  { %v2762_v12 = vsel %vm456_vm5, %v8351_v42, %v2761_v29  ;;  %v2805_v60 = vsel %vm8172_vm13, %v2801_v18, %v2802_v21  ;;  %v2769_v53 = vadd.f32 %v2763_v39, %v2725_v61  ;;  %v2932_v40 = vrot.slane %v6588_v19, 2 }
 0x77f   :  { %3251 = vrot.lane.b32.xlu1 %v8346_v32, %s5049_s25  ;;  %v2889_v29 = vsel %vm8172_vm13, %v2886_v22, %v2887_v55  ;;  %v2811_v7 = vadd.f32 %v2804_v36, %v2767_v20  ;;  %v2768_v26 = vadd.f32 %v2762_v12, %v2724_v17  ;;  %v2806_v44 = vsel %vm8175_vm15, %v6463_v41, %v2805_v60 }
 0x780   :  { %v2813_v21 = vadd.f32 %v2807_v28, %v2769_v53  ;;  %v2976_v39 = vrot.slane %v6616_v43, 2  ;;  %v2890_v61 = vsel %vm8173_vm14, %v6564_v49, %v2889_v29  ;;  %v2891_v17 = vsel %vm8172_vm13, %v2887_v55, %v2888_v56 }
 0x781   :  { %v2930_v41 = vrot.slane %v6584_v38, 2  ;;  %v2937_v24 = vsel %vm8171_vm1, %v6588_v19, %v2932_v40  ;;  %v2812_v36 = vadd.f32 %v2806_v44, %v2768_v26  ;;  %v2854_v60 = vadd.f32 %v2847_v31, %v2811_v7 }
 0x782   :  { %v2856_v22 = vadd.f32 %v2850_v47, %v2813_v21  ;;  %v2849_v49 = vsel %vm8174_vm3, %v6530_v25, %v2848_v63  ;;  %v2981_v34 = vsel %vm8170_vm6, %v6616_v43, %v2976_v39  ;;  %v3018_v19 = vrot.slane %v6638_v11, 2 }
 0x783   :  { %3253 = vrot.lane.b32.xlu1 %v8347_v52, %s5049_s25  ;;  %v2933_v56 = vsel %vm8172_vm13, %v2930_v41, %v2931_v27  ;;  %v2897_v20 = vadd.f32 %v2890_v61, %v2854_v60  ;;  %v2892_v53 = vsel %vm8173_vm14, %v6566_v46, %v2891_v17  ;;  %v2935_v29 = vsel %vm8172_vm13, %v2931_v27, %v2932_v40 }
 0x784   :  { %v2899_v28 = vadd.f32 %v2893_v58, %v2856_v22  ;;  %v2977_v7 = vsel %vm8172_vm13, %v2974_v16, %v2975_v45  ;;  %v3017_v25 = vrot.slane %v6640_v5, 2  ;;  %v2934_v43 = vsel %vm8171_vm1, %v6584_v38, %v2933_v56 }
 0x785   :  { %v3024_v46 = vsel %vm8169_vm12, %v6644_v9, %v3019_v33  ;;  %v2855_v63 = vadd.f32 %v2849_v49, %v2812_v36  ;;  %v2978_v61 = vsel %vm8170_vm6, %v6612_v3, %v2977_v7  ;;  %v2941_v17 = vadd.f32 %v2934_v43, %v2897_v20 }
 0x786   :  { %v2943_v62 = vadd.f32 %v2937_v24, %v2899_v28  ;;  %v3020_v58 = vsel %vm8172_vm13, %v3017_v25, %v3018_v19  ;;  %v2979_v41 = vsel %vm8172_vm13, %v2975_v45, %v2976_v39  ;;  %v2936_v28 = vsel %vm8171_vm1, %v6586_v10, %v2935_v29 }
 0x787   :  { %3255 = vrot.lane.b32.xlu1 %v8348_v37, %s5049_s25  ;;  %v2898_v60 = vadd.f32 %v2892_v53, %v2855_v63  ;;  %v3021_v36 = vsel %vm8169_vm12, %v6640_v5, %v3020_v58  ;;  %v3022_v49 = vsel %vm8172_vm13, %v3018_v19, %v3019_v33  ;;  %v2985_v56 = vadd.f32 %v2978_v61, %v2941_v17 }
 0x788   :  { %v2987_v44 = vadd.f32 %v2981_v34, %v2943_v62  ;;  %v2980_v45 = vsel %vm8170_vm6, %v6614_v1, %v2979_v41  ;;  %v3023_v33 = vsel %vm8169_vm12, %v6638_v11, %v3022_v49  ;;  %vm3831_vm1 = vcmask 859136  }
 0x789   :  { %v2942_v20 = vadd.f32 %v2936_v28, %v2898_v60  ;;  %v3028_v53 = vadd.f32 %v3021_v36, %v2985_v56  ;;  %vm3878_vm14 = vcmask 121856   ;;  %vm3922_vm3 = vcmask 130048  }
 0x78a   :  { %v3030_v9 = vadd.f32 %v3024_v46, %v2987_v44  ;;  %vm3185_vm15 = vcmask 990208  }
 0x7cc   :  { %v6688_v59 = vpop.permute.xlu1 %3054 }
 0x7cd   :  { %v3060_v40 = vrot.slane %v6688_v59, 2 }
 0x7d5   :  { %v6708_v13 = vpop.permute.xlu1 %3058  ;;  %v6710_v15 = vpop.permute.xlu0 %3056 }
 0x7d6   :  { %v3062_v47 = vrot.slane %v6708_v13, 2  ;;  %v3061_v21 = vrot.slane %v6710_v15, 2 }
 0x7d8   :  { %v3067_v38 = vsel %vm8168_vm7, %v6708_v13, %v3062_v47  ;;  %v3063_v24 = vsel %vm8172_vm13, %v3060_v40, %v3061_v21  ;;  %v3065_v10 = vsel %vm8172_vm13, %v3061_v21, %v3062_v47  ;;  %v6810_v40 = vld [vmem:[#allocation2 + $0x26] sm:$0xff] }
 0x7d9   :  { %v6729_v42 = vpop.permute.xlu1 %3079  ;;  %v6731_v18 = vpop.permute.xlu0 %3077  ;;  %v3073_v13 = vadd.f32 %v3067_v38, %v3030_v9  ;;  %v3064_v34 = vsel %vm8168_vm7, %v6688_v59, %v3063_v24  ;;  %v3066_v59 = vsel %vm8168_vm7, %v6710_v15, %v3065_v10  ;;  %v6820_v9 = vld [vmem:[#allocation2 + $0x2e] sm:$0xff]  ;;  %vm91_vm7 = vcmask 519170  }
 0x7da   :  { %v3084_v27 = vrot.slane %v6729_v42, 2  ;;  %v3083_v22 = vrot.slane %v6731_v18, 2  ;;  %v3071_v29 = vadd.f32 %v3064_v34, %v3028_v53  ;;  %vm92_vm12 = vmor %vm91_vm7, %vm90_vm0  ;;  %vm3787_vm7 = vcmask 850944  }
 0x7dc   :  { %v3086_v39 = vsel %vm8172_vm13, %v3083_v22, %v3084_v27 }
 0x7dd   :  { %v6750_v12 = vpop.permute.xlu1 %3100  ;;  %v3082_v55 = vpop.permute.xlu0 %3081  ;;  %v3087_v19 = vsel %vm8170_vm6, %v6731_v18, %v3086_v39  ;;  %v6828_v39 = vld [vmem:[#allocation2 + $0x36] sm:$0xf] }
 0x7de   :  { %v3085_v31 = vrot.slane %v3082_v55, 2  ;;  %v3094_v25 = vadd.f32 %v3087_v19, %v3071_v29  ;;  %v3106_v17 = vrot.slane %v6750_v12, 6  ;;  %v8355_v19 = vld [vmem:[#allocation27_spill] sm:$0xff] }
 0x7e0   :  { %v3090_v3 = vsel %vm8170_vm6, %v3082_v55, %v3085_v31  ;;  %v2986_v55 = vadd.f32 %v2980_v45, %v2942_v20  ;;  %v3088_v1 = vsel %vm8172_vm13, %v3084_v27, %v3085_v31  ;;  %v3109_v56 = vsel %vm2714_vm4, %v3106_v17, %v6750_v12 }
 0x7e1   :  { %v6766_v26 = vpop.permute.xlu1 %3104  ;;  %v3096_v62 = vadd.f32 %v3090_v3, %v3073_v13  ;;  %v3089_v21 = vsel %vm8170_vm6, %v6729_v42, %v3088_v1  ;;  %v3103_v11 = vpop.permute.xlu0 %3102  ;;  %vm3349_vm6 = vcmask 777216   ;;  %vm3437_vm13 = vcmask 793600  }
 0x7e2   :  { %v3029_v7 = vadd.f32 %v3023_v33, %v2986_v55  ;;  %v3108_v46 = vrot.slane %v6766_v26, 6  ;;  %v3107_v31 = vrot.slane %v3103_v11, 6 }
 0x7e3   :  { %4856 = vtanh.f32 %v3096_v62 }
 0x7e4   :  { %v3072_v43 = vadd.f32 %v3066_v59, %v3029_v7  ;;  %4858 = vtanh.f32 %v3094_v25  ;;  %v3112_v42 = vsel %vm90_vm0, %v3107_v31, %v3108_v46  ;;  %v3110_v34 = vsel %vm90_vm0, %v3106_v17, %v3107_v31  ;;  %v106_v31 = vld [vmem:[#allocation11 + $0x48] sm:$0xf] }
 0x7e5   :  { %v6782_v16 = vpop.permute.xlu1 %3230  ;;  %v3113_v41 = vsel %vm2714_vm4, %v3112_v42, %v6766_v26  ;;  %v3111_v62 = vsel %vm2714_vm4, %v3110_v34, %v3103_v11  ;;  %v6848_v11 = vld [vmem:[#allocation11 + $0x38] sm:$0xff]  ;;  %v8356_v46 = vmov 0.0   ;;  %v2658_v42 = vsel %vm1319_vm9, %v6548_v30, %v6558_v48 }
 0x7e6   :  { %v3095_v44 = vadd.f32 %v3089_v21, %v3072_v43  ;;  %114 = vst [vmem:[#allocation2 + $0x3a] sm:$0xff] %v6848_v11  ;;  %93 = vst.msk [vmem:[#allocation2 + $0x4c] sm:$0xf] %vm92_vm12, %v8356_v46  ;;  %v2661_v30 = vsel %vm1319_vm9, %v6620_v23, %v6550_v0 }
 0x7e7   :  { %116 = vst.msk [vmem:[#allocation2 + $0x4a] sm:$0xf] %vm92_vm12, %v106_v31  ;;  %vm2695_vm12 = vcmask 386048  }
 0x7e8   :  { %4860 = vtanh.f32 %v3095_v44 }
 0x7e9   :  { %v6796_v5 = vpop.permute.xlu1 %3232 }
 0x7ed   :  { %v6805_v47 = vpop.permute.xlu1 %3234  ;;  %v4857_v61 = vpop.eup %4856 }
 0x7ee   :  { %v3119_v3 = vmul.f32 %v4857_v61, %v3113_v41  ;;  %v4859_v49 = vpop.eup %4858  ;;  %v2662_v41 = vsel %vm1319_vm9, %v6550_v0, %v6562_v57  ;;  %v2664_v0 = vsel %vm1319_vm9, %v6560_v4, %v6625_v50 }
 0x7ef   :  { %v3117_v45 = vmul.f32 %v4859_v49, %v3109_v56  ;;  %v2689_v49 = vsel %vm90_vm0, %v2664_v0, 0.0 }
 0x7f0   :  { %v3163_v10 = vrot.slane %v3119_v3, %v8323_v54 }
 0x7f1   :  { %v3252_v18 = vpop.permute.xlu1 %3251  ;;  %v3130_v12 = vrot.slane %v3117_v45, %v8323_v54  ;;  %v3123_v55 = vcombine.high %v3117_v45, %v3117_v45 }
 0x7f2   :  { %v3257_v58 = vrot.slane %v3252_v18, 6  ;;  %v4861_v53 = vpop.eup %4860  ;;  %v3164_v1 = vcombine.high %v3163_v10, %v3163_v10 }
 0x7f3   :  { %v3118_v33 = vmul.f32 %v4861_v53, %v3111_v62  ;;  %v3138_v7 = vcombine.high %v3130_v12, %v3130_v12  ;;  %v3137_v25 = vrot.slane %v3123_v55, %v8323_v54  ;;  %v8368_v55 = vld [vmem:[#allocation79_spill] sm:$0xff] }
 0x7f4   :  { %v3261_v15 = vsel %vm3260_vm8, %v3257_v58, %v3252_v18  ;;  %v6854_v18 = vld [vmem:[#allocation11 + $0x40] sm:$0xff] }
 0x7f5   :  { %v3269_v27 = vmul.f32 %v3261_v15, %v6810_v40  ;;  %v3254_v22 = vpop.permute.xlu1 %3253  ;;  %v3147_v29 = vrot.slane %v3118_v33, %v8323_v54  ;;  %v3140_v59 = vcombine.high %v3118_v33, %v3118_v33  ;;  %v3139_v44 = vcombine.high %v3137_v25, %v3137_v25  ;;  %115 = vst [vmem:[#allocation2 + $0x42] sm:$0xff] %v6854_v18  ;;  %v8366_v33 = vld [vmem:[#allocation69_spill] sm:$0xff] }
 0x7f6   :  { %v3258_v63 = vrot.slane %v3254_v22, 6 }
 0x7f7   :  { %3275 = vrot.lane.b32.xlu1 %v3269_v27, %s5033_s7  ;;  %v3155_v21 = vcombine.high %v3147_v29, %v3147_v29  ;;  %v3154_v43 = vrot.slane %v3140_v59, %v8323_v54  ;;  %v8358_v27 = vld [vmem:[#allocation30_spill] sm:$0xff] }
 0x7f8   :  { %v3262_v38 = vsel %vm90_vm0, %v3257_v58, %v3258_v63  ;;  %v8357_v58 = vld [vmem:[#allocation32_spill] sm:$0xff] }
 0x7f9   :  { %v3263_v24 = vsel %vm3260_vm8, %v3262_v38, %v3254_v22  ;;  %v3256_v60 = vpop.permute.xlu1 %3255  ;;  %v3156_v15 = vcombine.high %v3154_v43, %v3154_v43  ;;  %v2659_v22 = vsel %vm1319_vm9, %v6558_v48, %v6556_v2  ;;  %v8359_v38 = vld [vmem:[#allocation33_spill] sm:$0xff]  ;;  %v2683_v48 = vsel %vm90_vm0, %v2661_v30, 0.0 }
 0x7fa   :  { %v3270_v28 = vmul.f32 %v3263_v24, %v6820_v9  ;;  %v3259_v36 = vrot.slane %v3256_v60, 6  ;;  %v2679_v61 = vsel %vm90_vm0, %v2659_v22, 0.0  ;;  %v8374_v22 = vld [vmem:[#allocation81_spill] sm:$0xff] }
 0x7fc   :  { %v3264_v13 = vsel %vm90_vm0, %v3258_v63, %v3259_v36  ;;  %3277 = vrot.lane.b32.xlu0 %v3270_v28, %s5033_s7  ;;  %v2660_v63 = vsel %vm1319_vm9, %v6556_v2, %v6620_v23  ;;  %v8361_v28 = vld [vmem:[#allocation29_spill] sm:$0xff]  ;;  %v2663_v23 = vsel %vm1319_vm9, %v6562_v57, %v6560_v4  ;;  %v2665_v57 = vsel %vm1319_vm9, %v6625_v50, %v6546_v14 }
 0x7fd   :  { %v3265_v26 = vsel %vm3260_vm8, %v3264_v13, %v3256_v60  ;;  %v2685_v60 = vsel %vm90_vm0, %v2662_v41, 0.0  ;;  %v2687_v3 = vsel %vm90_vm0, %v2663_v23, 0.0  ;;  %v2691_v56 = vsel %vm90_vm0, %v2665_v57, 0.0 }
 0x7fe   :  { %v3271_v20 = vmul.f32 %v3265_v26, %v6828_v39  ;;  %v8362_v26 = vld [vmem:[#allocation41_spill] sm:$0xff] }
 0x7ff   :  { %v2666_v45 = vsel %vm1319_vm9, %v6546_v14, %v8362_v26  ;;  %v8365_v14 = vld [vmem:[#allocation48_spill] sm:$0xff] }
 0x800   :  { %3279 = vrot.lane.b32.xlu1 %v3271_v20, %s5033_s7  ;;  %3181 = vrot.lane.b32.xlu0 %v3163_v10, %s5050_s26  ;;  %v2693_v34 = vsel %vm90_vm0, %v2666_v45, 0.0  ;;  %v8363_v20 = vld [vmem:[#allocation44_spill] sm:$0xff]  ;;  %v8364_v10 = vld [vmem:[#allocation38_spill] sm:$0xff] }
 0x801   :  { %v2667_v50 = vsel %vm1319_vm9, %v8362_v26, %v8364_v10  ;;  %vm3304_vm9 = vcmask 465920   ;;  %v7034_v26 = vld [vmem:[#allocation2 + $0x40] sm:$0xff] }
 0x802   :  { %v2696_v62 = vsel %vm2695_vm12, %v2667_v50, 0.0 }
 0x804   :  { %3295 = vrot.lane.b32.xlu1 %v8355_v19, %s5051_s27  ;;  %3165 = vrot.lane.b32.xlu0 %v3130_v12, %s5050_s26 }
 0x808   :  { %3183 = vrot.lane.b32.xlu1 %v3164_v1, %s5050_s26  ;;  %3173 = vrot.lane.b32.xlu0 %v3147_v29, %s5050_s26  ;;  %v8369_v29 = vld [vmem:[#allocation67_spill] sm:$0xff] }
 0x80c   :  { %3167 = vrot.lane.b32.xlu1 %v3138_v7, %s5050_s26  ;;  %3169 = vrot.lane.b32.xlu0 %v3137_v25, %s5050_s26  ;;  %v8372_v7 = vld [vmem:[#allocation75_spill] sm:$0xff] }
 0x810   :  { %3175 = vrot.lane.b32.xlu1 %v3155_v21, %s5050_s26  ;;  %3177 = vrot.lane.b32.xlu0 %v3154_v43, %s5050_s26  ;;  %v8373_v21 = vld [vmem:[#allocation80_spill] sm:$0xff] }
 0x814   :  { %3171 = vrot.lane.b32.xlu1 %v3139_v44, %s5050_s26  ;;  %3342 = vrot.lane.b32.xlu0 %v8357_v58, %s5052_s28 }
 0x818   :  { %3824 = vrot.lane.b32.xlu0 %v8358_v27, %s5053_s4  ;;  %3179 = vrot.lane.b32.xlu1 %v3156_v15, %s5050_s26 }
 0x81c   :  { %3386 = vrot.lane.b32.xlu0 %v8322_v8, %s5054_s29  ;;  %3297 = vrot.lane.b32.xlu1 %v8358_v27, %s5051_s27 }
 0x820   :  { %3428 = vrot.lane.b32.xlu0 %v8326_v35, %s5055_s0  ;;  %3778 = vrot.lane.b32.xlu1 %v8346_v32, %s5056_s8  ;;  %v8360_v32 = vld [vmem:[#allocation31_spill] sm:$0xff] }
 0x824   :  { %3782 = vrot.lane.b32.xlu0 %v8348_v37, %s5056_s8  ;;  %3780 = vrot.lane.b32.xlu1 %v8347_v52, %s5056_s8  ;;  %v2678_v52 = vsel %vm90_vm0, %v2658_v42, 0.0  ;;  %v2681_v37 = vsel %vm90_vm0, %v2660_v63, 0.0 }
 0x825   :  { %v2680_v17 = vadd.f32 %v2679_v61, %v2678_v52 }
 0x827   :  { %v2682_v2 = vadd.f32 %v2681_v37, %v2680_v17 }
 0x828   :  { %3344 = vrot.lane.b32.xlu0 %v8359_v38, %s5052_s28  ;;  %3340 = vrot.lane.b32.xlu1 %v8360_v32, %s5052_s28 }
 0x829   :  { %v2684_v24 = vadd.f32 %v2683_v48, %v2682_v2 }
 0x82b   :  { %v2686_v36 = vadd.f32 %v2685_v60, %v2684_v24 }
 0x82c   :  { %3913 = vrot.lane.b32.xlu0 %v8321_v6, %s5057_s11  ;;  %3822 = vrot.lane.b32.xlu1 %v8355_v19, %s5053_s4  ;;  %v8367_v19 = vld [vmem:[#allocation74_spill] sm:$0xff] }
 0x830   :  { %3384 = vrot.lane.b32.xlu1 %v8321_v6, %s5054_s29  ;;  %v2688_v6 = vadd.f32 %v2687_v3, %v2686_v36 }
 0x832   :  { %v2690_v13 = vadd.f32 %v2689_v49, %v2688_v6  ;;  %v8375_v6 = vld [vmem:[#allocation25_spill] sm:$0xff] }
 0x834   :  { %3299 = vrot.lane.b32.xlu1 %v8361_v28, %s5051_s27  ;;  %v2692_v4 = vadd.f32 %v2691_v56, %v2690_v13 }
 0x836   :  { %v2694_v53 = vadd.f32 %v2693_v34, %v2692_v4 }
 0x838   :  { %3430 = vrot.lane.b32.xlu1 %v8328_v51, %s5055_s0  ;;  %v2697_v12 = vadd.f32 %v2696_v62, %v2694_v53 }
 0x83c   :  { %3869 = vrot.lane.b32.xlu1 %v8360_v32, %s5058_s12 }
 0x840   :  { %3826 = vrot.lane.b32.xlu1 %v8361_v28, %s5053_s4  ;;  %v7020_v28 = vld [vmem:[#allocation2 + $0x38] sm:$0xff] }
 0x844   :  { %3388 = vrot.lane.b32.xlu1 %v8363_v20, %s5054_s29 }
 0x848   :  { %3871 = vrot.lane.b32.xlu1 %v8357_v58, %s5058_s12 }
 0x84b   :  { %2698 = vadd.xlane.f32.xlu0 %v2697_v12 }
 0x84c   :  { %3432 = vrot.lane.b32.xlu1 %v8365_v14, %s5055_s0 }
 0x850   :  { %3915 = vrot.lane.b32.xlu1 %v8322_v8, %s5057_s11  ;;  %v8370_v8 = vld [vmem:[#allocation73_spill] sm:$0xff] }
 0x854   :  { %3477 = vrot.lane.b32.xlu1 %v8366_v33, %s5044_s3 }
 0x858   :  { %3959 = vrot.lane.b32.xlu1 %v8328_v51, %s5059_s13  ;;  %v8371_v51 = vld [vmem:[#allocation68_spill] sm:$0xff] }
 0x85c   :  { %3520 = vrot.lane.b32.xlu1 %v8367_v19, %s5045_s9 }
 0x860   :  { %4087 = vrot.lane.b32.xlu1 %v8368_v55, %s5051_s27 }
 0x861   :  { %3475 = vrot.lane.b32.xlu0 %v8369_v29, %s5044_s3 }
 0x864   :  { %3873 = vrot.lane.b32.xlu1 %v8359_v38, %s5058_s12 }
 0x865   :  { %3957 = vrot.lane.b32.xlu0 %v8326_v35, %s5059_s13 }
 0x868   :  { %3917 = vrot.lane.b32.xlu1 %v8363_v20, %s5057_s11 }
 0x869   :  { %3518 = vrot.lane.b32.xlu0 %v8370_v8, %s5045_s9  ;;  %v6955_v1 = vpop.permute.xlu1 %3275 }
 0x86c   :  { %3479 = vrot.lane.b32.xlu1 %v8371_v51, %s5044_s3 }
 0x86d   :  { %4001 = vrot.lane.b32.xlu0 %v8369_v29, %s5048_s22 }
 0x86e   :  { %v6957_v59 = vpop.permute.xlu0 %3277 }
 0x870   :  { %3522 = vrot.lane.b32.xlu1 %v8372_v7, %s5045_s9 }
 0x871   :  { %3561 = vrot.lane.b32.xlu0 %v8368_v55, %s5046_s21 }
 0x872   :  { %v6963_v35 = vpop.permute.xlu1 %3279  ;;  %v6965_v25 = vpop.permute.xlu0 %3181 }
 0x874   :  { %3565 = vrot.lane.b32.xlu1 %v8373_v21, %s5046_s21 }
 0x875   :  { %4044 = vrot.lane.b32.xlu0 %v8370_v8, %s5049_s25 }
 0x876   :  { %v3296_v43 = vpop.permute.xlu1 %3295  ;;  %v6971_v44 = vpop.permute.xlu0 %3165 }
 0x877   :  { %v3301_v46 = vrot.slane %v3296_v43, 6 }
 0x878   :  { %4091 = vrot.lane.b32.xlu1 %v8373_v21, %s5051_s27 }
 0x879   :  { %v3305_v31 = vsel %vm3304_vm9, %v3301_v46, %v3296_v43  ;;  %4003 = vrot.lane.b32.xlu0 %v8366_v33, %s5048_s22 }
 0x87a   :  { %v3313_v58 = vmul.f32 %v3305_v31, %v6810_v40  ;;  %v6979_v15 = vpop.permute.xlu1 %3183  ;;  %v6981_v27 = vpop.permute.xlu0 %3173 }
 0x87c   :  { %3319 = vrot.lane.b32.xlu1 %v3313_v58, %s5039_s14 }
 0x87d   :  { %3563 = vrot.lane.b32.xlu0 %v8374_v22, %s5046_s21 }
 0x87e   :  { %v6986_v42 = vpop.permute.xlu1 %3167  ;;  %v6988_v63 = vpop.permute.xlu0 %3169 }
 0x881   :  { %4046 = vrot.lane.b32.xlu0 %v8367_v19, %s5049_s25 }
 0x882   :  { %v6992_v61 = vpop.permute.xlu1 %3175  ;;  %v6994_v38 = vpop.permute.xlu0 %3177 }
 0x885   :  { %4089 = vrot.lane.b32.xlu0 %v8374_v22, %s5051_s27 }
 0x886   :  { %v6998_v32 = vpop.permute.xlu1 %3171  ;;  %v3343_v52 = vpop.permute.xlu0 %3342 }
 0x887   :  { %v3347_v10 = vrot.slane %v3343_v52, 6 }
 0x889   :  { %3961 = vrot.lane.b32.xlu0 %v8365_v14, %s5059_s13 }
 0x88a   :  { %v7002_v37 = vpop.permute.xlu1 %3179  ;;  %v7004_v17 = vpop.permute.xlu0 %3824 }
 0x88d   :  { %4005 = vrot.lane.b32.xlu0 %v8371_v51, %s5048_s22  ;;  %v3829_v51 = vrot.slane %v7004_v17, 6 }
 0x88e   :  { %v7008_v30 = vpop.permute.xlu1 %3297  ;;  %v7010_v2 = vpop.permute.xlu0 %3386 }
 0x88f   :  { %v3302_v48 = vrot.slane %v7008_v30, 6 }
 0x891   :  { %v3306_v41 = vsel %vm90_vm0, %v3301_v46, %v3302_v48  ;;  %4048 = vrot.lane.b32.xlu0 %v8372_v7, %s5049_s25 }
 0x892   :  { %v3779_v24 = vpop.permute.xlu1 %3778  ;;  %v7018_v60 = vpop.permute.xlu0 %3428  ;;  %v3307_v36 = vsel %vm3304_vm9, %v3306_v41, %v7008_v30 }
 0x893   :  { %v3784_v23 = vrot.slane %v3779_v24, 6  ;;  %v3314_v13 = vmul.f32 %v3307_v36, %v6820_v9 }
 0x895   :  { %v3788_v3 = vsel %vm3787_vm7, %v3784_v23, %v3779_v24  ;;  %3757 = vrot.lane.b32.xlu0 %v8375_v6, %s5060_s19 }
 0x896   :  { %v3796_v0 = vmul.f32 %v3788_v3, %v7020_v28  ;;  %v7028_v49 = vpop.permute.xlu1 %3780  ;;  %v7030_v57 = vpop.permute.xlu0 %3782 }
 0x897   :  { %v3785_v56 = vrot.slane %v7028_v49, 6 }
 0x898   :  { %3802 = vrot.lane.b32.xlu1 %v3796_v0, %s5033_s7 }
 0x899   :  { %v3789_v45 = vsel %vm90_vm0, %v3784_v23, %v3785_v56  ;;  %3321 = vrot.lane.b32.xlu0 %v3314_v13, %s5039_s14 }
 0x89a   :  { %v3790_v4 = vsel %vm3787_vm7, %v3789_v45, %v7028_v49  ;;  %v3341_v34 = vpop.permute.xlu1 %3340  ;;  %v3345_v20 = vpop.permute.xlu0 %3344 }
 0x89b   :  { %v3797_v50 = vmul.f32 %v3790_v4, %v7034_v26  ;;  %v3346_v53 = vrot.slane %v3341_v34, 6  ;;  %v3348_v62 = vrot.slane %v3345_v20, 6 }
 0x89d   :  { %v3350_v12 = vsel %vm3349_vm6, %v3346_v53, %v3341_v34  ;;  %v3351_v14 = vsel %vm90_vm0, %v3346_v53, %v3347_v10  ;;  %v3353_v33 = vsel %vm90_vm0, %v3347_v10, %v3348_v62  ;;  %3804 = vrot.lane.b32.xlu0 %v3797_v50, %s5033_s7  ;;  %v3434_v34 = vrot.slane %v7018_v60, 6  ;;  %v8376_v53 = vld [vmem:[#allocation22_spill] sm:$0xff] }
 0x89e   :  { %v3352_v19 = vsel %vm3349_vm6, %v3351_v14, %v3343_v52  ;;  %v3358_v55 = vmul.f32 %v3350_v12, %v6810_v40  ;;  %v7048_v29 = vsel %vm3349_vm6, %v3353_v33, %v3345_v20  ;;  %v3823_v8 = vpop.permute.xlu1 %3822  ;;  %vm3393_vm6 = vcmask 785408   ;;  %v7078_v50 = vpop.permute.xlu0 %3913 }
 0x89f   :  { %v3828_v7 = vrot.slane %v3823_v8, 6  ;;  %v3359_v21 = vmul.f32 %v3352_v19, %v6820_v9  ;;  %v3391_v52 = vrot.slane %v7010_v2, 6  ;;  %v3919_v12 = vrot.slane %v7078_v50, 6 }
 0x8a0   :  { %3364 = vrot.lane.b32.xlu1 %v3358_v55, %s5031_s30  ;;  %v3786_v19 = vrot.slane %v7030_v57, 6 }
 0x8a1   :  { %v3832_v43 = vsel %vm3831_vm1, %v3828_v7, %v3823_v8  ;;  %v3833_v46 = vsel %vm90_vm0, %v3828_v7, %v3829_v51  ;;  %3366 = vrot.lane.b32.xlu0 %v3359_v21, %s5031_s30 }
 0x8a2   :  { %v3834_v31 = vsel %vm3831_vm1, %v3833_v46, %v7004_v17  ;;  %v3840_v58 = vmul.f32 %v3832_v43, %v7020_v28  ;;  %v3385_v22 = vpop.permute.xlu1 %3384  ;;  %v3438_v43 = vsel %vm3437_vm13, %v3434_v34, %v7018_v60  ;;  %v3923_v46 = vsel %vm3922_vm3, %v3919_v12, %v7078_v50 }
 0x8a3   :  { %v3390_v41 = vrot.slane %v3385_v22, 6  ;;  %v3841_v24 = vmul.f32 %v3834_v31, %v7034_v26  ;;  %v3187_v60 = vsel %vm3185_vm15, %v6986_v42, %v6988_v63  ;;  %v3931_v49 = vmul.f32 %v3923_v46, %v6848_v11 }
 0x8a4   :  { %3846 = vrot.lane.b32.xlu1 %v3840_v58, %s5039_s14  ;;  %v3791_v58 = vsel %vm90_vm0, %v3785_v56, %v3786_v19  ;;  %v3188_v56 = vsel %vm3185_vm15, %v6988_v63, %v6998_v32 }
 0x8a5   :  { %v3394_v23 = vsel %vm3393_vm6, %v3390_v41, %v3385_v22  ;;  %v3395_v36 = vsel %vm90_vm0, %v3390_v41, %v3391_v52  ;;  %3848 = vrot.lane.b32.xlu0 %v3841_v24, %s5039_s14  ;;  %v3446_v41 = vmul.f32 %v3438_v43, %v6810_v40 }
 0x8a6   :  { %v3402_v17 = vmul.f32 %v3394_v23, %v6810_v40  ;;  %v3300_v3 = vpop.permute.xlu1 %3299  ;;  %v3396_v6 = vsel %vm3393_vm6, %v3395_v36, %v7010_v2  ;;  %v7122_v23 = vld [vmem:[#allocation2 + $0x48] sm:$0x3f]  ;;  %v3208_v40 = vsel %vm90_vm0, %v3188_v56, 0.0 }
 0x8a7   :  { %v3303_v0 = vrot.slane %v3300_v3, 6  ;;  %v3403_v13 = vmul.f32 %v3396_v6, %v6820_v9 }
 0x8a8   :  { %3408 = vrot.lane.b32.xlu1 %v3402_v17, %s5030_s5 }
 0x8a9   :  { %v3308_v45 = vsel %vm90_vm0, %v3302_v48, %v3303_v0  ;;  %3410 = vrot.lane.b32.xlu0 %v3403_v13, %s5030_s5 }
 0x8aa   :  { %v3431_v4 = vpop.permute.xlu1 %3430  ;;  %v3309_v20 = vsel %vm3304_vm9, %v3308_v45, %v3300_v3 }
 0x8ab   :  { %v3435_v10 = vrot.slane %v3431_v4, 6  ;;  %v3315_v30 = vmul.f32 %v3309_v20, %v6828_v39 }
 0x8ac   :  { %3759 = vrot.lane.b32.xlu1 %v8376_v53, %s5060_s19 }
 0x8ad   :  { %v3439_v62 = vsel %vm90_vm0, %v3434_v34, %v3435_v10  ;;  %v3190_v34 = vsel %vm3185_vm15, %v6981_v27, %v6992_v61 }
 0x8ae   :  { %v7084_v48 = vpop.permute.xlu1 %3869  ;;  %v3440_v14 = vsel %vm3437_vm13, %v3439_v62, %v3431_v4 }
 0x8af   :  { %v3875_v33 = vrot.slane %v7084_v48, 6  ;;  %v3447_v8 = vmul.f32 %v3440_v14, %v6820_v9  ;;  %v3186_v9 = vsel %vm3185_vm15, %v6971_v44, %v6986_v42  ;;  %v3792_v44 = vsel %vm3787_vm7, %v3791_v58, %v7030_v57 }
 0x8b0   :  { %3323 = vrot.lane.b32.xlu1 %v3315_v30, %s5039_s14  ;;  %v3205_v42 = vsel %vm90_vm0, %v3186_v9, 0.0  ;;  %v3798_v17 = vmul.f32 %v3792_v44, %v7122_v23  ;;  %v3189_v57 = vsel %vm3185_vm15, %v6998_v32, %v6981_v27  ;;  %v3212_v30 = vsel %vm90_vm0, %v3190_v34, 0.0 }
 0x8b1   :  { %v3879_v55 = vsel %vm3878_vm14, %v3875_v33, %v7084_v48  ;;  %v3210_v4 = vsel %vm90_vm0, %v3189_v57, 0.0  ;;  %v3191_v32 = vsel %vm3185_vm15, %v6992_v61, %v6994_v38  ;;  %v3194_v61 = vsel %vm3185_vm15, %v6965_v25, %v6979_v15 }
 0x8b2   :  { %v3887_v7 = vmul.f32 %v3879_v55, %v6848_v11  ;;  %v3827_v21 = vpop.permute.xlu1 %3826  ;;  %v3214_v19 = vsel %vm90_vm0, %v3191_v32, 0.0  ;;  %v3192_v55 = vsel %vm3185_vm15, %v6994_v38, %v7002_v37  ;;  %v3220_v46 = vsel %vm90_vm0, %v3194_v61, 0.0 }
 0x8b3   :  { %v3830_v31 = vrot.slane %v3827_v21, 6  ;;  %v3222_v38 = vsel %vm2695_vm12, %v6979_v15, 0.0 }
 0x8b4   :  { %3893 = vrot.lane.b32.xlu0 %v3887_v7, %s5031_s30  ;;  %3454 = vrot.lane.b32.xlu1 %v3447_v8, %s5040_s15  ;;  %v3216_v8 = vsel %vm90_vm0, %v3192_v55, 0.0 }
 0x8b5   :  { %v3835_v22 = vsel %vm90_vm0, %v3829_v51, %v3830_v31  ;;  %v3206_v51 = vsel %vm90_vm0, %v3187_v60, 0.0 }
 0x8b6   :  { %v7117_v24 = vpop.permute.xlu1 %3388  ;;  %v3836_v36 = vsel %vm3831_vm1, %v3835_v22, %v3827_v21  ;;  %v3207_v6 = vadd.f32 %v3206_v51, %v3205_v42  ;;  %vm3766_vm1 = vcmask 842752  }
 0x8b7   :  { %v3842_v63 = vmul.f32 %v3836_v36, %v7122_v23 }
 0x8b8   :  { %3452 = vrot.lane.b32.xlu0 %v3446_v41, %s5040_s15  ;;  %3937 = vrot.lane.b32.xlu1 %v3931_v49, %s5030_s5  ;;  %v3209_v0 = vadd.f32 %v3208_v40, %v3207_v6 }
 0x8ba   :  { %v7134_v3 = vpop.permute.xlu1 %3871  ;;  %v3211_v20 = vadd.f32 %v3210_v4, %v3209_v0 }
 0x8bb   :  { %v3876_v22 = vrot.slane %v7134_v3, 6 }
 0x8bc   :  { %3806 = vrot.lane.b32.xlu0 %v3798_v17, %s5033_s7  ;;  %3850 = vrot.lane.b32.xlu1 %v3842_v63, %s5039_s14  ;;  %v3213_v14 = vadd.f32 %v3212_v30, %v3211_v20  ;;  %v3339_v63 = vld [vmem:[#allocation2 + $0x36] sm:$0x3f]  ;;  %s5063_s7 = smov 32   ;;  %s4793_s14 = sld [smem:[#allocation4 + $0x1]] }
 0x8bd   :  { %v3880_v15 = vsel %vm90_vm0, %v3875_v33, %v3876_v22  ;;  %v3360_v34 = vmul.f32 %v7048_v29, %v3339_v63  ;;  %v8378_v29 = vld [vmem:[#allocation26_spill] sm:$0xff] }
 0x8be   :  { %v3433_v13 = vpop.permute.xlu1 %3432  ;;  %v3215_v27 = vadd.f32 %v3214_v19, %v3213_v14  ;;  %v3881_v42 = vsel %vm3878_vm14, %v3880_v15, %v7134_v3 }
 0x8bf   :  { %v3436_v45 = vrot.slane %v3433_v13, 6  ;;  %v3888_v48 = vmul.f32 %v3881_v42, %v6854_v18 }
 0x8c0   :  { %v3217_v7 = vadd.f32 %v3216_v8, %v3215_v27 }
 0x8c1   :  { %v3441_v53 = vsel %vm90_vm0, %v3435_v10, %v3436_v45  ;;  %v3193_v10 = vsel %vm3185_vm15, %v7002_v37, %v6965_v25  ;;  %vm3239_vm15 = vcmask 449536  }
 0x8c2   :  { %v7147_v62 = vsel %vm3437_vm13, %v3441_v53, %v3433_v13  ;;  %v3218_v21 = vsel %vm90_vm0, %v3193_v10, 0.0  ;;  %v7170_v37 = vpop.permute.xlu1 %3915  ;;  %vm3966_vm13 = vcmask 138240   ;;  %v3392_v13 = vrot.slane %v7117_v24, 6  ;;  %v3472_v53 = vld [vmem:[#allocation2 + $0x28] sm:$0xff] }
 0x8c3   :  { %v3219_v43 = vadd.f32 %v3218_v21, %v3217_v7  ;;  %v7224_v21 = vld [vmem:[#allocation2 + $0x30] sm:$0xff] }
 0x8c4   :  { %v3397_v14 = vsel %vm90_vm0, %v3391_v52, %v3392_v13 }
 0x8c5   :  { %v3221_v31 = vadd.f32 %v3220_v46, %v3219_v43  ;;  %v3398_v8 = vsel %vm3393_vm6, %v3397_v14, %v7117_v24 }
 0x8c6   :  { %v7181_v49 = vpop.permute.xlu1 %3477  ;;  %v3404_v43 = vmul.f32 %v3398_v8, %v3339_v63 }
 0x8c7   :  { %v3223_v9 = vadd.f32 %v3222_v38, %v3221_v31  ;;  %v3482_v4 = vrot.slane %v7181_v49, 6 }
 0x8ca   :  { %v7194_v33 = vpop.permute.xlu1 %3959 }
 0x8ce   :  { %v7203_v20 = vpop.permute.xlu1 %3520 }
 0x8cf   :  { %v3525_v8 = vrot.slane %v7203_v20, 6 }
 0x8d2   :  { %v7221_v52 = vpop.permute.xlu1 %4087 }
 0x8d3   :  { %v4093_v46 = vrot.slane %v7221_v52, 6 }
 0x8d5   :  { %v4096_v15 = vsel %vm3304_vm9, %v4093_v46, %v7221_v52 }
 0x8d8   :  { %v7168_v58 = vpop.xlane.xlu0 %2698 }
 0x8d9   :  { %8377 = vst [vmem:[#allocation42_spill] sm:$0xff] %v7168_v58  ;;  %v4890_v58 = vld [vmem:[#allocation2 + $0x26] sm:$0xff] }
 0x8db   :  { %3224 = vadd.xlane.f32.xlu0 %v3223_v9  ;;  %v3920_v9 = vrot.slane %v7170_v37, 6 }
 0x8dc   :  { %v3476_v60 = vpop.permute.xlu0 %3475 }
 0x8dd   :  { %v3481_v6 = vrot.slane %v3476_v60, 6  ;;  %v3924_v42 = vsel %vm90_vm0, %v3919_v12, %v3920_v9 }
 0x8de   :  { %v3925_v50 = vsel %vm3922_vm3, %v3924_v42, %v7170_v37  ;;  %v3868_v42 = vld [vmem:[#allocation2 + $0x4a] sm:$0xf] }
 0x8df   :  { %v3484_v30 = vsel %vm2714_vm4, %v3481_v6, %v3476_v60  ;;  %v3485_v55 = vsel %vm90_vm0, %v3481_v6, %v3482_v4  ;;  %v8379_v6 = vld [vmem:[#allocation34_spill] sm:$0xff] }
 0x8e0   :  { %v7173_v41 = vpop.permute.xlu0 %3957  ;;  %v3492_v27 = vmul.f32 %v3484_v30, %v3472_v53  ;;  %v3486_v61 = vsel %vm2714_vm4, %v3485_v55, %v7181_v49  ;;  %v3964_v30 = vrot.slane %v7194_v33, 6  ;;  %v3474_v49 = vld [vmem:[#allocation2 + $0x38] sm:$0xf] }
 0x8e1   :  { %v3963_v25 = vrot.slane %v7173_v41, 6  ;;  %v3493_v38 = vmul.f32 %v3486_v61, %v7224_v21 }
 0x8e3   :  { %v3967_v56 = vsel %vm3966_vm13, %v3963_v25, %v7173_v41 }
 0x8e4   :  { %v3975_v44 = vmul.f32 %v3967_v56, %v6848_v11  ;;  %v7188_v36 = vpop.permute.xlu0 %3518  ;;  %v7243_v56 = vpop.permute.xlu1 %3873 }
 0x8e5   :  { %v3524_v10 = vrot.slane %v7188_v36, 6 }
 0x8e6   :  { %3981 = vrot.lane.b32.xlu1 %v3975_v44, %s5040_s15 }
 0x8e7   :  { %v3527_v24 = vsel %vm2735_vm10, %v3524_v10, %v7188_v36 }
 0x8e8   :  { %v4002_v51 = vpop.permute.xlu0 %4001  ;;  %v3535_v44 = vmul.f32 %v3527_v24, %v3472_v53  ;;  %v3918_v12 = vpop.permute.xlu1 %3917 }
 0x8e9   :  { %v4007_v40 = vrot.slane %v4002_v51, 6 }
 0x8ea   :  { %3895 = vrot.lane.b32.xlu1 %v3888_v48, %s5031_s30  ;;  %v4104_v48 = vmul.f32 %v4096_v15, %v6848_v11 }
 0x8eb   :  { %v4010_v17 = vsel %vm3239_vm15, %v4007_v40, %v4002_v51 }
 0x8ec   :  { %v4018_v57 = vmul.f32 %v4010_v17, %v6848_v11  ;;  %v3562_v0 = vpop.permute.xlu0 %3561  ;;  %v3480_v55 = vpop.permute.xlu1 %3479 }
 0x8ed   :  { %v3567_v45 = vrot.slane %v3562_v0, 6 }
 0x8ee   :  { %4024 = vrot.lane.b32.xlu1 %v4018_v57, %s5041_s16  ;;  %v3448_v57 = vmul.f32 %v7147_v62, %v3339_v63  ;;  %v3932_v62 = vmul.f32 %v3925_v50, %v6854_v18  ;;  %v3877_v50 = vrot.slane %v7243_v56, 6 }
 0x8ef   :  { %v3570_v19 = vsel %vm2779_vm11, %v3567_v45, %v3562_v0 }
 0x8f0   :  { %v4045_v32 = vpop.permute.xlu0 %4044  ;;  %v3578_v2 = vmul.f32 %v3570_v19, %v3472_v53  ;;  %v3921_v19 = vrot.slane %v3918_v12, 6  ;;  %v3523_v41 = vpop.permute.xlu1 %3522 }
 0x8f1   :  { %3368 = vrot.lane.b32.xlu0 %v3360_v34, %s5031_s30  ;;  %v4050_v0 = vrot.slane %v4045_v32, 6 }
 0x8f2   :  { %3761 = vrot.lane.b32.xlu1 %v8378_v29, %s5060_s19 }
 0x8f3   :  { %v4053_v37 = vsel %vm3260_vm8, %v4050_v0, %v4045_v32 }
 0x8f4   :  { %v7219_v7 = vpop.permute.xlu0 %4003  ;;  %v4061_v29 = vmul.f32 %v4053_v37, %v6848_v11  ;;  %v3483_v11 = vrot.slane %v3480_v55, 6 }
 0x8f5   :  { %3498 = vrot.lane.b32.xlu0 %v3492_v27, %s5041_s16  ;;  %v4008_v60 = vrot.slane %v7219_v7, 6 }
 0x8f6   :  { %3584 = vrot.lane.b32.xlu1 %v3578_v2, %s5043_s18  ;;  %v3968_v2 = vsel %vm90_vm0, %v3963_v25, %v3964_v30  ;;  %v3528_v25 = vsel %vm90_vm0, %v3524_v10, %v3525_v8 }
 0x8f7   :  { %v4011_v51 = vsel %vm90_vm0, %v4007_v40, %v4008_v60  ;;  %v3969_v24 = vsel %vm3966_vm13, %v3968_v2, %v7194_v33  ;;  %v3526_v2 = vrot.slane %v3523_v41, 6 }
 0x8f8   :  { %v7232_v31 = vpop.permute.xlu0 %3563  ;;  %v4012_v13 = vsel %vm3239_vm15, %v4011_v51, %v7219_v7 }
 0x8f9   :  { %3412 = vrot.lane.b32.xlu0 %v3404_v43, %s5030_s5  ;;  %v3568_v17 = vrot.slane %v7232_v31, 6  ;;  %v4019_v63 = vmul.f32 %v4012_v13, %v6854_v18  ;;  %v3926_v43 = vsel %vm90_vm0, %v3920_v9, %v3921_v19  ;;  %v3487_v9 = vsel %vm90_vm0, %v3482_v4, %v3483_v11  ;;  %v3566_v4 = vpop.permute.xlu1 %3565 }
 0x8fa   :  { %3500 = vrot.lane.b32.xlu1 %v3493_v38, %s5041_s16  ;;  %v3927_v15 = vsel %vm3922_vm3, %v3926_v43, %v3918_v12  ;;  %v3488_v10 = vsel %vm2714_vm4, %v3487_v9, %v3480_v55  ;;  %v3530_v33 = vsel %vm90_vm0, %v3525_v8, %v3526_v2  ;;  %vm8392_vm4 = vcmask 1045504  }
 0x8fb   :  { %v3571_v40 = vsel %vm90_vm0, %v3567_v45, %v3568_v17  ;;  %v3933_v51 = vmul.f32 %v3927_v15, %v3868_v42  ;;  %vm8395_vm7 = vmmov %vm8392_vm4 }
 0x8fc   :  { %v7245_v36 = vpop.permute.xlu0 %4046  ;;  %v3572_v14 = vsel %vm2779_vm11, %v3571_v40, %v7232_v31  ;;  %v3494_v40 = vmul.f32 %v3488_v10, %v3474_v49  ;;  %v8384_v31 = vld [vmem:[#allocation84_spill] sm:$0xff] }
 0x8fd   :  { %3541 = vrot.lane.b32.xlu0 %v3535_v44, %s5042_s17  ;;  %v4051_v53 = vrot.slane %v7245_v36, 6  ;;  %v3579_v32 = vmul.f32 %v3572_v14, %v7224_v21  ;;  %v4092_v19 = vpop.permute.xlu1 %4091 }
 0x8fe   :  { %3606 = vrot.lane.b32.xlu1 %v8379_v6, %s5054_s29  ;;  %v4095_v3 = vrot.slane %v4092_v19, 6 }
 0x8ff   :  { %v4054_v45 = vsel %vm90_vm0, %v4050_v0, %v4051_v53 }
 0x900   :  { %v7263_v34 = vpop.permute.xlu0 %4089  ;;  %v4055_v61 = vsel %vm3260_vm8, %v4054_v45, %v7245_v36  ;;  %v8380_v36 = vld [vmem:[#allocation36_spill] sm:$0xff] }
 0x901   :  { %3456 = vrot.lane.b32.xlu0 %v3448_v57, %s5040_s15  ;;  %v4062_v38 = vmul.f32 %v4055_v61, %v6854_v18  ;;  %v3529_v57 = vsel %vm2735_vm10, %v3528_v25, %v7203_v20  ;;  %v7349_v43 = vpop.permute.xlu1 %3319  ;;  %v3531_v25 = vsel %vm2735_vm10, %v3530_v33, %v3523_v41  ;;  %v8382_v20 = vld [vmem:[#allocation82_spill] sm:$0xff]  ;;  %vm8386_vm10 = vcmask 1031168  }
 0x902   :  { %4110 = vrot.lane.b32.xlu1 %v4104_v48, %s5043_s18  ;;  %v3976_v48 = vmul.f32 %v3969_v24, %v6854_v18  ;;  %v3536_v13 = vmul.f32 %v3529_v57, %v7224_v21  ;;  %v4094_v21 = vrot.slane %v7263_v34, 6  ;;  %v3537_v8 = vmul.f32 %v3531_v25, %v3474_v49 }
 0x904   :  { %v7281_v27 = vpop.permute.xlu0 %3961 }
 0x905   :  { %3939 = vrot.lane.b32.xlu0 %v3932_v62, %s5030_s5  ;;  %v3882_v62 = vsel %vm90_vm0, %v3876_v22, %v3877_v50  ;;  %v3965_v55 = vrot.slane %v7281_v27, 6 }
 0x906   :  { %4026 = vrot.lane.b32.xlu1 %v4019_v63, %s5041_s16  ;;  %v3883_v14 = vsel %vm3878_vm14, %v3882_v62, %v7243_v56  ;;  %v4097_v56 = vsel %vm90_vm0, %v4093_v46, %v4094_v21  ;;  %v8381_v46 = vld [vmem:[#allocation35_spill] sm:$0xff]  ;;  %vm8388_vm14 = vcmask 711680  }
 0x907   :  { %v3889_v7 = vmul.f32 %v3883_v14, %v3868_v42  ;;  %v3970_v52 = vsel %vm90_vm0, %v3964_v30, %v3965_v55  ;;  %v3569_v30 = vrot.slane %v3566_v4, 6 }
 0x908   :  { %v4006_v44 = vpop.permute.xlu0 %4005 }
 0x909   :  { %4067 = vrot.lane.b32.xlu0 %v4061_v29, %s5042_s17  ;;  %v4009_v0 = vrot.slane %v4006_v44, 6 }
 0x90a   :  { %3586 = vrot.lane.b32.xlu1 %v3579_v32, %s5043_s18  ;;  %v4099_v32 = vsel %vm90_vm0, %v4094_v21, %v4095_v3  ;;  %v3237_v3 = vrot.slane %v6796_v5, 6 }
 0x90b   :  { %v4013_v37 = vsel %vm90_vm0, %v4008_v60, %v4009_v0  ;;  %v4100_v61 = vsel %vm3304_vm9, %v4099_v32, %v4092_v19 }
 0x90c   :  { %v4049_v12 = vpop.permute.xlu0 %4048  ;;  %v4014_v45 = vsel %vm3239_vm15, %v4013_v37, %v4006_v44  ;;  %v4106_v24 = vmul.f32 %v4100_v61, %v3868_v42 }
 0x90d   :  { %3604 = vrot.lane.b32.xlu0 %v8380_v36, %s5054_s29  ;;  %v4052_v63 = vrot.slane %v4049_v12, 6  ;;  %v4020_v60 = vmul.f32 %v4014_v45, %v3868_v42  ;;  %v3238_v45 = vrot.slane %v6805_v47, 6 }
 0x90e   :  { %4069 = vrot.lane.b32.xlu1 %v4062_v38, %s5042_s17  ;;  %v7359_v38 = vpop.permute.xlu1 %3802 }
 0x90f   :  { %v4056_v22 = vsel %vm90_vm0, %v4051_v53, %v4052_v63  ;;  %v4098_v53 = vsel %vm3304_vm9, %v4097_v56, %v7263_v34  ;;  %v3971_v34 = vsel %vm3966_vm13, %v3970_v52, %v7281_v27  ;;  %v3283_v56 = vrot.slane %v6963_v35, 2  ;;  %vm8394_vm9 = vmmov %vm8392_vm4 }
 0x910   :  { %v4057_v29 = vsel %vm3260_vm8, %v4056_v22, %v4049_v12  ;;  %v4105_v11 = vmul.f32 %v4098_v53, %v6854_v18  ;;  %v3977_v15 = vmul.f32 %v3971_v34, %v3868_v42  ;;  %v3573_v18 = vsel %vm90_vm0, %v3568_v17, %v3569_v30  ;;  %v7380_v17 = vpop.permute.xlu0 %3757  ;;  %vm8393_vm8 = vmmov %vm8392_vm4 }
 0x911   :  { %3983 = vrot.lane.b32.xlu0 %v3976_v48, %s5040_s15  ;;  %v3574_v44 = vsel %vm2779_vm11, %v3573_v18, %v3566_v4  ;;  %vm8387_vm11 = vcmask 719872   ;;  %vm8396_vm13 = vmmov %vm8392_vm4 }
 0x912   :  { %3941 = vrot.lane.b32.xlu1 %v3933_v51, %s5030_s5  ;;  %v7367_v27 = vpop.permute.xlu1 %3364  ;;  %v3580_v41 = vmul.f32 %v3574_v44, %v3474_v49  ;;  %s5061_s5 = smov 73  }
 0x914   :  { %v7388_v48 = vpop.permute.xlu0 %3321 }
 0x915   :  { %3543 = vrot.lane.b32.xlu0 %v3536_v13, %s5042_s17 }
 0x916   :  { %3502 = vrot.lane.b32.xlu1 %v3494_v40, %s5041_s16  ;;  %v7375_v9 = vpop.permute.xlu1 %3846 }
 0x918   :  { %v7394_v57 = vpop.permute.xlu0 %3804 }
 0x919   :  { %4130 = vrot.lane.b32.xlu0 %v8380_v36, %s5057_s11  ;;  %v8383_v36 = vld [vmem:[#allocation83_spill] sm:$0xff] }
 0x91a   :  { %4132 = vrot.lane.b32.xlu1 %v8379_v6, %s5057_s11  ;;  %v4063_v6 = vmul.f32 %v4057_v29, %v3868_v42  ;;  %v7384_v42 = vpop.permute.xlu1 %3408 }
 0x91c   :  { %v7400_v10 = vpop.permute.xlu0 %3366 }
 0x91d   :  { %3897 = vrot.lane.b32.xlu0 %v3889_v7, %s5031_s30  ;;  %s5062_s30 = smov 25  }
 0x91e   :  { %4028 = vrot.lane.b32.xlu1 %v4020_v60, %s5041_s16  ;;  %v7390_v51 = vpop.permute.xlu1 %3759  ;;  %v3243_v60 = vsel %vm90_vm0, %v3237_v3, %v3238_v45  ;;  %v3809_v45 = vrot.slane %v7394_v57, 2 }
 0x91f   :  { %v3244_v32 = vsel %vm3239_vm15, %v3243_v60, %v6805_v47 }
 0x920   :  { %v7404_v49 = vpop.permute.xlu0 %3848  ;;  %v3250_v52 = vmul.f32 %v3244_v32, %v6828_v39 }
 0x921   :  { %3608 = vrot.lane.b32.xlu0 %v8381_v46, %s5054_s29 }
 0x922   :  { %4071 = vrot.lane.b32.xlu1 %v4063_v6, %s5042_s17  ;;  %v7398_v50 = vpop.permute.xlu1 %3323  ;;  %v3288_v6 = vsel %vm456_vm5, %v6963_v35, %v3283_v56 }
 0x923   :  { %v8178_v53 = vrot.slane %v7398_v50, 2  ;;  %v3294_v34 = vadd.f32 %v3288_v6, %v3250_v52  ;;  %v3281_v6 = vrot.slane %v6955_v1, 2  ;;  %v3763_v52 = vrot.slane %v7380_v17, 6 }
 0x924   :  { %v7408_v12 = vpop.permute.xlu0 %3410 }
 0x925   :  { %4112 = vrot.lane.b32.xlu0 %v4105_v11, %s5043_s18  ;;  %v3332_v11 = vsel %vm8386_vm10, %v7398_v50, %v8178_v53 }
 0x926   :  { %4114 = vrot.lane.b32.xlu1 %v4106_v24, %s5043_s18  ;;  %v7402_v0 = vpop.permute.xlu1 %3454  ;;  %v3338_v35 = vadd.f32 %v3332_v11, %v3294_v34 }
 0x928   :  { %v7412_v40 = vpop.permute.xlu0 %3893 }
 0x929   :  { %3985 = vrot.lane.b32.xlu0 %v3977_v15, %s5040_s15  ;;  %s5065_s15 = smov [#allocation14]  }
 0x92a   :  { %4153 = vrot.lane.b32.xlu1 %v8382_v20, %s5060_s19  ;;  %v7406_v4 = vpop.permute.xlu1 %3937  ;;  %s4781_s16 = sshll.u32 %s5065_s15, 4  ;;  %s4782_s16 = int_to_ptr.vmem [resolvable:$true] %s4781_s16 }
 0x92b   :  { %p4995_p8 = scmp.lt.s32.totalorder %s4782_s16, %s4782_s16 }
 0x92c   :  { %v7418_v63 = vpop.permute.xlu0 %3452 }
 0x92d   :  { %3545 = vrot.lane.b32.xlu0 %v3537_v8, %s5042_s17  ;;  %s4990_s17 = scalar_lea.vmem %s4782_s16, 320 }
 0x92e   :  { %4155 = vrot.lane.b32.xlu1 %v8383_v36, %s5060_s19  ;;  %v7410_v13 = vpop.permute.xlu1 %3850  ;;  %p4991_p7 = scmp.ne.s32.totalorder %s4782_s16, %s4990_s17  ;;  %p4996_p9 = scmp.lt.s32.totalorder %s4990_s17, %s4990_s17 }
 0x930   :  { %v7422_v19 = vpop.permute.xlu0 %3806  ;;  %p4997_p10 = por %p4996_p9, %p4995_p8 }
 0x931   :  { %3588 = vrot.lane.b32.xlu0 %v3580_v41, %s5043_s18  ;;  %v3236_v41 = vrot.slane %v6782_v16, 6 }
 0x932   :  { %4157 = vrot.lane.b32.xlu1 %v8384_v31, %s5060_s19  ;;  %p4998_p11 = pnand %p4997_p10, %p4991_p7 }
 0x933   :  { %v3240_v32 = vsel %vm3239_vm15, %v3236_v41, %v6782_v16  ;;  %v3241_v34 = vsel %vm90_vm0, %v3236_v41, %v3237_v3  ;;  %v3767_v41 = vsel %vm3766_vm1, %v3763_v52, %v7380_v17  ;;  %v3810_v17 = vrot.slane %v7422_v19, 2 }
 0x934   :  { %v3242_v3 = vsel %vm3239_vm15, %v3241_v34, %v6796_v5  ;;  %v3775_v34 = vmul.f32 %v3767_v41, %v7020_v28  ;;  %v3414_v28 = vrot.slane %v7384_v42, 2  ;;  %v8398_v41 = vrot.slane %v7400_v10, 2 }
 0x935   :  { %3627 = vrot.lane.b32.xlu0 %v8382_v20, %s5048_s22 }
 0x939   :  { %4134 = vrot.lane.b32.xlu0 %v8381_v46, %s5057_s11 }
 0x93d   :  { %3629 = vrot.lane.b32.xlu0 %v8383_v36, %s5048_s22 }
 0x941   :  { %3631 = vrot.lane.b32.xlu0 %v8384_v31, %s5048_s22  ;;  %v3282_v31 = vrot.slane %v6957_v59, 2 }
 0x958   :  { %v7414_v62 = vpop.permute.xlu1 %3981 }
 0x95c   :  { %v7416_v37 = vpop.permute.xlu1 %3895 }
 0x960   :  { %v7420_v14 = vpop.permute.xlu1 %4024 }
 0x964   :  { %v7424_v21 = vpop.permute.xlu1 %3761 }
 0x968   :  { %v7428_v22 = vpop.permute.xlu1 %3584  ;;  %v7430_v7 = vpop.xlane.xlu0 %3224 }
 0x969   :  { %8385 = vst [vmem:[#allocation37_spill] sm:$0xff] %v7430_v7  ;;  %v3248_v7 = vmul.f32 %v4890_v58, %v3240_v32 }
 0x96c   :  { %v7434_v55 = vpop.permute.xlu1 %3500  ;;  %v7436_v29 = vpop.permute.xlu0 %3368 }
 0x96d   :  { %v8177_v2 = vrot.slane %v7436_v29, 2 }
 0x96f   :  { %v3377_v47 = vsel %vm8387_vm11, %v7436_v29, %v8177_v2  ;;  %vm8399_vm11 = vmmov %vm8392_vm4 }
 0x970   :  { %v7445_v46 = vpop.permute.xlu1 %3606  ;;  %v7447_v61 = vpop.permute.xlu0 %3498  ;;  %v3383_v30 = vadd.f32 %v3377_v47, %v3338_v35  ;;  %v3808_v47 = vrot.slane %v7359_v38, 2  ;;  %v3326_v35 = vrot.slane %v7388_v48, 2 }
 0x972   :  { %v3811_v16 = vsel %vm8393_vm8, %v3808_v47, %v3809_v45  ;;  %vm8402_vm8 = vmmov %vm8392_vm4 }
 0x973   :  { %v3812_v5 = vsel %vm456_vm5, %v7359_v38, %v3811_v16 }
 0x974   :  { %v7457_v24 = vpop.permute.xlu1 %4110  ;;  %v7459_v33 = vpop.permute.xlu0 %3412 }
 0x975   :  { %v8176_v39 = vrot.slane %v7459_v33, 2 }
 0x977   :  { %v3421_v15 = vsel %vm8388_vm14, %v7459_v33, %v8176_v39  ;;  %v3325_v39 = vrot.slane %v7349_v43, 2  ;;  %vm8400_vm14 = vmmov %vm8386_vm10 }
 0x978   :  { %v7466_v25 = vadd.f32 %v3421_v15, %v3383_v30  ;;  %v7468_v18 = vpop.permute.xlu0 %3541  ;;  %v7470_v20 = vpop.permute.xlu1 %4026  ;;  %v3284_v30 = vsel %vm8392_vm4, %v3281_v6, %v3282_v31  ;;  %v3853_v15 = vrot.slane %v7404_v49, 2  ;;  %v3852_v6 = vrot.slane %v7375_v9, 2 }
 0x979   :  { %v3285_v54 = vsel %vm456_vm5, %v6955_v1, %v3284_v30  ;;  %v3328_v47 = vsel %vm8395_vm7, %v3325_v39, %v3326_v35  ;;  %v8397_v1 = vrot.slane %v7390_v51, 6  ;;  %vm8405_vm7 = vcmask 719872  }
 0x97a   :  { %8389 = vst [vmem:[#allocation39_spill] sm:$0xff] %v7466_v25  ;;  %v3286_v25 = vsel %vm8394_vm9, %v3282_v31, %v3283_v56  ;;  %v3855_v58 = vsel %vm8396_vm13, %v3852_v6, %v3853_v15  ;;  %v3899_v31 = vrot.slane %v7412_v40, 6  ;;  %v4891_v6 = vld [vmem:[#allocation2 + $0x2e] sm:$0xff]  ;;  %v3329_v16 = vsel %vm8386_vm10, %v7349_v43, %v3328_v47  ;;  %vm8404_vm9 = vmmov %vm8392_vm4 }
 0x97b   :  { %v3768_v56 = vsel %vm90_vm0, %v3763_v52, %v8397_v1  ;;  %v3249_v2 = vmul.f32 %v4891_v6, %v3242_v3  ;;  %v3287_v38 = vsel %vm456_vm5, %v6957_v59, %v3286_v25  ;;  %v3819_v1 = vadd.f32 %v3812_v5, %v3775_v34  ;;  %vm8406_vm13 = vmmov %vm8405_vm7 }
 0x97c   :  { %v7472_v8 = vpop.permute.xlu0 %3456  ;;  %v7474_v44 = vpop.permute.xlu1 %3586  ;;  %v3856_v39 = vsel %vm8400_vm14, %v7375_v9, %v3855_v58  ;;  %v3769_v3 = vsel %vm3766_vm1, %v3768_v56, %v7390_v51  ;;  %v3813_v43 = vsel %vm8402_vm8, %v3809_v45, %v3810_v17  ;;  %v8403_v25 = vrot.slane %v7408_v12, 2  ;;  %vm8408_vm14 = vmmov %vm8392_vm4 }
 0x97d   :  { %8390 = vst [vmem:[#allocation40_spill] sm:$0xff] %v7474_v44  ;;  %v3292_v44 = vadd.f32 %v3285_v54, %v3248_v7  ;;  %v8401_v54 = vrot.slane %v7398_v50, 2  ;;  %v3458_v7 = vrot.slane %v7418_v63, 2  ;;  %v3902_v9 = vsel %vm8405_vm7, %v3899_v31, %v7412_v40 }
 0x97e   :  { %v3943_v47 = vrot.slane %v7406_v4, 6  ;;  %v3854_v58 = vrot.slane %v7410_v13, 2  ;;  %v3863_v5 = vadd.f32 %v3856_v39, %v3819_v1  ;;  %v3900_v56 = vrot.slane %v7416_v37, 6 }
 0x97f   :  { %v3330_v59 = vsel %vm8392_vm4, %v3326_v35, %v8401_v54  ;;  %v3459_v35 = vrot.slane %v7402_v0, 2  ;;  %v3336_v34 = vadd.f32 %v3329_v16, %v3292_v44  ;;  %v3776_v6 = vmul.f32 %v3769_v3, %v7034_v26 }
 0x980   :  { %v7476_v36 = vpop.permute.xlu0 %3939  ;;  %v7487_v11 = vpop.permute.xlu1 %4069  ;;  %v3987_v40 = vrot.slane %v7414_v62, 6  ;;  %v3331_v54 = vsel %vm8386_vm10, %v7388_v48, %v3330_v59  ;;  %v3765_v16 = vrot.slane %v7424_v21, 6  ;;  %v3903_v3 = vsel %vm90_vm0, %v3899_v31, %v3900_v56 }
 0x981   :  { %8391 = vst [vmem:[#allocation57_spill] sm:$0xff] %v7487_v11  ;;  %v3370_v11 = vrot.slane %v7367_v27, 2  ;;  %v3461_v39 = vsel %vm8408_vm14, %v3458_v7, %v3459_v35  ;;  %vm8418_vm14 = vmmov %vm8402_vm8 }
 0x983   :  { %v3373_v52 = vsel %vm8399_vm11, %v3370_v11, %v8398_v41  ;;  %v3417_v11 = vsel %vm8404_vm9, %v3414_v28, %v8403_v25  ;;  %v3814_v41 = vsel %vm456_vm5, %v7394_v57, %v3813_v43  ;;  %v3910_v25 = vadd.f32 %v3902_v9, %v3863_v5 }
 0x984   :  { %v7481_v60 = vpop.permute.xlu0 %4067  ;;  %v7514_v32 = vpop.permute.xlu1 %3941  ;;  %v3374_v28 = vsel %vm8406_vm13, %v7367_v27, %v3373_v52  ;;  %vm8407_vm11 = vcmask 711680   ;;  %v3857_v27 = vsel %vm8402_vm8, %v3853_v15, %v3854_v58  ;;  %v4030_v57 = vrot.slane %v7420_v14, 6  ;;  %vm8412_vm13 = vmmov %vm8386_vm10 }
 0x985   :  { %v3418_v44 = vsel %vm8407_vm11, %v7384_v42, %v3417_v11  ;;  %vm8409_vm4 = vmmov %vm8407_vm11  ;;  %v3293_v52 = vadd.f32 %v3287_v38, %v3249_v2  ;;  %v3381_v1 = vadd.f32 %v3374_v28, %v3336_v34  ;;  %v3820_v42 = vadd.f32 %v3814_v41, %v3776_v6 }
 0x986   :  { %v3946_v26 = vsel %vm8409_vm4, %v3943_v47, %v7406_v4  ;;  %vm8410_vm9 = vcmask 703488   ;;  %v3504_v15 = vrot.slane %v7447_v61, 6  ;;  %v3858_v2 = vsel %vm8412_vm13, %v7404_v49, %v3857_v27 }
 0x987   :  { %v3462_v59 = vsel %vm8410_vm9, %v7418_v63, %v3461_v39  ;;  %vm8411_vm7 = vmmov %vm8410_vm9  ;;  %v3337_v43 = vadd.f32 %v3331_v54, %v3293_v52  ;;  %v3954_v11 = vadd.f32 %v3946_v26, %v3910_v25  ;;  %v3425_v9 = vadd.f32 %v3418_v44, %v3381_v1 }
 0x988   :  { %v7497_v53 = vpop.permute.xlu0 %3604  ;;  %v7554_v45 = vpop.permute.xlu1 %3502  ;;  %v3990_v7 = vsel %vm8411_vm7, %v3987_v40, %v7414_v62  ;;  %vm8413_vm10 = vcmask 719872   ;;  %vm8414_vm11 = vcmask 392192   ;;  %v8415_v62 = vrot.slane %v7390_v51, 6 }
 0x989   :  { %v3904_v5 = vsel %vm8413_vm10, %v3903_v3, %v7416_v37  ;;  %v4033_v63 = vsel %vm8414_vm11, %v4030_v57, %v7420_v14  ;;  %v3547_v34 = vrot.slane %v7468_v18, 6  ;;  %v3469_v28 = vadd.f32 %v3462_v59, %v3425_v9  ;;  %vm8419_vm4 = vmmov %vm8414_vm11  ;;  %v8434_v14 = vld [vmem:[#allocation57_spill] sm:$0xff] }
 0x98a   :  { %v3770_v31 = vsel %vm90_vm0, %v8415_v62, %v3765_v16  ;;  %v3998_v49 = vadd.f32 %v3990_v7, %v3954_v11  ;;  %v3864_v41 = vadd.f32 %v3858_v2, %v3820_v42  ;;  %v4073_v54 = vrot.slane %v7481_v60, 6  ;;  %vm8423_vm7 = vmmov %vm8413_vm10 }
 0x98b   :  { %v8416_v25 = vrot.slane %v7436_v29, 2  ;;  %v8417_v44 = vrot.slane %v7400_v10, 2  ;;  %v3507_v51 = vsel %vm8419_vm4, %v3504_v15, %v7447_v61  ;;  %v3460_v26 = vrot.slane %v7472_v8, 2  ;;  %vm8425_vm10 = vmmov %vm8402_vm8 }
 0x98c   :  { %v7522_v30 = vpop.permute.xlu0 %3983  ;;  %v7588_v38 = vpop.permute.xlu1 %4132  ;;  %v3944_v27 = vrot.slane %v7476_v36, 6  ;;  %v3911_v16 = vadd.f32 %v3904_v5, %v3864_v41  ;;  %v4041_v52 = vadd.f32 %v4033_v63, %v3998_v49  ;;  %v3771_v1 = vsel %vm3766_vm1, %v3770_v31, %v7424_v21 }
 0x98d   :  { %v3375_v39 = vsel %vm8418_vm14, %v8417_v44, %v8416_v25  ;;  %v3610_v42 = vrot.slane %v7497_v53, 2  ;;  %v4116_v29 = vrot.slane %v7457_v24, 6  ;;  %v8420_v3 = vrot.slane %v7459_v33, 2  ;;  %vm8427_vm14 = vmmov %vm8402_vm8 }
 0x98e   :  { %v8421_v59 = vrot.slane %v7408_v12, 2  ;;  %vm8422_vm9 = vcmask 384000   ;;  %v3988_v11 = vrot.slane %v7522_v30, 6  ;;  %v3376_v21 = vsel %vm8423_vm7, %v7400_v10, %v3375_v39 }
 0x98f   :  { %v3550_v61 = vsel %vm8422_vm9, %v3547_v34, %v7468_v18  ;;  %v3611_v2 = vrot.slane %v7445_v46, 2  ;;  %v3515_v5 = vadd.f32 %v3507_v51, %v3469_v28  ;;  %vm8424_vm13 = vmmov %vm8422_vm9  ;;  %v3590_v62 = vrot.slane %v7428_v22, 6 }
 0x990   :  { %v7550_v50 = vpop.permute.xlu0 %3543  ;;  %v3419_v7 = vsel %vm8402_vm8, %v8421_v59, %v8420_v3  ;;  %v4076_v33 = vsel %vm8424_vm13, %v4073_v54, %v7481_v60  ;;  %v7633_v63 = vpop.permute.xlu1 %4028  ;;  %v3505_v18 = vrot.slane %v7434_v55, 6  ;;  %v3463_v31 = vsel %vm8425_vm10, %v3459_v35, %v3460_v26 }
 0x991   :  { %v3947_v10 = vsel %vm90_vm0, %v3943_v47, %v3944_v27  ;;  %vm8426_vm11 = vcmask 711680   ;;  %v3558_v49 = vadd.f32 %v3550_v61, %v3515_v5  ;;  %v3613_v41 = vsel %vm8427_vm14, %v3610_v42, %v3611_v2 }
 0x992   :  { %v3420_v28 = vsel %vm8426_vm11, %v7408_v12, %v3419_v7  ;;  %v3382_v44 = vadd.f32 %v3376_v21, %v3337_v43  ;;  %vm8428_vm4 = vcmask 375808   ;;  %v4084_v39 = vadd.f32 %v4076_v33, %v4041_v52  ;;  %vm8429_vm8 = vmmov %vm8426_vm11 }
 0x993   :  { %v4119_v35 = vsel %vm8428_vm4, %v4116_v29, %v7457_v24  ;;  %v3991_v4 = vsel %vm90_vm0, %v3987_v40, %v3988_v11  ;;  %v4031_v12 = vrot.slane %v7470_v20, 6  ;;  %v3948_v51 = vsel %vm8429_vm8, %v3947_v10, %v7476_v36  ;;  %vm8431_vm7 = vmmov %vm8428_vm4 }
 0x994   :  { %v7576_v48 = vpop.permute.xlu0 %4130  ;;  %vm8430_vm9 = vcmask 703488   ;;  %v3548_v42 = vrot.slane %v7550_v50, 6  ;;  %v3777_v3 = vmul.f32 %v3771_v1, %v7122_v23  ;;  %v3593_v52 = vsel %vm8431_vm7, %v3590_v62, %v7428_v22  ;;  %v8433_v22 = vld [vmem:[#allocation40_spill] sm:$0xff] }
 0x995   :  { %v4136_v25 = vrot.slane %v7576_v48, 6  ;;  %v3464_v43 = vsel %vm8430_vm9, %v7402_v0, %v3463_v31  ;;  %v3614_v40 = vsel %vm3393_vm6, %v7497_v53, %v3613_v41  ;;  %v3426_v59 = vadd.f32 %v3420_v28, %v3382_v44  ;;  %vm8432_vm13 = vmmov %vm8430_vm9  ;;  %v7676_v0 = vpop.permute.xlu1 %4071 }
 0x996   :  { %v3508_v7 = vsel %vm90_vm0, %v3504_v15, %v3505_v18  ;;  %v3601_v61 = vadd.f32 %v3593_v52, %v3558_v49  ;;  %v3992_v21 = vsel %vm8432_vm13, %v3991_v4, %v7522_v30  ;;  %v3591_v1 = vrot.slane %v8433_v22, 6  ;;  %vm8441_vm9 = vmmov %vm8431_vm7 }
 0x997   :  { %v4139_v23 = vsel %vm3922_vm3, %v4136_v25, %v7576_v48  ;;  %v3955_v5 = vadd.f32 %v3948_v51, %v3911_v16  ;;  %v3470_v53 = vadd.f32 %v3464_v43, %v3426_v59  ;;  %v4127_v33 = vadd.f32 %v4119_v35, %v4084_v39  ;;  %vm8443_vm13 = vmmov %vm8441_vm9 }
 0x998   :  { %v7600_v6 = vpop.permute.xlu0 %3897  ;;  %v4034_v15 = vsel %vm90_vm0, %v4030_v57, %v4031_v12  ;;  %v3621_v10 = vadd.f32 %v3614_v40, %v3601_v61  ;;  %v3551_v28 = vsel %vm90_vm0, %v3547_v34, %v3548_v42  ;;  %v3815_v16 = vsel %vm456_vm5, %v7422_v19, %v3810_v17 }
 0x999   :  { %v3901_v49 = vrot.slane %v7600_v6, 6  ;;  %v3999_v41 = vadd.f32 %v3992_v21, %v3955_v5  ;;  %v4147_v44 = vadd.f32 %v4139_v23, %v4127_v33  ;;  %v3821_v39 = vadd.f32 %v3815_v16, %v3777_v3  ;;  %v7714_v59 = vpop.permute.xlu1 %4114 }
 0x99a   :  { %v4074_v4 = vrot.slane %v8434_v14, 6  ;;  %vm8435_vm10 = vcmask 392192   ;;  %v3594_v43 = vsel %vm90_vm0, %v3590_v62, %v3591_v1  ;;  %vm8437_vm5 = vcmask 384000  }
 0x99b   :  { %v3509_v57 = vsel %vm8435_vm10, %v3508_v7, %v7434_v55  ;;  %vm8436_vm11 = vmmov %vm8435_vm10  ;;  %v3552_v17 = vsel %vm8437_vm5, %v3551_v28, %v7550_v50  ;;  %v3945_v3 = vrot.slane %v7514_v32, 6  ;;  %4862 = vtanh.f32 %v3621_v10 }
 0x99c   :  { %v7624_v9 = vpop.permute.xlu0 %3608  ;;  %v4035_v34 = vsel %vm8436_vm11, %v4034_v15, %v7470_v20  ;;  %v3516_v19 = vadd.f32 %v3509_v57, %v3470_v53  ;;  %v4077_v40 = vsel %vm90_vm0, %v4073_v54, %v4074_v4  ;;  %v3905_v62 = vsel %vm90_vm0, %v3900_v56, %v3901_v49  ;;  %vm8442_vm7 = vmmov %vm8437_vm5 }
 0x99d   :  { %v3612_v51 = vrot.slane %v7624_v9, 2  ;;  %v3506_v7 = vrot.slane %v7554_v45, 6  ;;  %v4042_v61 = vadd.f32 %v4035_v34, %v3999_v41  ;;  %4864 = vtanh.f32 %v4147_v44 }
 0x99e   :  { %vm8438_vm14 = vcmask 1031168   ;;  %v3559_v54 = vadd.f32 %v3552_v17, %v3516_v19  ;;  %vm8439_vm4 = vcmask 1045504   ;;  %vm8440_vm8 = vcmask 719872  }
 0x99f   :  { %v3859_v60 = vsel %vm8438_vm14, %v7410_v13, %v3854_v58  ;;  %v3615_v37 = vsel %vm8439_vm4, %v3611_v2, %v3612_v51  ;;  %v3906_v5 = vsel %vm8440_vm8, %v3905_v62, %v7600_v6  ;;  %v3949_v13 = vsel %vm90_vm0, %v3944_v27, %v3945_v3  ;;  %v7745_v2 = vpop.permute.xlu1 %4153  ;;  %vm8449_vm4 = vmmov %vm8442_vm7 }
 0x9a0   :  { %v7658_v47 = vpop.permute.xlu0 %4112  ;;  %v3865_v23 = vadd.f32 %v3859_v60, %v3821_v39  ;;  %v4078_v58 = vsel %vm8442_vm7, %v4077_v40, %v8434_v14  ;;  %v3510_v6 = vsel %vm90_vm0, %v3505_v18, %v3506_v7  ;;  %v4137_v33 = vrot.slane %v7588_v38, 6  ;;  %v8448_v7 = vld [vmem:[#allocation39_spill] sm:$0xff]  ;;  %vm8452_vm7 = vmmov %vm8449_vm4 }
 0x9a1   :  { %v4117_v35 = vrot.slane %v7658_v47, 6  ;;  %v3616_v15 = vsel %vm3393_vm6, %v7445_v46, %v3615_v37  ;;  %v4085_v36 = vadd.f32 %v4078_v58, %v4042_v61  ;;  %v4032_v16 = vrot.slane %v7633_v63, 6 }
 0x9a2   :  { %v3912_v27 = vadd.f32 %v3906_v5, %v3865_v23  ;;  %v4140_v55 = vsel %vm90_vm0, %v4136_v25, %v4137_v33  ;;  %v4159_v41 = vrot.slane %v7745_v2, 6  ;;  %vm8444_vm10 = vcmask 703488  }
 0x9a3   :  { %v4120_v21 = vsel %vm90_vm0, %v4116_v29, %v4117_v35  ;;  %v3595_v29 = vsel %vm8441_vm9, %v3594_v43, %v8433_v22  ;;  %v3465_v30 = vsel %vm8444_vm10, %v7472_v8, %v3460_v26  ;;  %vm8445_vm11 = vcmask 711680   ;;  %vm8447_vm14 = vmmov %vm8444_vm10  ;;  %v7798_v22 = vpop.permute.xlu1 %4155 }
 0x9a4   :  { %v3986_v31 = vpop.permute.xlu0 %3985  ;;  %v4121_v53 = vsel %vm8443_vm13, %v4120_v21, %v7658_v47  ;;  %v3602_v10 = vadd.f32 %v3595_v29, %v3559_v54  ;;  %v3950_v57 = vsel %vm8445_vm11, %v3949_v13, %v7514_v32  ;;  %vm8446_vm5 = vcmask 392192   ;;  %vm8453_vm13 = vmmov %vm8441_vm9 }
 0x9a5   :  { %v3989_v56 = vrot.slane %v3986_v31, 6  ;;  %v4128_v18 = vadd.f32 %v4121_v53, %v4085_v36  ;;  %v3511_v48 = vsel %vm8446_vm5, %v3510_v6, %v7554_v45  ;;  %v4075_v25 = vrot.slane %v7676_v0, 6  ;;  %v4863_v43 = vpop.eup %4862  ;;  %vm8451_vm8 = vmmov %vm8446_vm5 }
 0x9a6   :  { %v3622_v44 = vadd.f32 %v3616_v15, %v3602_v10  ;;  %v4141_v19 = vsel %vm3922_vm3, %v4140_v55, %v7588_v38  ;;  %v3956_v17 = vadd.f32 %v3950_v57, %v3912_v27  ;;  %v4036_v32 = vsel %vm90_vm0, %v4031_v12, %v4032_v16  ;;  %v8450_v12 = vld [vmem:[#allocation20_spill] sm:$0xff] }
 0x9a7   :  { %v3993_v28 = vsel %vm90_vm0, %v3988_v11, %v3989_v56  ;;  %v4865_v3 = vpop.eup %4864  ;;  %v4148_v45 = vadd.f32 %v4141_v19, %v4128_v18  ;;  %v3471_v61 = vadd.f32 %v3465_v30, %v8448_v7  ;;  %v4037_v37 = vsel %vm8451_vm8, %v4036_v32, %v7633_v63 }
 0x9a8   :  { %v3546_v52 = vpop.permute.xlu0 %3545  ;;  %v3994_v34 = vsel %vm8447_vm14, %v3993_v28, %v3986_v31  ;;  %v4162_v31 = vsel %vm3766_vm1, %v4159_v41, %v7745_v2  ;;  %4866 = vtanh.f32 %v3622_v44  ;;  %v4079_v56 = vsel %vm90_vm0, %v4074_v4, %v4075_v25  ;;  %v4158_v25 = vpop.permute.xlu1 %4157 }
 0x9a9   :  { %v3549_v49 = vrot.slane %v3546_v52, 6  ;;  %v4000_v50 = vadd.f32 %v3994_v34, %v3956_v17  ;;  %v3517_v54 = vadd.f32 %v3511_v48, %v3471_v61  ;;  %v4170_v23 = vmul.f32 %v4865_v3, %v4162_v31 }
 0x9aa   :  { %4868 = vtanh.f32 %v4148_v45  ;;  %v4118_v14 = vrot.slane %v7714_v59, 6  ;;  %v4080_v15 = vsel %vm8452_vm7, %v4079_v56, %v7676_v0  ;;  %v3617_v0 = vsel %vm3393_vm6, %v7624_v9, %v3612_v51 }
 0x9ab   :  { %v3553_v8 = vsel %vm90_vm0, %v3548_v42, %v3549_v49  ;;  %v4043_v13 = vadd.f32 %v4037_v37, %v4000_v50  ;;  %v4183_v36 = vrot.slane %v4170_v23, %v8450_v12  ;;  %v4176_v55 = vcombine.high %v4170_v23, %v4170_v23 }
 0x9ac   :  { %v3589_v24 = vpop.permute.xlu0 %3588  ;;  %v3554_v20 = vsel %vm8449_vm4, %v3553_v8, %v3546_v52  ;;  %v4122_v27 = vsel %vm90_vm0, %v4117_v35, %v4118_v14  ;;  %v4161_v8 = vrot.slane %v4158_v25, 6  ;;  %vm4248_vm6 = vcmask 203776  }
 0x9ad   :  { %v3592_v11 = vrot.slane %v3589_v24, 6  ;;  %v3560_v58 = vadd.f32 %v3554_v20, %v3517_v54  ;;  %v4086_v28 = vadd.f32 %v4080_v15, %v4043_v13  ;;  %v4191_v35 = vcombine.high %v4183_v36, %v4183_v36 }
 0x9ae   :  { %v4123_v38 = vsel %vm8453_vm13, %v4122_v27, %v7714_v59  ;;  %v4190_v44 = vrot.slane %v4176_v55, %v8450_v12 }
 0x9af   :  { %v3596_v42 = vsel %vm90_vm0, %v3591_v1, %v3592_v11  ;;  %v4129_v9 = vadd.f32 %v4123_v38, %v4086_v28 }
 0x9b0   :  { %v3628_v46 = vpop.permute.xlu0 %3627  ;;  %v3597_v5 = vsel %vm8441_vm9, %v3596_v42, %v3589_v24  ;;  %v4160_v24 = vrot.slane %v7798_v22, 6  ;;  %v4192_v48 = vcombine.high %v4190_v44, %v4190_v44 }
 0x9b1   :  { %v3633_v39 = vrot.slane %v3628_v46, 6  ;;  %v3603_v4 = vadd.f32 %v3597_v5, %v3560_v58 }
 0x9b2   :  { %v4867_v18 = vpop.eup %4866  ;;  %v4163_v47 = vsel %vm90_vm0, %v4159_v41, %v4160_v24 }
 0x9b3   :  { %v3636_v26 = vsel %vm3239_vm15, %v3633_v39, %v3628_v46  ;;  %v3623_v46 = vadd.f32 %v3617_v0, %v3603_v4  ;;  %v4164_v2 = vsel %vm3766_vm1, %v4163_v47, %v7798_v22 }
 0x9b4   :  { %v3644_v40 = vmul.f32 %v4863_v43, %v3636_v26  ;;  %v4135_v62 = vpop.permute.xlu0 %4134  ;;  %v4869_v51 = vpop.eup %4868 }
 0x9b5   :  { %v4138_v63 = vrot.slane %v4135_v62, 6  ;;  %4870 = vtanh.f32 %v3623_v46 }
 0x9b6   :  { %v3650_v21 = vcombine.high %v3644_v40, %v3644_v40  ;;  %v3657_v60 = vrot.slane %v3644_v40, %v8450_v12  ;;  %v4165_v40 = vsel %vm90_vm0, %v4160_v24, %v4161_v8 }
 0x9b7   :  { %v4142_v49 = vsel %vm90_vm0, %v4137_v33, %v4138_v63  ;;  %v4166_v50 = vsel %vm3766_vm1, %v4165_v40, %v4158_v25 }
 0x9b8   :  { %v3664_v1 = vrot.slane %v3650_v21, %v8450_v12  ;;  %v3665_v52 = vcombine.high %v3657_v60, %v3657_v60  ;;  %3692 = vrot.lane.b32.xlu0 %v3657_v60, %s5061_s5  ;;  %v3630_v29 = vpop.permute.xlu0 %3629  ;;  %v4143_v33 = vsel %vm3922_vm3, %v4142_v49, %v4135_v62  ;;  %vm3712_vm3 = vcmask 596992  }
 0x9b9   :  { %v3634_v53 = vrot.slane %v3630_v29, 6  ;;  %v4149_v41 = vadd.f32 %v4143_v33, %v4129_v9 }
 0x9ba   :  { %3694 = vrot.lane.b32.xlu1 %v3665_v52, %s5061_s5  ;;  %v3666_v10 = vcombine.high %v3664_v1, %v3664_v1 }
 0x9bb   :  { %v3637_v6 = vsel %vm90_vm0, %v3633_v39, %v3634_v53  ;;  %v4171_v39 = vmul.f32 %v4869_v51, %v4164_v2  ;;  %4872 = vtanh.f32 %v4149_v41 }
 0x9bc   :  { %3696 = vrot.lane.b32.xlu0 %v3664_v1, %s5061_s5  ;;  %v3638_v16 = vsel %vm3239_vm15, %v3637_v6, %v3630_v29  ;;  %v3632_v11 = vpop.permute.xlu0 %3631 }
 0x9bd   :  { %v3645_v30 = vmul.f32 %v4867_v18, %v3638_v16  ;;  %v3635_v57 = vrot.slane %v3632_v11, 6  ;;  %v4200_v19 = vrot.slane %v4171_v39, %v8450_v12  ;;  %v4193_v45 = vcombine.high %v4171_v39, %v4171_v39 }
 0x9be   :  { %3698 = vrot.lane.b32.xlu1 %v3666_v10, %s5061_s5 }
 0x9bf   :  { %v3674_v59 = vrot.slane %v3645_v30, %v8450_v12  ;;  %v3667_v34 = vcombine.high %v3645_v30, %v3645_v30  ;;  %v3639_v17 = vsel %vm90_vm0, %v3634_v53, %v3635_v57  ;;  %v4871_v3 = vpop.eup %4870  ;;  %v4208_v31 = vcombine.high %v4200_v19, %v4200_v19 }
 0x9c0   :  { %4226 = vrot.lane.b32.xlu0 %v4183_v36, %s5062_s30  ;;  %v3640_v32 = vsel %vm3239_vm15, %v3639_v17, %v3632_v11  ;;  %v4207_v42 = vrot.slane %v4193_v45, %v8450_v12  ;;  %vm4677_vm15 = vcmask 916480  }
 0x9c1   :  { %v3682_v43 = vcombine.high %v3674_v59, %v3674_v59  ;;  %v3681_v26 = vrot.slane %v3667_v34, %v8450_v12  ;;  %v3646_v62 = vmul.f32 %v4871_v3, %v3640_v32 }
 0x9c2   :  { %4228 = vrot.lane.b32.xlu1 %v4191_v35, %s5062_s30  ;;  %v4209_v60 = vcombine.high %v4207_v42, %v4207_v42 }
 0x9c3   :  { %v3683_v7 = vcombine.high %v3681_v26, %v3681_v26  ;;  %v3690_v20 = vrot.slane %v3646_v62, %v8450_v12 }
 0x9c4   :  { %4230 = vrot.lane.b32.xlu0 %v4190_v44, %s5062_s30 }
 0x9c5   :  { %v4873_v61 = vpop.eup %4872  ;;  %v3691_v54 = vcombine.high %v3690_v20, %v3690_v20 }
 0x9c6   :  { %3700 = vrot.lane.b32.xlu1 %v3674_v59, %s5061_s5  ;;  %v4172_v21 = vmul.f32 %v4873_v61, %v4166_v50 }
 0x9c8   :  { %4232 = vrot.lane.b32.xlu0 %v4192_v48, %s5062_s30  ;;  %v4217_v37 = vrot.slane %v4172_v21, %v8450_v12  ;;  %v4210_v56 = vcombine.high %v4172_v21, %v4172_v21 }
 0x9ca   :  { %3702 = vrot.lane.b32.xlu1 %v3682_v43, %s5061_s5  ;;  %v4225_v23 = vcombine.high %v4217_v37, %v4217_v37  ;;  %v4224_v5 = vrot.slane %v4210_v56, %v8450_v12 }
 0x9cc   :  { %4234 = vrot.lane.b32.xlu0 %v4200_v19, %s5062_s30 }
 0x9ce   :  { %3704 = vrot.lane.b32.xlu1 %v3681_v26, %s5061_s5 }
 0x9d0   :  { %4236 = vrot.lane.b32.xlu0 %v4208_v31, %s5062_s30 }
 0x9d2   :  { %3706 = vrot.lane.b32.xlu1 %v3683_v7, %s5061_s5 }
 0x9d4   :  { %4238 = vrot.lane.b32.xlu0 %v4207_v42, %s5062_s30 }
 0x9d6   :  { %3708 = vrot.lane.b32.xlu1 %v3690_v20, %s5061_s5 }
 0x9d8   :  { %4240 = vrot.lane.b32.xlu0 %v4209_v60, %s5062_s30 }
 0x9da   :  { %3710 = vrot.lane.b32.xlu1 %v3691_v54, %s5061_s5 }
 0x9dc   :  { %4242 = vrot.lane.b32.xlu0 %v4217_v37, %s5062_s30 }
 0x9de   :  { %4244 = vrot.lane.b32.xlu1 %v4225_v23, %s5062_s30 }
 0x9e0   :  { %4246 = vrot.lane.b32.xlu0 %v4224_v5, %s5062_s30 }
 0xa2a   :  { %v3693_v22 = vpop.permute.xlu0 %3692 }
 0xa2c   :  { %v3695_v1 = vpop.permute.xlu1 %3694 }
 0xa2d   :  { %v3713_v24 = vsel %vm3712_vm3, %v3693_v22, %v3695_v1 }
 0xa2e   :  { %v3697_v52 = vpop.permute.xlu0 %3696  ;;  %v3732_v10 = vsel %vm90_vm0, %v3713_v24, 0.0 }
 0xa2f   :  { %v3714_v14 = vsel %vm3712_vm3, %v3695_v1, %v3697_v52 }
 0xa30   :  { %v3699_v29 = vpop.permute.xlu1 %3698  ;;  %v3733_v6 = vsel %vm90_vm0, %v3714_v14, 0.0 }
 0xa31   :  { %v3715_v36 = vsel %vm3712_vm3, %v3697_v52, %v3699_v29  ;;  %v3734_v28 = vadd.f32 %v3733_v6, %v3732_v10 }
 0xa32   :  { %v4227_v13 = vpop.permute.xlu0 %4226  ;;  %v3735_v0 = vsel %vm90_vm0, %v3715_v36, 0.0 }
 0xa33   :  { %v3736_v30 = vadd.f32 %v3735_v0, %v3734_v28 }
 0xa34   :  { %v4229_v58 = vpop.permute.xlu1 %4228 }
 0xa35   :  { %v4249_v18 = vsel %vm4248_vm6, %v4227_v13, %v4229_v58 }
 0xa36   :  { %v4231_v63 = vpop.permute.xlu0 %4230  ;;  %v4269_v44 = vsel %vm90_vm0, %v4249_v18, 0.0 }
 0xa37   :  { %v4250_v49 = vsel %vm4248_vm6, %v4229_v58, %v4231_v63 }
 0xa38   :  { %v3701_v53 = vpop.permute.xlu1 %3700  ;;  %v4270_v35 = vsel %vm90_vm0, %v4250_v49, 0.0 }
 0xa39   :  { %v3716_v16 = vsel %vm3712_vm3, %v3699_v29, %v3701_v53  ;;  %v4271_v59 = vadd.f32 %v4270_v35, %v4269_v44 }
 0xa3a   :  { %v4233_v4 = vpop.permute.xlu0 %4232  ;;  %v3737_v38 = vsel %vm90_vm0, %v3716_v16, 0.0 }
 0xa3b   :  { %v4251_v46 = vsel %vm4248_vm6, %v4231_v63, %v4233_v4  ;;  %v3738_v39 = vadd.f32 %v3737_v38, %v3736_v30  ;;  %v4489_v30 = vld [vmem:[#allocation11 + $0x24] sm:$0xff] }
 0xa3c   :  { %v3703_v15 = vpop.permute.xlu1 %3702  ;;  %v4272_v2 = vsel %vm90_vm0, %v4251_v46, 0.0 }
 0xa3d   :  { %v3717_v47 = vsel %vm3712_vm3, %v3701_v53, %v3703_v15  ;;  %v4273_v19 = vadd.f32 %v4272_v2, %v4271_v59 }
 0xa3e   :  { %v4235_v27 = vpop.permute.xlu0 %4234  ;;  %v3739_v41 = vsel %vm90_vm0, %v3717_v47, 0.0 }
 0xa3f   :  { %v4252_v9 = vsel %vm4248_vm6, %v4233_v4, %v4235_v27  ;;  %v3740_v17 = vadd.f32 %v3739_v41, %v3738_v39 }
 0xa40   :  { %v3705_v55 = vpop.permute.xlu1 %3704  ;;  %v4274_v25 = vsel %vm90_vm0, %v4252_v9, 0.0  ;;  %v4502_v9 = vrot.slane %v4489_v30, %v8450_v12 }
 0xa41   :  { %v3718_v51 = vsel %vm3712_vm3, %v3703_v15, %v3705_v55  ;;  %v4275_v45 = vadd.f32 %v4274_v25, %v4273_v19 }
 0xa42   :  { %v4237_v33 = vpop.permute.xlu0 %4236  ;;  %v3741_v34 = vsel %vm90_vm0, %v3718_v51, 0.0  ;;  %v4495_v51 = vcombine.high %v4489_v30, %v4489_v30 }
 0xa43   :  { %v4253_v57 = vsel %vm4248_vm6, %v4235_v27, %v4237_v33  ;;  %v3742_v31 = vadd.f32 %v3741_v34, %v3740_v17  ;;  %v4380_v27 = vld [vmem:[#allocation11 + $0x12] sm:$0xff] }
 0xa44   :  { %v3707_v11 = vpop.permute.xlu1 %3706  ;;  %v4276_v26 = vsel %vm90_vm0, %v4253_v57, 0.0  ;;  %v4393_v28 = vrot.slane %v4380_v27, %v8450_v12  ;;  %v4386_v16 = vcombine.high %v4380_v27, %v4380_v27  ;;  %v4509_v2 = vrot.slane %v4495_v51, %v8450_v12  ;;  %v4491_v34 = vld [vmem:[#allocation11 + $0x34] sm:$0x3f] }
 0xa45   :  { %v3719_v48 = vsel %vm3712_vm3, %v3705_v55, %v3707_v11  ;;  %v4277_v50 = vadd.f32 %v4276_v26, %v4275_v45  ;;  %v4381_v55 = vld [vmem:[#allocation11 + $0x1a] sm:$0xff]  ;;  %v4510_v57 = vcombine.high %v4502_v9, %v4502_v9  ;;  %v4529_v19 = vcombine.high %v4491_v34, %v4491_v34 }
 0xa46   :  { %v4239_v43 = vpop.permute.xlu0 %4238  ;;  %v3743_v3 = vsel %vm90_vm0, %v3719_v48, 0.0  ;;  %v4401_v49 = vcombine.high %v4393_v28, %v4393_v28  ;;  %v4400_v0 = vrot.slane %v4386_v16, %v8450_v12  ;;  %v4410_v18 = vrot.slane %v4381_v55, %v8450_v12 }
 0xa47   :  { %v4254_v8 = vsel %vm4248_vm6, %v4237_v33, %v4239_v43  ;;  %v3744_v42 = vadd.f32 %v3743_v3, %v3742_v31  ;;  %v4403_v46 = vcombine.high %v4381_v55, %v4381_v55  ;;  %v4795_v33 = vld.sshfl [vmem:[#allocation11 + $0x22] sm:$0x33 pattern:$0x76325410]  ;;  %v4511_v25 = vcombine.high %v4509_v2, %v4509_v2 }
 0xa48   :  { %v3709_v32 = vpop.permute.xlu1 %3708  ;;  %v4278_v62 = vsel %vm90_vm0, %v4254_v8, 0.0  ;;  %v4402_v35 = vcombine.high %v4400_v0, %v4400_v0  ;;  %v4418_v38 = vcombine.high %v4410_v18, %v4410_v18  ;;  %v4427_v41 = vcombine.high %v4795_v33, %v4795_v33  ;;  %v4609_v8 = vld [vmem:[#allocation11 + $0x38] sm:$0xff] }
 0xa49   :  { %v3720_v40 = vsel %vm3712_vm3, %v3707_v11, %v3709_v32  ;;  %v4279_v54 = vadd.f32 %v4278_v62, %v4277_v50  ;;  %v4417_v47 = vrot.slane %v4403_v46, %v8450_v12  ;;  %v4490_v11 = vld [vmem:[#allocation11 + $0x2c] sm:$0xff]  ;;  %v4543_v26 = vrot.slane %v4529_v19, %v8450_v12 }
 0xa4a   :  { %v3745_v7 = vsel %vm90_vm0, %v3720_v40, 0.0  ;;  %v4241_v61 = vpop.permute.xlu0 %4240  ;;  %v4519_v59 = vrot.slane %v4490_v11, %v8450_v12  ;;  %v4512_v39 = vcombine.high %v4490_v11, %v4490_v11  ;;  %v4622_v3 = vrot.slane %v4609_v8, %v8450_v12 }
 0xa4b   :  { %v4255_v20 = vsel %vm4248_vm6, %v4239_v43, %v4241_v61  ;;  %v3746_v37 = vadd.f32 %v3745_v7, %v3744_v42  ;;  %v4419_v44 = vcombine.high %v4417_v47, %v4417_v47  ;;  %v4536_v43 = vrot.slane %v4491_v34, %v8450_v12  ;;  %v4610_v7 = vld [vmem:[#allocation11 + $0x40] sm:$0xff] }
 0xa4c   :  { %v4280_v21 = vsel %vm90_vm0, %v4255_v20, 0.0  ;;  %v3711_v60 = vpop.permute.xlu1 %3710  ;;  %v4526_v48 = vrot.slane %v4512_v39, %v8450_v12  ;;  %v4527_v17 = vcombine.high %v4519_v59, %v4519_v59  ;;  %v4630_v31 = vcombine.high %v4622_v3, %v4622_v3 }
 0xa4d   :  { %v3721_v56 = vsel %vm3712_vm3, %v3709_v32, %v3711_v60  ;;  %v4281_v22 = vadd.f32 %v4280_v21, %v4279_v54  ;;  %v3749_v29 = vsel %vm2695_vm12, %v3711_v60, 0.0  ;;  %v4615_v32 = vcombine.high %v4609_v8, %v4609_v8  ;;  %v4796_v54 = vld.sshfl [vmem:[#allocation11 + $0x48] sm:$0x33 pattern:$0x76325410] }
 0xa4e   :  { %v3747_v23 = vsel %vm90_vm0, %v3721_v56, 0.0  ;;  %v4243_v5 = vpop.permute.xlu0 %4242  ;;  %v4528_v45 = vcombine.high %v4526_v48, %v4526_v48  ;;  %v4544_v62 = vcombine.high %v4536_v43, %v4536_v43  ;;  %v4639_v50 = vrot.slane %v4610_v7, %v8450_v12 }
 0xa4f   :  { %v3748_v1 = vadd.f32 %v3747_v23, %v3746_v37  ;;  %v4256_v52 = vsel %vm4248_vm6, %v4241_v61, %v4243_v5  ;;  %v4629_v40 = vrot.slane %v4615_v32, %v8450_v12  ;;  %v4632_v42 = vcombine.high %v4610_v7, %v4610_v7  ;;  %v8454_v23 = vld [vmem:[#allocation37_spill] sm:$0xff] }
 0xa50   :  { %v4282_v13 = vsel %vm90_vm0, %v4256_v52, 0.0  ;;  %v4245_v58 = vpop.permute.xlu1 %4244  ;;  %v4647_v20 = vcombine.high %v4639_v50, %v4639_v50  ;;  %v4656_v37 = vcombine.high %v4796_v54, %v4796_v54  ;;  %v2700_v56 = vstv %s4793_s14 }
 0xa51   :  { %v3750_v63 = vadd.f32 %v3749_v29, %v3748_v1  ;;  %v4283_v53 = vadd.f32 %v4282_v13, %v4281_v22  ;;  %v4257_v14 = vsel %vm4248_vm6, %v4243_v5, %v4245_v58  ;;  %v4631_v61 = vcombine.high %v4629_v40, %v4629_v40  ;;  %v8455_v1 = vld [vmem:[#allocation42_spill] sm:$0xff] }
 0xa52   :  { %v4284_v4 = vsel %vm90_vm0, %v4257_v14, 0.0  ;;  %v4247_v24 = vpop.permute.xlu0 %4246  ;;  %v4646_v21 = vrot.slane %v4632_v42, %v8450_v12  ;;  %v3226_v5 = vadd.f32 %v8454_v23, %v2700_v56  ;;  %v2701_v52 = vadd.f32 %v2700_v56, %v8455_v1 }
 0xa53   :  { %v4285_v6 = vadd.f32 %v4284_v4, %v4283_v53  ;;  %v4258_v15 = vsel %vm4248_vm6, %v4245_v58, %v4247_v24  ;;  %3751 = vadd.xlane.f32.xlu1 %v3750_v63  ;;  %vm4448_vm0 = vcmask 654336  }
 0xa54   :  { %v4286_v36 = vsel %vm2695_vm12, %v4258_v15, 0.0  ;;  %v4648_v60 = vcombine.high %v4646_v21, %v4646_v21  ;;  %v4291_v13 = vmax.f32 %v2701_v52, %v3226_v5  ;;  %vm4567_vm12 = vcmask 261120  }
 0xa55   :  { %v4287_v10 = vadd.f32 %v4286_v36, %v4285_v6 }
 0xa57   :  { %4288 = vadd.xlane.f32.xlu0 %v4287_v10 }
 0xa64   :  { %4430 = vrot.lane.b32.xlu1 %v4401_v49, %s5025_s10 }
 0xa68   :  { %4432 = vrot.lane.b32.xlu1 %v4400_v0, %s5025_s10 }
 0xa6c   :  { %4436 = vrot.lane.b32.xlu1 %v4410_v18, %s5025_s10 }
 0xa6d   :  { %4428 = vrot.lane.b32.xlu0 %v4393_v28, %s5025_s10 }
 0xa70   :  { %4440 = vrot.lane.b32.xlu1 %v4417_v47, %s5025_s10 }
 0xa71   :  { %4434 = vrot.lane.b32.xlu0 %v4402_v35, %s5025_s10 }
 0xa74   :  { %4444 = vrot.lane.b32.xlu1 %v4795_v33, %s5025_s10 }
 0xa75   :  { %4438 = vrot.lane.b32.xlu0 %v4418_v38, %s5025_s10 }
 0xa78   :  { %4545 = vrot.lane.b32.xlu1 %v4502_v9, %s5063_s7 }
 0xa79   :  { %4442 = vrot.lane.b32.xlu0 %v4419_v44, %s5025_s10 }
 0xa7c   :  { %4549 = vrot.lane.b32.xlu1 %v4509_v2, %s5063_s7 }
 0xa7d   :  { %4446 = vrot.lane.b32.xlu0 %v4427_v41, %s5025_s10  ;;  %s5064_s10 = smov 112  }
 0xa80   :  { %4553 = vrot.lane.b32.xlu1 %v4519_v59, %s5063_s7 }
 0xa81   :  { %4547 = vrot.lane.b32.xlu0 %v4510_v57, %s5063_s7 }
 0xa84   :  { %4557 = vrot.lane.b32.xlu1 %v4526_v48, %s5063_s7  ;;  %v4311_v48 = vld [vmem:[#allocation11] sm:$0xff] }
 0xa85   :  { %4551 = vrot.lane.b32.xlu0 %v4511_v25, %s5063_s7  ;;  %v4312_v25 = vld [vmem:[#allocation11 + $0x8] sm:$0xff]  ;;  %v4317_v34 = vcombine.high %v4311_v48, %v4311_v48  ;;  %v4324_v8 = vrot.slane %v4311_v48, %v8450_v12 }
 0xa88   :  { %4561 = vrot.lane.b32.xlu1 %v4536_v43, %s5063_s7  ;;  %v4334_v43 = vcombine.high %v4312_v25, %v4312_v25 }
 0xa89   :  { %4555 = vrot.lane.b32.xlu0 %v4527_v17, %s5063_s7 }
 0xa8a   :  { %v4348_v32 = vrot.slane %v4334_v43, %v8450_v12 }
 0xa8c   :  { %4565 = vrot.lane.b32.xlu1 %v4543_v26, %s5063_s7  ;;  %v4331_v26 = vrot.slane %v4317_v34, %v8450_v12 }
 0xa8d   :  { %4559 = vrot.lane.b32.xlu0 %v4528_v45, %s5063_s7 }
 0xa8e   :  { %v4333_v7 = vcombine.high %v4331_v26, %v4331_v26 }
 0xa90   :  { %4659 = vrot.lane.b32.xlu1 %v4630_v31, %s5064_s10 }
 0xa91   :  { %4563 = vrot.lane.b32.xlu0 %v4544_v62, %s5063_s7  ;;  %v4332_v62 = vcombine.high %v4324_v8, %v4324_v8 }
 0xa94   :  { %4663 = vrot.lane.b32.xlu1 %v4631_v61, %s5064_s10 }
 0xa95   :  { %4657 = vrot.lane.b32.xlu0 %v4622_v3, %s5064_s10  ;;  %v4341_v3 = vrot.slane %v4312_v25, %v8450_v12 }
 0xa97   :  { %v4349_v61 = vcombine.high %v4341_v3, %v4341_v3 }
 0xa98   :  { %4667 = vrot.lane.b32.xlu1 %v4647_v20, %s5064_s10 }
 0xa99   :  { %4661 = vrot.lane.b32.xlu0 %v4629_v40, %s5064_s10  ;;  %v4794_v40 = vld.sshfl [vmem:[#allocation11 + $0x10] sm:$0x33 pattern:$0x76325410] }
 0xa9c   :  { %4671 = vrot.lane.b32.xlu1 %v4648_v60, %s5064_s10 }
 0xa9d   :  { %4665 = vrot.lane.b32.xlu0 %v4639_v50, %s5064_s10  ;;  %v4350_v50 = vcombine.high %v4348_v32, %v4348_v32 }
 0xaa0   :  { %4675 = vrot.lane.b32.xlu1 %v4656_v37, %s5064_s10 }
 0xaa1   :  { %4669 = vrot.lane.b32.xlu0 %v4646_v21, %s5064_s10 }
 0xaa5   :  { %4673 = vrot.lane.b32.xlu0 %v4796_v54, %s5064_s10 }
 0xae0   :  { %v3752_v22 = vpop.xlane.xlu1 %3751 }
 0xae1   :  { %v3753_v29 = vadd.f32 %v3752_v22, %v2700_v56 }
 0xae3   :  { %v4292_v53 = vmax.f32 %v4291_v13, %v3753_v29 }
 0xae4   :  { %v4431_v58 = vpop.permute.xlu1 %4430  ;;  %v4289_v63 = vpop.xlane.xlu0 %4288 }
 0xae5   :  { %v4290_v14 = vadd.f32 %v4289_v63, %v2700_v56  ;;  %v4358_v56 = vcombine.high %v4794_v40, %v4794_v40 }
 0xae7   :  { %v4293_v4 = vmax.f32 %v4292_v53, %v4290_v14 }
 0xae8   :  { %v4433_v24 = vpop.permute.xlu1 %4432  ;;  %v4429_v6 = vpop.permute.xlu0 %4428 }
 0xae9   :  { %v4294_v15 = vsub.f32 %v2701_v52, %v4293_v4  ;;  %v4297_v36 = vsub.f32 %v3226_v5, %v4293_v4  ;;  %v4300_v10 = vsub.f32 %v3753_v29, %v4293_v4  ;;  %v4303_v27 = vsub.f32 %v4290_v14, %v4293_v4 }
 0xaea   :  { %v4450_v60 = vsel %vm4448_vm0, %v4431_v58, %v4433_v24  ;;  %v4449_v54 = vsel %vm4448_vm0, %v4429_v6, %v4431_v58 }
 0xaeb   :  { %v4295_v28 = vmul.f32 1.442695, %v4294_v15  ;;  %v4298_v49 = vmul.f32 1.442695, %v4297_v36  ;;  %v4301_v16 = vmul.f32 1.442695, %v4300_v10 }
 0xaec   :  { %v4437_v0 = vpop.permute.xlu1 %4436  ;;  %v4435_v55 = vpop.permute.xlu0 %4434  ;;  %v4304_v18 = vmul.f32 1.442695, %v4303_v27 }
 0xaed   :  { %4874 = vpow2.f32 %v4295_v28  ;;  %v4451_v37 = vsel %vm4448_vm0, %v4433_v24, %v4435_v55  ;;  %v4452_v22 = vsel %vm4448_vm0, %v4435_v55, %v4437_v0 }
 0xaee   :  { %4876 = vpow2.f32 %v4298_v49 }
 0xaef   :  { %4878 = vpow2.f32 %v4301_v16 }
 0xaf0   :  { %v4441_v46 = vpop.permute.xlu1 %4440  ;;  %v4439_v47 = vpop.permute.xlu0 %4438  ;;  %4880 = vpow2.f32 %v4304_v18 }
 0xaf1   :  { %v4453_v1 = vsel %vm4448_vm0, %v4437_v0, %v4439_v47  ;;  %v4454_v52 = vsel %vm4448_vm0, %v4439_v47, %v4441_v46 }
 0xaf4   :  { %v4445_v35 = vpop.permute.xlu1 %4444  ;;  %v4443_v38 = vpop.permute.xlu0 %4442 }
 0xaf5   :  { %v4455_v29 = vsel %vm4448_vm0, %v4441_v46, %v4443_v38  ;;  %v4456_v13 = vsel %vm4448_vm0, %v4443_v38, %v4445_v35 }
 0xaf7   :  { %v4875_v33 = vpop.eup %4874 }
 0xaf8   :  { %v4877_v30 = vpop.eup %4876  ;;  %v4546_v9 = vpop.permute.xlu1 %4545 }
 0xaf9   :  { %v7935_v51 = vpop.permute.xlu0 %4446  ;;  %v4306_v44 = vadd.f32 %v4877_v30, %v4875_v33  ;;  %v4879_v2 = vpop.eup %4878 }
 0xafa   :  { %v7937_v11 = vpop.eup %4880  ;;  %v4457_v63 = vsel %vm4448_vm0, %v4445_v35, %v7935_v51 }
 0xafb   :  { %v4307_v41 = vadd.f32 %v4879_v2, %v4306_v44 }
 0xafc   :  { %v4550_v59 = vpop.permute.xlu1 %4549 }
 0xafd   :  { %v4548_v39 = vpop.permute.xlu0 %4547  ;;  %v4308_v57 = vadd.f32 %v7937_v11, %v4307_v41 }
 0xafe   :  { %v4568_v58 = vsel %vm4567_vm12, %v4546_v9, %v4548_v39  ;;  %v4569_v53 = vsel %vm4567_vm12, %v4548_v39, %v4550_v59 }
 0xaff   :  { %4882 = vrcp.f32 %v4308_v57 }
 0xb00   :  { %v4554_v19 = vpop.permute.xlu1 %4553 }
 0xb01   :  { %v4552_v17 = vpop.permute.xlu0 %4551 }
 0xb02   :  { %v4570_v14 = vsel %vm4567_vm12, %v4550_v59, %v4552_v17  ;;  %v4571_v4 = vsel %vm4567_vm12, %v4552_v17, %v4554_v19 }
 0xb04   :  { %v4558_v45 = vpop.permute.xlu1 %4557 }
 0xb05   :  { %v4556_v31 = vpop.permute.xlu0 %4555 }
 0xb06   :  { %v4572_v36 = vsel %vm4567_vm12, %v4554_v19, %v4556_v31  ;;  %v4573_v10 = vsel %vm4567_vm12, %v4556_v31, %v4558_v45 }
 0xb08   :  { %v7944_v42 = vpop.permute.xlu1 %4561 }
 0xb09   :  { %v4560_v20 = vpop.permute.xlu0 %4559  ;;  %v4883_v21 = vpop.eup %4882 }
 0xb0a   :  { %v4310_v23 = vmul.f32 %v4883_v21, %v4875_v33  ;;  %v4379_v5 = vmul.f32 %v4883_v21, %v4877_v30  ;;  %v7962_v15 = vmul.f32 %v4883_v21, %v4879_v2  ;;  %v7967_v27 = vsel %vm4567_vm12, %v4558_v45, %v4560_v20 }
 0xb0b   :  { %v7971_v43 = vmul.f32 %v4883_v21, %v7937_v11 }
 0xb0c   :  { %v7960_v24 = vpop.permute.xlu1 %4565  ;;  %v4370_v28 = vmul.f32 %v4332_v62, %v4310_v23  ;;  %v4469_v49 = vmul.f32 %v4450_v60, %v4379_v5  ;;  %v4369_v16 = vmul.f32 %v4324_v8, %v4310_v23  ;;  %v4468_v0 = vmul.f32 %v4449_v54, %v4379_v5 }
 0xb0d   :  { %v4564_v6 = vpop.permute.xlu0 %4563  ;;  %v4371_v55 = vmul.f32 %v4331_v26, %v4310_v23  ;;  %v4372_v18 = vmul.f32 %v4333_v7, %v4310_v23  ;;  %v4470_v46 = vmul.f32 %v4451_v37, %v4379_v5  ;;  %v4471_v47 = vmul.f32 %v4452_v22, %v4379_v5 }
 0xb0e   :  { %v4373_v35 = vmul.f32 %v4341_v3, %v4310_v23  ;;  %v4374_v38 = vmul.f32 %v4349_v61, %v4310_v23  ;;  %v4472_v33 = vmul.f32 %v4453_v1, %v4379_v5  ;;  %v4473_v30 = vmul.f32 %v4454_v52, %v4379_v5 }
 0xb0f   :  { %v4375_v2 = vmul.f32 %v4348_v32, %v4310_v23  ;;  %v4376_v41 = vmul.f32 %v4350_v50, %v4310_v23  ;;  %v4474_v59 = vmul.f32 %v4455_v29, %v4379_v5  ;;  %v4475_v39 = vmul.f32 %v4456_v13, %v4379_v5 }
 0xb10   :  { %v4660_v9 = vpop.permute.xlu1 %4659  ;;  %v4377_v57 = vmul.f32 %v4794_v40, %v4310_v23  ;;  %v4378_v48 = vmul.f32 %v4358_v56, %v4310_v23  ;;  %v4476_v25 = vmul.f32 %v4457_v63, %v4379_v5  ;;  %v4477_v34 = vmul.f32 %v7935_v51, %v4379_v5 }
 0xb11   :  { %v4658_v44 = vpop.permute.xlu0 %4657  ;;  %v4479_v19 = vadd.f32 %v4469_v49, %v4370_v28  ;;  %v4478_v17 = vadd.f32 %v4468_v0, %v4369_v16  ;;  %v4575_v8 = vsel %vm4567_vm12, %v4560_v20, %v7944_v42  ;;  %v4480_v26 = vadd.f32 %v4470_v46, %v4371_v55 }
 0xb12   :  { %v4481_v3 = vadd.f32 %v4471_v47, %v4372_v18  ;;  %v4482_v45 = vadd.f32 %v4472_v33, %v4373_v35  ;;  %v4483_v32 = vadd.f32 %v4473_v30, %v4374_v38  ;;  %v4484_v7 = vadd.f32 %v4474_v59, %v4375_v2 }
 0xb13   :  { %v4485_v40 = vadd.f32 %v4475_v39, %v4376_v41  ;;  %v4588_v61 = vmul.f32 %v4568_v58, %v7962_v15  ;;  %v4589_v51 = vmul.f32 %v4569_v53, %v7962_v15  ;;  %v4486_v50 = vadd.f32 %v4476_v25, %v4377_v57 }
 0xb14   :  { %v4664_v31 = vpop.permute.xlu1 %4663  ;;  %v4487_v11 = vadd.f32 %v4477_v34, %v4378_v48  ;;  %v4590_v21 = vmul.f32 %v4570_v14, %v7962_v15  ;;  %v4591_v60 = vmul.f32 %v4571_v4, %v7962_v15  ;;  %v4592_v20 = vmul.f32 %v4572_v36, %v7962_v15 }
 0xb15   :  { %v4662_v62 = vpop.permute.xlu0 %4661  ;;  %v4593_v54 = vmul.f32 %v4573_v10, %v7962_v15  ;;  %v4678_v37 = vsel %vm4677_vm15, %v4658_v44, %v4660_v9  ;;  %v4598_v23 = vadd.f32 %v4588_v61, %v4478_v17  ;;  %v4599_v5 = vadd.f32 %v4589_v51, %v4479_v19 }
 0xb16   :  { %v4679_v56 = vsel %vm4677_vm15, %v4660_v9, %v4662_v62  ;;  %v4600_v22 = vadd.f32 %v4590_v21, %v4480_v26  ;;  %v4576_v1 = vsel %vm4567_vm12, %v7944_v42, %v4564_v6  ;;  %v4697_v13 = vmul.f32 %v4678_v37, %v7971_v43 }
 0xb17   :  { %v4680_v63 = vsel %vm4677_vm15, %v4662_v62, %v4664_v31  ;;  %v4698_v58 = vmul.f32 %v4679_v56, %v7971_v43  ;;  %v4601_v14 = vadd.f32 %v4591_v60, %v4481_v3  ;;  %v4577_v4 = vsel %vm4567_vm12, %v4564_v6, %v7960_v24 }
 0xb18   :  { %v4668_v52 = vpop.permute.xlu1 %4667  ;;  %v4699_v36 = vmul.f32 %v4680_v63, %v7971_v43  ;;  %v4596_v42 = vmul.f32 %v4576_v1, %v7962_v15  ;;  %v4707_v28 = vadd.f32 %v4697_v13, %v4598_v23  ;;  %v4594_v0 = vmul.f32 %v7967_v27, %v7962_v15 }
 0xb19   :  { %v4666_v29 = vpop.permute.xlu0 %4665  ;;  %v4708_v49 = vadd.f32 %v4698_v58, %v4599_v5  ;;  %v4595_v55 = vmul.f32 %v4575_v8, %v7962_v15  ;;  %v4597_v24 = vmul.f32 %v4577_v4, %v7962_v15  ;;  %v4603_v30 = vadd.f32 %v4593_v54, %v4483_v32 }
 0xb1a   :  { %v4681_v53 = vsel %vm4677_vm15, %v4664_v31, %v4666_v29  ;;  %v4682_v16 = vsel %vm4677_vm15, %v4666_v29, %v4668_v52  ;;  %v4709_v18 = vadd.f32 %v4699_v36, %v4600_v22  ;;  %v4602_v27 = vadd.f32 %v4592_v20, %v4482_v45 }
 0xb1b   :  { %v4700_v10 = vmul.f32 %v4681_v53, %v7971_v43  ;;  %v4727_v6 = vcombine.low %v4707_v28, %v4708_v49  ;;  %v4701_v9 = vmul.f32 %v4682_v16, %v7971_v43  ;;  %v4604_v41 = vadd.f32 %v4594_v0, %v4484_v7 }
 0xb1c   :  { %v4672_v47 = vpop.permute.xlu1 %4671  ;;  %v4605_v59 = vadd.f32 %v4595_v55, %v4485_v40  ;;  %v4606_v39 = vadd.f32 %v4596_v42, %v4486_v50  ;;  %v4607_v17 = vadd.f32 %v4597_v24, %v4487_v11 }
 0xb1d   :  { %v4710_v46 = vadd.f32 %v4700_v10, %v4601_v14  ;;  %v4670_v35 = vpop.permute.xlu0 %4669  ;;  %v4735_v34 = vrot.slane %v4727_v6, %v8450_v12  ;;  %v4711_v45 = vadd.f32 %v4701_v9, %v4602_v27 }
 0xb1e   :  { %v4683_v38 = vsel %vm4677_vm15, %v4668_v52, %v4670_v35  ;;  %v4684_v33 = vsel %vm4677_vm15, %v4670_v35, %v4672_v47 }
 0xb1f   :  { %v4728_v44 = vcombine.low %v4709_v18, %v4710_v46  ;;  %v4702_v2 = vmul.f32 %v4683_v38, %v7971_v43  ;;  %v4703_v57 = vmul.f32 %v4684_v33, %v7971_v43 }
 0xb20   :  { %v4676_v25 = vpop.permute.xlu1 %4675 }
 0xb21   :  { %v4712_v48 = vadd.f32 %v4702_v2, %v4603_v30  ;;  %v4674_v15 = vpop.permute.xlu0 %4673  ;;  %v4742_v19 = vrot.slane %v4728_v44, %v8450_v12  ;;  %v4706_v8 = vmul.f32 %v4676_v25, %v7971_v43  ;;  %v4713_v40 = vadd.f32 %v4703_v57, %v4604_v41 }
 0xb22   :  { %v4685_v26 = vsel %vm4677_vm15, %v4672_v47, %v4674_v15  ;;  %v4686_v3 = vsel %vm4677_vm15, %v4674_v15, %v4676_v25 }
 0xb23   :  { %v4704_v32 = vmul.f32 %v4685_v26, %v7971_v43  ;;  %v4705_v31 = vmul.f32 %v4686_v3, %v7971_v43  ;;  %v4743_v62 = vcombine.low %v4735_v34, %v4742_v19  ;;  %v4716_v7 = vadd.f32 %v4706_v8, %v4607_v17 }
 0xb24   :  { %v4744_v61 = vcombine.low %v4711_v45, %v4712_v48 }
 0xb25   :  { %v4714_v51 = vadd.f32 %v4704_v32, %v4605_v59  ;;  %v4715_v50 = vadd.f32 %v4705_v31, %v4606_v39  ;;  %4772 = vst [vmem:[#allocation14] sm:$0xff] %v4743_v62 }
 0xb26   :  { %v4752_v60 = vrot.slane %v4744_v61, %v8450_v12 }
 0xb27   :  { %v4745_v21 = vcombine.low %v4713_v40, %v4714_v51  ;;  %v4761_v11 = vcombine.low %v4715_v50, %v4716_v7 }
 0xb29   :  { %v4759_v20 = vrot.slane %v4745_v21, %v8450_v12  ;;  %v4768_v54 = vrot.slane %v4761_v11, %v8450_v12 }
 0xb2b   :  { %v4760_v37 = vcombine.low %v4752_v60, %v4759_v20  ;;  %4774 = vst.msk [vmem:[#allocation14 + $0x10] sm:$0xf] %vm5303_vm2, %v4768_v54 }
 0xb2d   :  { %4773 = vst [vmem:[#allocation14 + $0x8] sm:$0xff] %v4760_v37 }
 0xb2e   :  { %5001 = shalt.err (!%p4998_p11)
}
 0xb2f   :  { %s5002_s1 = scalar_lea.hbm %s8034_s6, 320 }
 0xb30   :  { %p5003_p12 = scmp.ne.s32.totalorder %s8034_s6, %s5002_s1  ;;  %p5006_p13 = scmp.lt.u32.totalorder %s5002_s1, %s8034_s6 }
 0xb32   :  { %p5008_p0 = pnand %p5006_p13, %p5003_p12 }
 0xb34   :  { %5011 = shalt.err (!%p5008_p0)
}
 0xb35   :  { %4784 = dma.vmem_to_hbm [thread:$0]  %s4782_s16, 320, %s8034_s6, [#allocation6]  }
 0xb36   :  { %5020 = dma.done.wait [#allocation6], 320  }
 0xb37   :  { %5021 = vsyncadd [#allocation6], 4294966976 }
 0xb38   :  { %4788 = vsyncpa [#allocation5], 1 }
 0xb39   :  { %4789 = vsyncpa [#allocation10], 1 }
 0xb3a   :  { %4790 = vsyncpa [#allocation13], 1 }
 0xb3b   :  { %4791 = vsyncpa [#allocation6], 1 }
 0xb3c   :  { %4792 = vsyncpa [#allocation7], 1 }

</bundles_post_ra>
